<compile_context>
chip_gen: v7x
topology: tpu7x:2x2x1
jax: 0.10.0
libtpu: 0.0.40
codegen_flags: <defaults>
</compile_context>

<pallas_src>
import functools

import numpy as np

import jax
import jax.numpy as jnp
from jax.experimental import pallas as pl
from jax.experimental.pallas import tpu as pltpu


# ----------------------------------------------------------------------------
# Pallas kernel: fused encoder forward
#   h1  = relu(x  @ W1 + b1)        (conv1 as dense matmul, avg folded into b1)
#   h2  = relu(h1 @ W2 + b2)        (conv2 as dense matmul)
#   out = h2 @ Wh' + bh             (Wh' = n_iter*W_head, bh = avg_latent + n_iter*b_head)
# All intermediates stay in VMEM / vregs; only `out` is stored to HBM.
# ----------------------------------------------------------------------------
def _fused_encoder_kernel(x_ref, w1_ref, b1_ref, w2_ref, b2_ref,
                          wh_ref, bh_ref, o_ref):
    h1 = jnp.dot(x_ref[...], w1_ref[...], preferred_element_type=jnp.float32)
    h1 = jnp.maximum(h1 + b1_ref[...], 0.0)                      # f32 epilogue

    h2 = jnp.dot(h1.astype(jnp.bfloat16), w2_ref[...],
                 preferred_element_type=jnp.float32)
    h2 = jnp.maximum(h2 + b2_ref[...], 0.0)                      # f32 epilogue

    out = jnp.dot(h2.astype(jnp.bfloat16), wh_ref[...],
                  preferred_element_type=jnp.float32)
    o_ref[...] = (out + bh_ref[...]).astype(o_ref.dtype)


def stylegan_encoder_forward(img_nchw, dense):
    """img_nchw: [B, C, H, W] -> latents [B, n_styles, latent_dim]."""
    B = img_nchw.shape[0]
    x = img_nchw.reshape(B, -1).astype(jnp.bfloat16)      # CHW-flatten, bf16 operand

    d_in = x.shape[1]
    d_h1 = dense["w1"].shape[1]
    d_h2 = dense["w2"].shape[1]
    d_out = dense["wh"].shape[1]

    # Row tile: sublane-aligned; larger batches get 256-row blocks so the grid
    # pipelines and can split across TensorCores ("parallel").
    tm = 8 if B <= 8 else 256
    b_pad = -(-B // tm) * tm
    if b_pad != B:
        x = jnp.pad(x, ((0, b_pad - B), (0, 0)))

    out = pl.pallas_call(
        _fused_encoder_kernel,
        out_shape=jax.ShapeDtypeStruct((b_pad, d_out), jnp.float32),
        grid=(b_pad // tm,),
        in_specs=[
            pl.BlockSpec((tm, d_in), lambda i: (i, 0)),          # activations
            pl.BlockSpec((d_in, d_h1), lambda i: (0, 0)),        # W1 (resident)
            pl.BlockSpec((1, d_h1), lambda i: (0, 0)),           # b1 (+avg fold)
            pl.BlockSpec((d_h1, d_h2), lambda i: (0, 0)),        # W2 (resident)
            pl.BlockSpec((1, d_h2), lambda i: (0, 0)),           # b2
            pl.BlockSpec((d_h2, d_out), lambda i: (0, 0)),       # n_iter * W_head
            pl.BlockSpec((1, d_out), lambda i: (0, 0)),          # avg_latent + n*b_head
        ],
        out_specs=pl.BlockSpec((tm, d_out), lambda i: (i, 0)),   # lane-dense (512)
        compiler_params=pltpu.CompilerParams(
            dimension_semantics=("parallel",)),
    )(x, dense["w1"], dense["b1"], dense["w2"], dense["b2"],
      dense["wh"], dense["bh"])

    return out[:B].reshape(B, dense["n_styles"], dense["latent_dim"])


# ----------------------------------------------------------------------------
# One-time setup: lower each 3x3/stride-2/pad-1 conv to a dense [flat_in, flat_out]
# operator and fold avg_image / biases / avg_latent / n_iter into weights & biases.
# ----------------------------------------------------------------------------
def _conv_to_dense(w_hwio, H, W, *, stride=2, pad=1, chw_input=False):
    """w_hwio: [kh, kw, cin, cout].  Returns dense [H*W*cin, OH*OW*cout] and (OH, OW).

    Input flatten order is (c, y, x) if chw_input else (y, x, c); output order is
    (oy, ox, cout) — matching NHWC conv + .reshape(B, -1)."""
    kh, kw, cin, cout = w_hwio.shape
    OH = (H + 2 * pad - kh) // stride + 1
    OW = (W + 2 * pad - kw) // stride + 1
    dense = np.zeros((H * W * cin, OH * OW * cout), np.float32)
    for oy in range(OH):
        for ox in range(OW):
            c0 = (oy * OW + ox) * cout
            for di in range(kh):
                y = stride * oy - pad + di
                if not (0 <= y < H):
                    continue
                for dj in range(kw):
                    x = stride * ox - pad + dj
                    if not (0 <= x < W):
                        continue
                    for ci in range(cin):
                        r = (ci * H + y) * W + x if chw_input else (y * W + x) * cin + ci
                        dense[r, c0:c0 + cout] = w_hwio[di, dj, ci]
    return dense, (OH, OW)


def prepare_dense_params(params, *, in_ch, H, W, n_iter_batch=1):
    get = lambda k: np.asarray(jax.device_get(params[k]), np.float32)
    c1 = params["b1"].shape[0]
    c2 = params["b2"].shape[0]
    n_styles, latent_dim = params["avg_latent"].shape

    w1 = get("w1").reshape(3, 3, 2 * in_ch, c1)           # HWIO over concat channels
    w1_img, w1_avg = w1[:, :, :in_ch, :], w1[:, :, in_ch:, :]
    w2 = get("w2").reshape(3, 3, c1, c2)

    # conv1: dense operator on the image half; avg_image half folded into the bias.
    W1, (oh1, ow1) = _conv_to_dense(w1_img, H, W, chw_input=True)
    W1_avg, _ = _conv_to_dense(w1_avg, H, W, chw_input=True)
    avg_flat = get("avg_image").reshape(1, -1)            # CHW flatten
    b1 = avg_flat @ W1_avg + np.tile(get("b1"), oh1 * ow1)[None]

    # conv2: dense operator on h1 (flattened (oy, ox, c) order).
    W2, (oh2, ow2) = _conv_to_dense(w2, oh1, ow1, chw_input=False)
    b2 = np.tile(get("b2"), oh2 * ow2)[None]

    # head: residual-updated from avg_latent, hoisted out of the n_iter loop
    # (features loop-invariant -> latent = avg_latent + n * (flat @ W_head + b_head)).
    # Fold the n_iter scale directly into the head weight and bias (kernel stays
    # a pure matmul + bias epilogue).
    Wh = float(n_iter_batch) * get("w_head")
    bh = get("avg_latent").reshape(1, -1) + float(n_iter_batch) * get("b_head")[None]

    return {
        "w1": jnp.asarray(W1, jnp.bfloat16),
        "b1": jnp.asarray(b1, jnp.float32),
        "w2": jnp.asarray(W2, jnp.bfloat16),
        "b2": jnp.asarray(b2, jnp.float32),
        "wh": jnp.asarray(Wh, jnp.bfloat16),
        "bh": jnp.asarray(bh, jnp.float32),
        "n_styles": int(n_styles),
        "latent_dim": int(latent_dim),
    }


# ----------------------------------------------------------------------------
# Deterministic parameter init (shapes implied by the encoder structure)
# ----------------------------------------------------------------------------
def init_params(key, in_ch=4, H=16, W=16, c1=16, c2=32, n_styles=8, latent_dim=64):
    ks = jax.random.split(key, 8)
    flat_dim = c2 * (H // 4) * (W // 4)
    return {
        "avg_image": 0.1 * jax.random.normal(ks[0], (in_ch, H, W), jnp.float32),
        "avg_latent": 0.1 * jax.random.normal(ks[1], (n_styles, latent_dim), jnp.float32),
        "w1": 0.05 * jax.random.normal(ks[2], (3 * 3 * 2 * in_ch, c1), jnp.float32),
        "b1": jnp.zeros((c1,), jnp.float32),
        "w2": 0.05 * jax.random.normal(ks[3], (3 * 3 * c1, c2), jnp.float32),
        "b2": jnp.zeros((c2,), jnp.float32),
        "w_head": 0.05 * jax.random.normal(ks[4], (flat_dim, n_styles * latent_dim), jnp.float32),
        "b_head": jnp.zeros((n_styles * latent_dim,), jnp.float32),
    }


# ----------------------------------------------------------------------------
# Pure-JAX reference (f32, per-sample residual update) for correctness checking
# ----------------------------------------------------------------------------
def reference_forward(img_nchw, params, n_iter_batch=1):
    B = img_nchw.shape[0]
    img = jnp.transpose(img_nchw, (0, 2, 3, 1))
    avg = jnp.broadcast_to(jnp.transpose(params["avg_image"], (1, 2, 0))[None], img.shape)
    x = jnp.concatenate([img, avg], axis=-1)

    def conv(h, w_flat, b):
        w = w_flat.reshape(3, 3, -1, b.shape[0])
        y = jax.lax.conv_general_dilated(
            h, w, window_strides=(2, 2), padding=((1, 1), (1, 1)),
            dimension_numbers=("NHWC", "HWIO", "NHWC"))
        return jnp.maximum(y + b, 0.0)

    h1 = conv(x, params["w1"], params["b1"])
    h2 = conv(h1, params["w2"], params["b2"])
    flat = h2.reshape(B, -1)
    delta = flat @ params["w_head"] + params["b_head"]
    n_styles, latent_dim = params["avg_latent"].shape
    latent = jnp.broadcast_to(params["avg_latent"][None], (B, n_styles, latent_dim))
    # TODO(synk): real ReStyle feeds the decoded previous image back each iteration;
    # the decoder is checkpoint-only, so the feedback input stays avg_image.
    for _ in range(n_iter_batch):
        latent = latent + delta.reshape(B, n_styles, latent_dim)
    return latent


if __name__ == "__main__":
    key = jax.random.PRNGKey(0)
    k_img, k_par = jax.random.split(key)

    B, C, H, W = 2, 4, 16, 16
    img = jax.random.normal(k_img, (B, C, H, W), jnp.float32)
    params = init_params(k_par, in_ch=C, H=H, W=W)
    dense = prepare_dense_params(params, in_ch=C, H=H, W=W, n_iter_batch=1)

    latents = stylegan_encoder_forward(img, dense)
    latents = jax.block_until_ready(latents)

    assert latents.shape == (B, 8, 64), latents.shape
    assert latents.dtype == jnp.float32
    assert bool(jnp.all(jnp.isfinite(latents)))

    ref = reference_forward(img, params, n_iter_batch=1)
    max_err = float(jnp.max(jnp.abs(latents - ref)))
    assert bool(jnp.allclose(latents, ref, atol=2e-2, rtol=5e-2)), max_err

    print("KERNEL_OK")
</pallas_src>

<mosaic_0001>
module attributes {stable_mosaic.version = 11 : i64} {
  func.func @_fused_encoder_kernel(%arg0: i32, %arg1: memref<8x1024xbf16, #tpu.memory_space<vmem>>, %arg2: memref<1024x1024xbf16, #tpu.memory_space<vmem>>, %arg3: memref<1x1024xf32, #tpu.memory_space<vmem>>, %arg4: memref<1024x512xbf16, #tpu.memory_space<vmem>>, %arg5: memref<1x512xf32, #tpu.memory_space<vmem>>, %arg6: memref<512x512xbf16, #tpu.memory_space<vmem>>, %arg7: memref<1x512xf32, #tpu.memory_space<vmem>>, %arg8: memref<8x512xf32, #tpu.memory_space<vmem>>) attributes {dimension_semantics = [#tpu.dimension_semantics<parallel>], iteration_bounds = array<i64: 1>, scalar_prefetch = 0 : i64, scratch_operands = 0 : i64, tpu.core_type = #tpu.core_type<tc>, window_params = [{transform_indices = @transform_0, window_bounds = array<i64: 8, 1024>}, {pipeline_mode = #tpu.pipeline_mode<synchronous>, transform_indices = @transform_1, window_bounds = array<i64: 1024, 1024>}, {pipeline_mode = #tpu.pipeline_mode<synchronous>, transform_indices = @transform_2, window_bounds = array<i64: 1, 1024>}, {pipeline_mode = #tpu.pipeline_mode<synchronous>, transform_indices = @transform_3, window_bounds = array<i64: 1024, 512>}, {pipeline_mode = #tpu.pipeline_mode<synchronous>, transform_indices = @transform_4, window_bounds = array<i64: 1, 512>}, {pipeline_mode = #tpu.pipeline_mode<synchronous>, transform_indices = @transform_5, window_bounds = array<i64: 512, 512>}, {pipeline_mode = #tpu.pipeline_mode<synchronous>, transform_indices = @transform_6, window_bounds = array<i64: 1, 512>}, {transform_indices = @transform_7, window_bounds = array<i64: 8, 512>}]} {
    %c0 = arith.constant 0 : index
    %c0_0 = arith.constant 0 : index
    %0 = vector.load %arg1[%c0, %c0_0] : memref<8x1024xbf16, #tpu.memory_space<vmem>>, vector<8x1024xbf16>
    %c0_1 = arith.constant 0 : index
    %c0_2 = arith.constant 0 : index
    %1 = vector.load %arg2[%c0_1, %c0_2] : memref<1024x1024xbf16, #tpu.memory_space<vmem>>, vector<1024x1024xbf16>
    %cst = arith.constant dense<0.000000e+00> : vector<8x1024xf32>
    %2 = tpu.matmul %0, %1, %cst {dimension_numbers = #tpu.dot_dimension_numbers<[1], [0], [0], [1], [0, 0, 1, 1], [], []>} : vector<8x1024xbf16>, vector<1024x1024xbf16>, vector<8x1024xf32> -> vector<8x1024xf32>
    %c0_3 = arith.constant 0 : index
    %c0_4 = arith.constant 0 : index
    %3 = vector.load %arg3[%c0_3, %c0_4] : memref<1x1024xf32, #tpu.memory_space<vmem>>, vector<1x1024xf32>
    %4 = vector.broadcast %3 : vector<1x1024xf32> to vector<8x1024xf32>
    %5 = arith.addf %2, %4 : vector<8x1024xf32>
    %cst_5 = arith.constant 0.000000e+00 : f32
    %6 = vector.broadcast %cst_5 : f32 to vector<8x1024xf32>
    %7 = arith.maximumf %5, %6 : vector<8x1024xf32>
    %8 = arith.truncf %7 : vector<8x1024xf32> to vector<8x1024xbf16>
    %c0_6 = arith.constant 0 : index
    %c0_7 = arith.constant 0 : index
    %9 = vector.load %arg4[%c0_6, %c0_7] : memref<1024x512xbf16, #tpu.memory_space<vmem>>, vector<1024x512xbf16>
    %cst_8 = arith.constant dense<0.000000e+00> : vector<8x512xf32>
    %10 = tpu.matmul %8, %9, %cst_8 {dimension_numbers = #tpu.dot_dimension_numbers<[1], [0], [0], [1], [0, 0, 1, 1], [], []>} : vector<8x1024xbf16>, vector<1024x512xbf16>, vector<8x512xf32> -> vector<8x512xf32>
    %c0_9 = arith.constant 0 : index
    %c0_10 = arith.constant 0 : index
    %11 = vector.load %arg5[%c0_9, %c0_10] : memref<1x512xf32, #tpu.memory_space<vmem>>, vector<1x512xf32>
    %12 = vector.broadcast %11 : vector<1x512xf32> to vector<8x512xf32>
    %13 = arith.addf %10, %12 : vector<8x512xf32>
    %cst_11 = arith.constant 0.000000e+00 : f32
    %14 = vector.broadcast %cst_11 : f32 to vector<8x512xf32>
    %15 = arith.maximumf %13, %14 : vector<8x512xf32>
    %16 = arith.truncf %15 : vector<8x512xf32> to vector<8x512xbf16>
    %c0_12 = arith.constant 0 : index
    %c0_13 = arith.constant 0 : index
    %17 = vector.load %arg6[%c0_12, %c0_13] : memref<512x512xbf16, #tpu.memory_space<vmem>>, vector<512x512xbf16>
    %cst_14 = arith.constant dense<0.000000e+00> : vector<8x512xf32>
    %18 = tpu.matmul %16, %17, %cst_14 {dimension_numbers = #tpu.dot_dimension_numbers<[1], [0], [0], [1], [0, 0, 1, 1], [], []>} : vector<8x512xbf16>, vector<512x512xbf16>, vector<8x512xf32> -> vector<8x512xf32>
    %c0_15 = arith.constant 0 : index
    %c0_16 = arith.constant 0 : index
    %19 = vector.load %arg7[%c0_15, %c0_16] : memref<1x512xf32, #tpu.memory_space<vmem>>, vector<1x512xf32>
    %20 = vector.broadcast %19 : vector<1x512xf32> to vector<8x512xf32>
    %21 = arith.addf %18, %20 : vector<8x512xf32>
    %c0_17 = arith.constant 0 : index
    %c0_18 = arith.constant 0 : index
    %22 = vector.load %arg8[%c0_17, %c0_18] : memref<8x512xf32, #tpu.memory_space<vmem>>, vector<8x512xf32>
    tpu.vector_store %arg8[%c0_17, %c0_18], %21 {strides = array<i32>} : memref<8x512xf32, #tpu.memory_space<vmem>>, vector<8x512xf32>,
    return
  }
  func.func @transform_0(%arg0: i32) -> (i32, i32) {
    %c0_i32 = arith.constant 0 : i32
    %c0_i32_0 = arith.constant 0 : i32
    return %arg0, %c0_i32 : i32, i32
  }
  func.func @transform_1(%arg0: i32) -> (i32, i32) {
    %c0_i32 = arith.constant 0 : i32
    %c0_i32_0 = arith.constant 0 : i32
    %c0_i32_1 = arith.constant 0 : i32
    return %c0_i32, %c0_i32_0 : i32, i32
  }
  func.func @transform_2(%arg0: i32) -> (i32, i32) {
    %c0_i32 = arith.constant 0 : i32
    %c0_i32_0 = arith.constant 0 : i32
    %c0_i32_1 = arith.constant 0 : i32
    return %c0_i32, %c0_i32_0 : i32, i32
  }
  func.func @transform_3(%arg0: i32) -> (i32, i32) {
    %c0_i32 = arith.constant 0 : i32
    %c0_i32_0 = arith.constant 0 : i32
    %c0_i32_1 = arith.constant 0 : i32
    return %c0_i32, %c0_i32_0 : i32, i32
  }
  func.func @transform_4(%arg0: i32) -> (i32, i32) {
    %c0_i32 = arith.constant 0 : i32
    %c0_i32_0 = arith.constant 0 : i32
    %c0_i32_1 = arith.constant 0 : i32
    return %c0_i32, %c0_i32_0 : i32, i32
  }
  func.func @transform_5(%arg0: i32) -> (i32, i32) {
    %c0_i32 = arith.constant 0 : i32
    %c0_i32_0 = arith.constant 0 : i32
    %c0_i32_1 = arith.constant 0 : i32
    return %c0_i32, %c0_i32_0 : i32, i32
  }
  func.func @transform_6(%arg0: i32) -> (i32, i32) {
    %c0_i32 = arith.constant 0 : i32
    %c0_i32_0 = arith.constant 0 : i32
    %c0_i32_1 = arith.constant 0 : i32
    return %c0_i32, %c0_i32_0 : i32, i32
  }
  func.func @transform_7(%arg0: i32) -> (i32, i32) {
    %c0_i32 = arith.constant 0 : i32
    %c0_i32_0 = arith.constant 0 : i32
    return %arg0, %c0_i32 : i32, i32
  }
}

</mosaic_0001>

<bundles_post_ra>
// kernel: tpu_custom_call.1
= control target key start
LH: loop header
LB: loop body
LE: loop exit
PB: predicated region body
PF: predicated region fallthrough
CT: control target
= control target key end

     0   :  { %12 = vsyncpa [#allocation3], 0  ;;  %s8868_s0 = inlined_call_operand.hbm [shape: bf16[8,1024], index: 0, kind: input, shape index: {}]   ;;  %s8869_s1 = inlined_call_operand.hbm [shape: bf16[1024,1024], index: 1, kind: input, shape index: {}]   ;;  %s8870_s2 = inlined_call_operand.hbm [shape: f32[1,1024], index: 2, kind: input, shape index: {}]   ;;  %s8871_s3 = inlined_call_operand.hbm [shape: bf16[1024,512], index: 3, kind: input, shape index: {}]   ;;  %s8872_s4 = inlined_call_operand.hbm [shape: f32[1,512], index: 4, kind: input, shape index: {}]   ;;  %s8873_s5 = inlined_call_operand.hbm [shape: bf16[512,512], index: 5, kind: input, shape index: {}]   ;;  %s8874_s6 = inlined_call_operand.hbm [shape: f32[1,512], index: 6, kind: input, shape index: {}]   ;;  %s8875_s7 = inlined_call_operand.hbm [shape: f32[8,512], index: 7, kind: output, shape index: {}]  }
   0x1   :  { %13 = vsyncpa [#allocation6], 0 }
   0x2   :  { %14 = vsyncpa [#allocation9], 0 }
   0x3   :  { %15 = vsyncpa [#allocation12], 0 }
   0x4   :  { %16 = vsyncpa [#allocation4], 0  ;;  %s8585_s24 = smov [#allocation5]   ;;  %s8399_s28 = scalar_lea.hbm %s8869_s1, 65536 }
   0x5   :  { %s32_s25 = sshll.u32 %s8585_s24, 4  ;;  %p8400_p0 = scmp.ne.s32.totalorder %s8869_s1, %s8399_s28  ;;  %s33_s25 = int_to_ptr.vmem [resolvable:$true] %s32_s25 }
   0x6   :  { %p8403_p1 = scmp.lt.u32.totalorder %s8399_s28, %s8869_s1 }
   0x8   :  { %p8405_p2 = pnand %p8403_p1, %p8400_p0 }
   0xa   :  { %8408 = shalt.err (!%p8405_p2)
}
   0xb   :  { %s8409_s10 = scalar_lea.vmem %s33_s25, 65536  ;;  %p8414_p4 = scmp.lt.s32.totalorder %s33_s25, %s33_s25 }
   0xc   :  { %p8410_p3 = scmp.ne.s32.totalorder %s33_s25, %s8409_s10  ;;  %p8415_p5 = scmp.lt.s32.totalorder %s8409_s10, %s8409_s10 }
   0xe   :  { %p8416_p6 = por %p8415_p5, %p8414_p4 }
  0x10   :  { %p8417_p7 = pnand %p8416_p6, %p8410_p3 }
  0x12   :  { %8420 = shalt.err (!%p8417_p7)
}
  0x13   :  { %s8586_s11 = smov 512   ;;  %s8587_s12 = smov 32  }
  0x14   :  { %38 = dma.hbm_to_vmem [thread:$0]  %s8869_s1, 65536, %s33_s25, [#allocation6], %s8586_s11, %s8586_s11, %s8587_s12  }
  0x15   :  { %s8588_s15 = smov [#allocation8]   ;;  %s8421_s19 = scalar_lea.hbm %s8871_s3, 32768 }
  0x16   :  { %s54_s16 = sshll.u32 %s8588_s15, 4  ;;  %p8422_p8 = scmp.ne.s32.totalorder %s8871_s3, %s8421_s19  ;;  %s55_s16 = int_to_ptr.vmem [resolvable:$true] %s54_s16 }
  0x17   :  { %p8425_p9 = scmp.lt.u32.totalorder %s8421_s19, %s8871_s3 }
  0x19   :  { %p8427_p10 = pnand %p8425_p9, %p8422_p8 }
  0x1b   :  { %8430 = shalt.err (!%p8427_p10)
}
  0x1c   :  { %s8431_s24 = scalar_lea.vmem %s55_s16, 32768  ;;  %p8436_p12 = scmp.lt.s32.totalorder %s55_s16, %s55_s16 }
  0x1d   :  { %p8432_p11 = scmp.ne.s32.totalorder %s55_s16, %s8431_s24  ;;  %p8437_p13 = scmp.lt.s32.totalorder %s8431_s24, %s8431_s24 }
  0x1f   :  { %p8438_p0 = por %p8437_p13, %p8436_p12 }
  0x21   :  { %p8439_p1 = pnand %p8438_p0, %p8432_p11 }
  0x23   :  { %8442 = shalt.err (!%p8439_p1)
}
  0x24   :  { %s8589_s1 = smov 256   ;;  %s8590_s25 = smov 16  }
  0x25   :  { %60 = dma.hbm_to_vmem [thread:$0]  %s8871_s3, 32768, %s55_s16, [#allocation9], %s8589_s1, %s8589_s1, %s8590_s25  }
  0x26   :  { %s8591_s28 = smov [#allocation11]   ;;  %s8592_s30 = smov [#allocation2]  }
  0x27   :  { %s76_s29 = sshll.u32 %s8591_s28, 4  ;;  %s23_s8 = sshll.u32 %s8592_s30, 4  ;;  %s77_s29 = int_to_ptr.vmem [resolvable:$true] %s76_s29  ;;  %s24_s8 = int_to_ptr.vmem [resolvable:$true] %s23_s8 }
  0x28   :  { %s8443_s11 = scalar_lea.hbm %s8873_s5, 16384 }
  0x29   :  { %p8444_p2 = scmp.ne.s32.totalorder %s8873_s5, %s8443_s11  ;;  %p8447_p3 = scmp.lt.u32.totalorder %s8443_s11, %s8873_s5 }
  0x2b   :  { %p8449_p4 = pnand %p8447_p3, %p8444_p2 }
  0x2d   :  { %8452 = shalt.err (!%p8449_p4)
}
  0x2e   :  { %s8453_s3 = scalar_lea.vmem %s77_s29, 16384  ;;  %p8458_p6 = scmp.lt.s32.totalorder %s77_s29, %s77_s29 }
  0x2f   :  { %p8454_p5 = scmp.ne.s32.totalorder %s77_s29, %s8453_s3  ;;  %p8459_p7 = scmp.lt.s32.totalorder %s8453_s3, %s8453_s3 }
  0x31   :  { %p8460_p8 = por %p8459_p7, %p8458_p6 }
  0x33   :  { %p8461_p9 = pnand %p8460_p8, %p8454_p5 }
  0x35   :  { %8464 = shalt.err (!%p8461_p9)
}
  0x36   :  { %82 = dma.hbm_to_vmem [thread:$0]  %s8873_s5, 16384, %s77_s29, [#allocation12], %s8589_s1, %s8589_s1, %s8590_s25  }
  0x37   :  { %s8465_s20 = scalar_lea.hbm %s8868_s0, 512 }
  0x38   :  { %p8466_p10 = scmp.ne.s32.totalorder %s8868_s0, %s8465_s20  ;;  %p8469_p11 = scmp.lt.u32.totalorder %s8465_s20, %s8868_s0 }
  0x3a   :  { %p8471_p12 = pnand %p8469_p11, %p8466_p10 }
  0x3c   :  { %8474 = shalt.err (!%p8471_p12)
}
  0x3d   :  { %s8475_s26 = scalar_lea.vmem %s24_s8, 512  ;;  %p8480_p0 = scmp.lt.s32.totalorder %s24_s8, %s24_s8 }
  0x3e   :  { %p8476_p13 = scmp.ne.s32.totalorder %s24_s8, %s8475_s26  ;;  %p8481_p1 = scmp.lt.s32.totalorder %s8475_s26, %s8475_s26 }
  0x40   :  { %p8482_p2 = por %p8481_p1, %p8480_p0 }
  0x42   :  { %p8483_p3 = pnand %p8482_p2, %p8476_p13 }
  0x44   :  { %8486 = shalt.err (!%p8483_p3)
}
  0x45   :  { %26 = dma.hbm_to_vmem [thread:$0]  %s8868_s0, 512, %s24_s8, [#allocation3]  }
  0x46   :  { %s8593_s25 = smov [#allocation7]   ;;  %s8594_s28 = smov [#allocation10]  }
  0x47   :  { %s45_s27 = sshll.u32 %s8593_s25, 4  ;;  %s67_s29 = sshll.u32 %s8594_s28, 4  ;;  %s46_s27 = int_to_ptr.vmem [resolvable:$true] %s45_s27  ;;  %s68_s29 = int_to_ptr.vmem [resolvable:$true] %s67_s29 }
  0x48   :  { %s8487_s10 = scalar_lea.hbm %s8870_s2, 128 }
  0x49   :  { %p8488_p4 = scmp.ne.s32.totalorder %s8870_s2, %s8487_s10  ;;  %p8491_p5 = scmp.lt.u32.totalorder %s8487_s10, %s8870_s2 }
  0x4b   :  { %p8493_p6 = pnand %p8491_p5, %p8488_p4 }
  0x4d   :  { %8496 = shalt.err (!%p8493_p6)
}
  0x4e   :  { %s8497_s0 = scalar_lea.vmem %s46_s27, 128  ;;  %p8502_p8 = scmp.lt.s32.totalorder %s46_s27, %s46_s27 }
  0x4f   :  { %p8498_p7 = scmp.ne.s32.totalorder %s46_s27, %s8497_s0  ;;  %p8503_p9 = scmp.lt.s32.totalorder %s8497_s0, %s8497_s0 }
  0x51   :  { %p8504_p10 = por %p8503_p9, %p8502_p8 }
  0x53   :  { %p8505_p11 = pnand %p8504_p10, %p8498_p7 }
  0x55   :  { %8508 = shalt.err (!%p8505_p11)
}
  0x56   :  { %48 = dma.hbm_to_vmem [thread:$0]  %s8870_s2, 128, %s46_s27, [#allocation6]  }
  0x57   :  { %s8509_s17 = scalar_lea.hbm %s8872_s4, 64 }
  0x58   :  { %p8510_p12 = scmp.ne.s32.totalorder %s8872_s4, %s8509_s17  ;;  %p8513_p13 = scmp.lt.u32.totalorder %s8509_s17, %s8872_s4 }
  0x5a   :  { %p8515_p0 = pnand %p8513_p13, %p8510_p12 }
  0x5c   :  { %8518 = shalt.err (!%p8515_p0)
}
  0x5d   :  { %s8519_s22 = scalar_lea.vmem %s68_s29, 64  ;;  %p8524_p2 = scmp.lt.s32.totalorder %s68_s29, %s68_s29 }
  0x5e   :  { %p8520_p1 = scmp.ne.s32.totalorder %s68_s29, %s8519_s22  ;;  %p8525_p3 = scmp.lt.s32.totalorder %s8519_s22, %s8519_s22 }
  0x60   :  { %p8526_p4 = por %p8525_p3, %p8524_p2 }
  0x62   :  { %p8527_p5 = pnand %p8526_p4, %p8520_p1 }
  0x64   :  { %8530 = shalt.err (!%p8527_p5)
}
  0x65   :  { %70 = dma.hbm_to_vmem [thread:$0]  %s8872_s4, 64, %s68_s29, [#allocation9]  }
  0x66   :  { %s8595_s24 = smov [#allocation13]   ;;  %s8531_s25 = scalar_lea.hbm %s8874_s6, 64 }
  0x67   :  { %s89_s26 = sshll.u32 %s8595_s24, 4  ;;  %p8532_p6 = scmp.ne.s32.totalorder %s8874_s6, %s8531_s25  ;;  %s90_s26 = int_to_ptr.vmem [resolvable:$true] %s89_s26 }
  0x68   :  { %p8535_p7 = scmp.lt.u32.totalorder %s8531_s25, %s8874_s6 }
  0x6a   :  { %p8537_p8 = pnand %p8535_p7, %p8532_p6 }
  0x6c   :  { %8540 = shalt.err (!%p8537_p8)
}
  0x6d   :  { %s8541_s10 = scalar_lea.vmem %s90_s26, 64  ;;  %p8546_p10 = scmp.lt.s32.totalorder %s90_s26, %s90_s26 }
  0x6e   :  { %p8542_p9 = scmp.ne.s32.totalorder %s90_s26, %s8541_s10  ;;  %p8547_p11 = scmp.lt.s32.totalorder %s8541_s10, %s8541_s10 }
  0x70   :  { %p8548_p12 = por %p8547_p11, %p8546_p10 }
  0x72   :  { %p8549_p13 = pnand %p8548_p12, %p8542_p9 }
  0x74   :  { %8552 = shalt.err (!%p8549_p13)
}
  0x75   :  { %92 = dma.hbm_to_vmem [thread:$0]  %s8874_s6, 64, %s90_s26, [#allocation12]  }
  0x76   :  { %8575 = dma.done.wait [#allocation3], 512  }
  0x77   :  { %8576 = vsyncadd [#allocation3], 4294966784 }
  0x78   :  { %8577 = dma.done.wait [#allocation6], 65664  }
  0x79   :  { %8578 = vsyncadd [#allocation6], 4294901632 }
  0x7a   :  { %8579 = dma.done.wait [#allocation9], 32832  }
  0x7b   :  { %8580 = vsyncadd [#allocation9], 4294934464 }
  0x7c   :  { %8581 = dma.done.wait [#allocation12], 16448  }
  0x7d   :  { %8582 = vsyncadd [#allocation12], 4294950848  ;;  %v118_v0 = vld [vmem:[#allocation5] sm:$0xff]  ;;  %v119_v2 = vld [vmem:[#allocation5 + $0x8] sm:$0xff]  ;;  %s8596_s6 = smov [#allocation14]  }
  0x7e   :  { %v122_v1 = vld [vmem:[#allocation5 + $0x20] sm:$0xff]  ;;  %v123_v4 = vld [vmem:[#allocation5 + $0x28] sm:$0xff]  ;;  %s6790_s11 = sshll.u32 %s8596_s6, 4  ;;  %s6791_s11 = int_to_ptr.vmem [resolvable:$true] %s6790_s11 }
  0x7f   :  { %v6811_v3 = vcombine.high %v118_v0, %v122_v1  ;;  %v6810_v5 = vcombine.low %v118_v0, %v122_v1  ;;  %v126_v6 = vld [vmem:[#allocation5 + $0x40] sm:$0xff]  ;;  %v6813_v8 = vcombine.high %v119_v2, %v123_v4  ;;  %v6812_v9 = vcombine.low %v119_v2, %v123_v4  ;;  %v127_v11 = vld [vmem:[#allocation5 + $0x48] sm:$0xff]  ;;  %s8553_s12 = scalar_lea.vmem %s6791_s11, 512  ;;  %p8558_p1 = scmp.lt.s32.totalorder %s6791_s11, %s6791_s11 }
  0x80   :  { %v130_v7 = vld [vmem:[#allocation5 + $0x60] sm:$0xff]  ;;  %v131_v12 = vld [vmem:[#allocation5 + $0x68] sm:$0xff]  ;;  %p8554_p0 = scmp.ne.s32.totalorder %s6791_s11, %s8553_s12  ;;  %p8559_p2 = scmp.lt.s32.totalorder %s8553_s12, %s8553_s12 }
  0x81   :  { %v6819_v10 = vcombine.high %v126_v6, %v130_v7  ;;  %v134_v13 = vld [vmem:[#allocation5 + $0x80] sm:$0xff]  ;;  %3260 = vmatprep.subr.bf16.mxu0 %v6811_v3  ;;  %v6821_v14 = vcombine.high %v127_v11, %v131_v12  ;;  %v135_v16 = vld [vmem:[#allocation5 + $0x88] sm:$0xff]  ;;  %3424 = vmatprep.subr.bf16.mxu1 %v6813_v8  ;;  %v6818_v18 = vcombine.low %v126_v6, %v130_v7 }
  0x82   :  { %v138_v15 = vld [vmem:[#allocation5 + $0xa0] sm:$0xff]  ;;  %v139_v17 = vld [vmem:[#allocation5 + $0xa8] sm:$0xff]  ;;  %3261 = vmatpush1.bf16.msra.mxu0 %v6810_v5  ;;  %3425 = vmatpush1.bf16.msra.mxu1 %v6812_v9  ;;  %v6820_v19 = vcombine.low %v127_v11, %v131_v12  ;;  %p8560_p3 = por %p8559_p2, %p8558_p1 }
  0x83   :  { %3262 = vmatprep.subr.bf16.mxu0 %v6819_v10  ;;  %v6827_v20 = vcombine.high %v134_v13, %v138_v15  ;;  %3426 = vmatprep.subr.bf16.mxu1 %v6821_v14  ;;  %v6829_v21 = vcombine.high %v135_v16, %v139_v17  ;;  %v142_v22 = vld [vmem:[#allocation5 + $0xc0] sm:$0xff]  ;;  %v143_v24 = vld [vmem:[#allocation5 + $0xc8] sm:$0xff]  ;;  %v6826_v26 = vcombine.low %v134_v13, %v138_v15 }
  0x84   :  { %v146_v23 = vld [vmem:[#allocation5 + $0xe0] sm:$0xff]  ;;  %v147_v25 = vld [vmem:[#allocation5 + $0xe8] sm:$0xff]  ;;  %v6828_v27 = vcombine.low %v135_v16, %v139_v17  ;;  %p8561_p4 = pnand %p8560_p3, %p8554_p0 }
  0x85   :  { %v6835_v28 = vcombine.high %v142_v22, %v146_v23  ;;  %v6837_v29 = vcombine.high %v143_v24, %v147_v25  ;;  %v150_v30 = vld [vmem:[#allocation5 + $0x100] sm:$0xff]  ;;  %v151_v32 = vld [vmem:[#allocation5 + $0x108] sm:$0xff]  ;;  %v6834_v34 = vcombine.low %v142_v22, %v146_v23  ;;  %v6836_v35 = vcombine.low %v143_v24, %v147_v25 }
  0x86   :  { %3263 = vmatpush1.bf16.msra.mxu0 %v6818_v18  ;;  %3427 = vmatpush1.bf16.msra.mxu1 %v6820_v19  ;;  %v154_v31 = vld [vmem:[#allocation5 + $0x120] sm:$0xff]  ;;  %v155_v33 = vld [vmem:[#allocation5 + $0x128] sm:$0xff] }
  0x87   :  { %3264 = vmatprep.subr.bf16.mxu0 %v6827_v20  ;;  %3428 = vmatprep.subr.bf16.mxu1 %v6829_v21  ;;  %v6843_v36 = vcombine.high %v150_v30, %v154_v31  ;;  %v6845_v37 = vcombine.high %v151_v32, %v155_v33  ;;  %v158_v38 = vld [vmem:[#allocation5 + $0x140] sm:$0xff]  ;;  %v159_v40 = vld [vmem:[#allocation5 + $0x148] sm:$0xff]  ;;  %v6842_v42 = vcombine.low %v150_v30, %v154_v31 }
  0x88   :  { %v162_v39 = vld [vmem:[#allocation5 + $0x160] sm:$0xff]  ;;  %v163_v41 = vld [vmem:[#allocation5 + $0x168] sm:$0xff]  ;;  %v6844_v43 = vcombine.low %v151_v32, %v155_v33 }
  0x89   :  { %v6851_v44 = vcombine.high %v158_v38, %v162_v39  ;;  %v6853_v45 = vcombine.high %v159_v40, %v163_v41  ;;  %v166_v46 = vld [vmem:[#allocation5 + $0x180] sm:$0xff]  ;;  %v167_v48 = vld [vmem:[#allocation5 + $0x188] sm:$0xff]  ;;  %v6850_v50 = vcombine.low %v158_v38, %v162_v39  ;;  %v6852_v51 = vcombine.low %v159_v40, %v163_v41 }
  0x8a   :  { %3265 = vmatpush1.bf16.msra.mxu0 %v6826_v26  ;;  %3429 = vmatpush1.bf16.msra.mxu1 %v6828_v27  ;;  %v170_v47 = vld [vmem:[#allocation5 + $0x1a0] sm:$0xff]  ;;  %v171_v49 = vld [vmem:[#allocation5 + $0x1a8] sm:$0xff] }
  0x8b   :  { %3266 = vmatprep.subr.bf16.mxu0 %v6835_v28  ;;  %3430 = vmatprep.subr.bf16.mxu1 %v6837_v29  ;;  %v6859_v52 = vcombine.high %v166_v46, %v170_v47  ;;  %v8721_v53 = vld [vmem:[#allocation2] sm:$0xff]  ;;  %v6861_v54 = vcombine.high %v167_v48, %v171_v49  ;;  %v175_v58 = vld [vmem:[#allocation5 + $0x1c8] sm:$0xff]  ;;  %v6858_v60 = vcombine.low %v166_v46, %v170_v47 }
  0x8c   :  { %v174_v55 = vld [vmem:[#allocation5 + $0x1c0] sm:$0xff]  ;;  %v8725_v57 = vcombine.high %v8721_v53, %v8721_v53  ;;  %v179_v59 = vld [vmem:[#allocation5 + $0x1e8] sm:$0xff]  ;;  %v6860_v61 = vcombine.low %v167_v48, %v171_v49 }
  0x8d   :  { %v178_v56 = vld [vmem:[#allocation5 + $0x1e0] sm:$0xff]  ;;  %v6869_v63 = vcombine.high %v175_v58, %v179_v59  ;;  %v183_v2 = vld [vmem:[#allocation5 + $0x208] sm:$0xff]  ;;  %v6868_v5 = vcombine.low %v175_v58, %v179_v59 }
  0x8e   :  { %3267 = vmatpush1.bf16.msra.mxu0 %v6834_v34  ;;  %3431 = vmatpush1.bf16.msra.mxu1 %v6836_v35  ;;  %v6867_v62 = vcombine.high %v174_v55, %v178_v56  ;;  %v182_v0 = vld [vmem:[#allocation5 + $0x200] sm:$0xff]  ;;  %v187_v3 = vld [vmem:[#allocation5 + $0x228] sm:$0xff]  ;;  %v6866_v4 = vcombine.low %v174_v55, %v178_v56 }
  0x8f   :  { %3268 = vmatprep.subr.bf16.mxu0 %v6843_v36  ;;  %3432 = vmatprep.subr.bf16.mxu1 %v6845_v37  ;;  %v186_v1 = vld [vmem:[#allocation5 + $0x220] sm:$0xff]  ;;  %v6877_v7 = vcombine.high %v183_v2, %v187_v3  ;;  %v191_v10 = vld [vmem:[#allocation5 + $0x248] sm:$0xff]  ;;  %v6876_v13 = vcombine.low %v183_v2, %v187_v3 }
  0x90   :  { %3292 = vmatprep.mubr.bf16.mxu0 %v8725_v57  ;;  %3456 = vmatprep.mubr.bf16.mxu1 %v8725_v57  ;;  %v6875_v6 = vcombine.high %v182_v0, %v186_v1  ;;  %v190_v8 = vld [vmem:[#allocation5 + $0x240] sm:$0xff]  ;;  %v195_v11 = vld [vmem:[#allocation5 + $0x268] sm:$0xff]  ;;  %v6874_v12 = vcombine.low %v182_v0, %v186_v1 }
  0x91   :  { %v194_v9 = vld [vmem:[#allocation5 + $0x260] sm:$0xff]  ;;  %v6885_v15 = vcombine.high %v191_v10, %v195_v11  ;;  %v199_v18 = vld [vmem:[#allocation5 + $0x288] sm:$0xff]  ;;  %v6884_v21 = vcombine.low %v191_v10, %v195_v11 }
  0x92   :  { %3269 = vmatpush1.bf16.msra.mxu0 %v6842_v42  ;;  %3433 = vmatpush1.bf16.msra.mxu1 %v6844_v43  ;;  %v6883_v14 = vcombine.high %v190_v8, %v194_v9  ;;  %v198_v16 = vld [vmem:[#allocation5 + $0x280] sm:$0xff]  ;;  %v203_v19 = vld [vmem:[#allocation5 + $0x2a8] sm:$0xff]  ;;  %v6882_v20 = vcombine.low %v190_v8, %v194_v9 }
  0x93   :  { %3270 = vmatprep.subr.bf16.mxu0 %v6851_v44  ;;  %3434 = vmatprep.subr.bf16.mxu1 %v6853_v45  ;;  %v202_v17 = vld [vmem:[#allocation5 + $0x2a0] sm:$0xff]  ;;  %v6893_v23 = vcombine.high %v199_v18, %v203_v19  ;;  %v207_v26 = vld [vmem:[#allocation5 + $0x2c8] sm:$0xff]  ;;  %v6892_v29 = vcombine.low %v199_v18, %v203_v19 }
  0x94   :  { %v6891_v22 = vcombine.high %v198_v16, %v202_v17  ;;  %v206_v24 = vld [vmem:[#allocation5 + $0x2c0] sm:$0xff]  ;;  %v211_v27 = vld [vmem:[#allocation5 + $0x2e8] sm:$0xff]  ;;  %v6890_v28 = vcombine.low %v198_v16, %v202_v17 }
  0x95   :  { %v210_v25 = vld [vmem:[#allocation5 + $0x2e0] sm:$0xff]  ;;  %v6901_v31 = vcombine.high %v207_v26, %v211_v27  ;;  %v215_v34 = vld [vmem:[#allocation5 + $0x308] sm:$0xff]  ;;  %v6900_v37 = vcombine.low %v207_v26, %v211_v27 }
  0x96   :  { %3271 = vmatpush1.bf16.msra.mxu0 %v6850_v50  ;;  %3435 = vmatpush1.bf16.msra.mxu1 %v6852_v51  ;;  %v6899_v30 = vcombine.high %v206_v24, %v210_v25  ;;  %v214_v32 = vld [vmem:[#allocation5 + $0x300] sm:$0xff]  ;;  %v219_v35 = vld [vmem:[#allocation5 + $0x328] sm:$0xff]  ;;  %v6898_v36 = vcombine.low %v206_v24, %v210_v25 }
  0x97   :  { %3272 = vmatprep.subr.bf16.mxu0 %v6859_v52  ;;  %3436 = vmatprep.subr.bf16.mxu1 %v6861_v54  ;;  %v218_v33 = vld [vmem:[#allocation5 + $0x320] sm:$0xff]  ;;  %v6909_v39 = vcombine.high %v215_v34, %v219_v35  ;;  %v223_v42 = vld [vmem:[#allocation5 + $0x348] sm:$0xff]  ;;  %v6908_v45 = vcombine.low %v215_v34, %v219_v35 }
  0x98   :  { %v6907_v38 = vcombine.high %v214_v32, %v218_v33  ;;  %v222_v40 = vld [vmem:[#allocation5 + $0x340] sm:$0xff]  ;;  %v227_v43 = vld [vmem:[#allocation5 + $0x368] sm:$0xff]  ;;  %v6906_v44 = vcombine.low %v214_v32, %v218_v33 }
  0x99   :  { %v226_v41 = vld [vmem:[#allocation5 + $0x360] sm:$0xff]  ;;  %v6917_v47 = vcombine.high %v223_v42, %v227_v43  ;;  %v231_v50 = vld [vmem:[#allocation5 + $0x388] sm:$0xff]  ;;  %v6916_v54 = vcombine.low %v223_v42, %v227_v43 }
  0x9a   :  { %3273 = vmatpush1.bf16.msra.mxu0 %v6858_v60  ;;  %3437 = vmatpush1.bf16.msra.mxu1 %v6860_v61  ;;  %v6915_v46 = vcombine.high %v222_v40, %v226_v41  ;;  %v230_v48 = vld [vmem:[#allocation5 + $0x380] sm:$0xff]  ;;  %v235_v51 = vld [vmem:[#allocation5 + $0x3a8] sm:$0xff]  ;;  %v6914_v52 = vcombine.low %v222_v40, %v226_v41 }
  0x9b   :  { %3274 = vmatprep.subr.bf16.mxu0 %v6867_v62  ;;  %3438 = vmatprep.subr.bf16.mxu1 %v6869_v63  ;;  %v234_v49 = vld [vmem:[#allocation5 + $0x3a0] sm:$0xff]  ;;  %v6925_v56 = vcombine.high %v231_v50, %v235_v51  ;;  %v239_v60 = vld [vmem:[#allocation5 + $0x3c8] sm:$0xff]  ;;  %v6924_v63 = vcombine.low %v231_v50, %v235_v51 }
  0x9c   :  { %v6923_v55 = vcombine.high %v230_v48, %v234_v49  ;;  %v238_v58 = vld [vmem:[#allocation5 + $0x3c0] sm:$0xff]  ;;  %v243_v61 = vld [vmem:[#allocation5 + $0x3e8] sm:$0xff]  ;;  %v6922_v62 = vcombine.low %v230_v48, %v234_v49 }
  0x9d   :  { %v242_v59 = vld [vmem:[#allocation5 + $0x3e0] sm:$0xff]  ;;  %v6933_v1 = vcombine.high %v239_v60, %v243_v61 }
  0x9e   :  { %3275 = vmatpush1.bf16.msra.mxu0 %v6866_v4  ;;  %3439 = vmatpush1.bf16.msra.mxu1 %v6868_v5  ;;  %v6931_v0 = vcombine.high %v238_v58, %v242_v59  ;;  %v246_v2 = vld [vmem:[#allocation5 + $0x400] sm:$0xff]  ;;  %v247_v4 = vld [vmem:[#allocation5 + $0x408] sm:$0xff] }
  0x9f   :  { %3276 = vmatprep.subr.bf16.mxu0 %v6875_v6  ;;  %3440 = vmatprep.subr.bf16.mxu1 %v6877_v7  ;;  %v250_v3 = vld [vmem:[#allocation5 + $0x420] sm:$0xff]  ;;  %v251_v5 = vld [vmem:[#allocation5 + $0x428] sm:$0xff]  ;;  %v6930_v6 = vcombine.low %v238_v58, %v242_v59  ;;  %v6932_v7 = vcombine.low %v239_v60, %v243_v61 }
  0xa0   :  { %v6939_v8 = vcombine.high %v246_v2, %v250_v3  ;;  %v6941_v9 = vcombine.high %v247_v4, %v251_v5  ;;  %v254_v10 = vld [vmem:[#allocation5 + $0x440] sm:$0xff]  ;;  %v6938_v16 = vcombine.low %v246_v2, %v250_v3  ;;  %v6940_v17 = vcombine.low %v247_v4, %v251_v5 }
  0xa1   :  { %v258_v11 = vld [vmem:[#allocation5 + $0x460] sm:$0xff] }
  0xa2   :  { %3277 = vmatpush1.bf16.msra.mxu0 %v6874_v12  ;;  %3441 = vmatpush1.bf16.msra.mxu1 %v6876_v13  ;;  %v8731_v12 = vcombine.low %v8721_v53, %v8721_v53  ;;  %v255_v13 = vld [vmem:[#allocation5 + $0x448] sm:$0xff]  ;;  %v6947_v18 = vcombine.high %v254_v10, %v258_v11  ;;  %v262_v19 = vld [vmem:[#allocation5 + $0x480] sm:$0xff]  ;;  %v6946_v24 = vcombine.low %v254_v10, %v258_v11 }
  0xa3   :  { %3278 = vmatprep.subr.bf16.mxu0 %v6883_v14  ;;  %3442 = vmatprep.subr.bf16.mxu1 %v6885_v15  ;;  %v259_v14 = vld [vmem:[#allocation5 + $0x468] sm:$0xff]  ;;  %v270_v27 = vld [vmem:[#allocation5 + $0x4c0] sm:$0xff] }
  0xa4   :  { %v8733_v15 = vld [vmem:[#allocation2 + $0x8] sm:$0xff]  ;;  %v6948_v25 = vcombine.low %v255_v13, %v259_v14  ;;  %v278_v35 = vld [vmem:[#allocation5 + $0x500] sm:$0xff] }
  0xa5   :  { %v8737_v53 = vcombine.high %v8733_v15, %v8733_v15  ;;  %v286_v43 = vld [vmem:[#allocation5 + $0x540] sm:$0xff] }
  0xa6   :  { %3279 = vmatpush1.bf16.msra.mxu0 %v6882_v20  ;;  %3443 = vmatpush1.bf16.msra.mxu1 %v6884_v21  ;;  %v266_v20 = vld [vmem:[#allocation5 + $0x4a0] sm:$0xff]  ;;  %v6949_v21 = vcombine.high %v255_v13, %v259_v14 }
  0xa7   :  { %3280 = vmatprep.subr.bf16.mxu0 %v6891_v22  ;;  %3444 = vmatprep.subr.bf16.mxu1 %v6893_v23  ;;  %v263_v22 = vld [vmem:[#allocation5 + $0x488] sm:$0xff]  ;;  %v6955_v26 = vcombine.high %v262_v19, %v266_v20  ;;  %v6954_v32 = vcombine.low %v262_v19, %v266_v20  ;;  %v294_v51 = vld [vmem:[#allocation5 + $0x580] sm:$0xff] }
  0xa8   :  { %v267_v23 = vld [vmem:[#allocation5 + $0x4a8] sm:$0xff]  ;;  %v302_v61 = vld [vmem:[#allocation5 + $0x5c0] sm:$0xff] }
  0xa9   :  { %v6956_v33 = vcombine.low %v263_v22, %v267_v23  ;;  %v310_v5 = vld [vmem:[#allocation5 + $0x600] sm:$0xff]  ;;  %v323_v19 = vld [vmem:[#allocation5 + $0x668] sm:$0xff] }
  0xaa   :  { %3281 = vmatpush1.bf16.msra.mxu0 %v6890_v28  ;;  %3445 = vmatpush1.bf16.msra.mxu1 %v6892_v29  ;;  %v274_v28 = vld [vmem:[#allocation5 + $0x4e0] sm:$0xff]  ;;  %v271_v29 = vld [vmem:[#allocation5 + $0x4c8] sm:$0xff] }
  0xab   :  { %3282 = vmatprep.subr.bf16.mxu0 %v6899_v30  ;;  %3446 = vmatprep.subr.bf16.mxu1 %v6901_v31  ;;  %v6957_v30 = vcombine.high %v263_v22, %v267_v23  ;;  %v275_v31 = vld [vmem:[#allocation5 + $0x4e8] sm:$0xff]  ;;  %v6963_v34 = vcombine.high %v270_v27, %v274_v28  ;;  %v6962_v40 = vcombine.low %v270_v27, %v274_v28  ;;  %v318_v14 = vld [vmem:[#allocation5 + $0x640] sm:$0xff] }
  0xac   :  { %v6964_v41 = vcombine.low %v271_v29, %v275_v31  ;;  %v326_v23 = vld [vmem:[#allocation5 + $0x680] sm:$0xff]  ;;  %v331_v27 = vld [vmem:[#allocation5 + $0x6a8] sm:$0xff] }
  0xae   :  { %3283 = vmatpush1.bf16.msra.mxu0 %v6898_v36  ;;  %3447 = vmatpush1.bf16.msra.mxu1 %v6900_v37  ;;  %v282_v36 = vld [vmem:[#allocation5 + $0x520] sm:$0xff]  ;;  %v279_v37 = vld [vmem:[#allocation5 + $0x508] sm:$0xff] }
  0xaf   :  { %3284 = vmatprep.subr.bf16.mxu0 %v6907_v38  ;;  %3448 = vmatprep.subr.bf16.mxu1 %v6909_v39  ;;  %v6965_v38 = vcombine.high %v271_v29, %v275_v31  ;;  %v283_v39 = vld [vmem:[#allocation5 + $0x528] sm:$0xff]  ;;  %v6971_v42 = vcombine.high %v278_v35, %v282_v36  ;;  %v6970_v48 = vcombine.low %v278_v35, %v282_v36  ;;  %v334_v31 = vld [vmem:[#allocation5 + $0x6c0] sm:$0xff] }
  0xb0   :  { %v6972_v49 = vcombine.low %v279_v37, %v283_v39  ;;  %v339_v35 = vld [vmem:[#allocation5 + $0x6e8] sm:$0xff] }
  0xb2   :  { %3285 = vmatpush1.bf16.msra.mxu0 %v6906_v44  ;;  %3449 = vmatpush1.bf16.msra.mxu1 %v6908_v45  ;;  %v290_v44 = vld [vmem:[#allocation5 + $0x560] sm:$0xff]  ;;  %v287_v45 = vld [vmem:[#allocation5 + $0x548] sm:$0xff] }
  0xb3   :  { %3286 = vmatprep.subr.bf16.mxu0 %v6915_v46  ;;  %3450 = vmatprep.subr.bf16.mxu1 %v6917_v47  ;;  %v6973_v46 = vcombine.high %v279_v37, %v283_v39  ;;  %v291_v47 = vld [vmem:[#allocation5 + $0x568] sm:$0xff]  ;;  %v6979_v50 = vcombine.high %v286_v43, %v290_v44  ;;  %v6978_v58 = vcombine.low %v286_v43, %v290_v44  ;;  %v342_v39 = vld [vmem:[#allocation5 + $0x700] sm:$0xff] }
  0xb4   :  { %v6980_v59 = vcombine.low %v287_v45, %v291_v47  ;;  %v347_v43 = vld [vmem:[#allocation5 + $0x728] sm:$0xff] }
  0xb6   :  { %3287 = vmatpush1.bf16.msra.mxu0 %v6914_v52  ;;  %3451 = vmatpush1.bf16.msra.mxu1 %v6916_v54  ;;  %v298_v52 = vld [vmem:[#allocation5 + $0x5a0] sm:$0xff]  ;;  %v295_v54 = vld [vmem:[#allocation5 + $0x588] sm:$0xff] }
  0xb7   :  { %3288 = vmatprep.subr.bf16.mxu0 %v6923_v55  ;;  %3452 = vmatprep.subr.bf16.mxu1 %v6925_v56  ;;  %v6981_v55 = vcombine.high %v287_v45, %v291_v47  ;;  %v299_v56 = vld [vmem:[#allocation5 + $0x5a8] sm:$0xff]  ;;  %v6987_v60 = vcombine.high %v294_v51, %v298_v52  ;;  %v6986_v2 = vcombine.low %v294_v51, %v298_v52  ;;  %v350_v47 = vld [vmem:[#allocation5 + $0x740] sm:$0xff] }
  0xb8   :  { %v6988_v3 = vcombine.low %v295_v54, %v299_v56  ;;  %v355_v51 = vld [vmem:[#allocation5 + $0x768] sm:$0xff] }
  0xba   :  { %3289 = vmatpush1.bf16.msra.mxu0 %v6922_v62  ;;  %3453 = vmatpush1.bf16.msra.mxu1 %v6924_v63  ;;  %v306_v62 = vld [vmem:[#allocation5 + $0x5e0] sm:$0xff]  ;;  %v303_v63 = vld [vmem:[#allocation5 + $0x5c8] sm:$0xff] }
  0xbb   :  { %3290 = vmatprep.subr.bf16.mxu0 %v6931_v0  ;;  %3454 = vmatprep.subr.bf16.mxu1 %v6933_v1  ;;  %v6989_v0 = vcombine.high %v295_v54, %v299_v56  ;;  %v307_v1 = vld [vmem:[#allocation5 + $0x5e8] sm:$0xff]  ;;  %v6995_v4 = vcombine.high %v302_v61, %v306_v62  ;;  %v6994_v10 = vcombine.low %v302_v61, %v306_v62  ;;  %v358_v56 = vld [vmem:[#allocation5 + $0x780] sm:$0xff] }
  0xbc   :  { %v6996_v11 = vcombine.low %v303_v63, %v307_v1  ;;  %v363_v61 = vld [vmem:[#allocation5 + $0x7a8] sm:$0xff] }
  0xbe   :  { %3291 = vmatpush1.bf16.msra.mxu0 %v6930_v6  ;;  %3455 = vmatpush1.bf16.msra.mxu1 %v6932_v7  ;;  %v314_v6 = vld [vmem:[#allocation5 + $0x620] sm:$0xff]  ;;  %v311_v7 = vld [vmem:[#allocation5 + $0x608] sm:$0xff] }
  0xbf   :  { %3301 = vmatprep.subr.bf16.mxu0 %v6939_v8  ;;  %3465 = vmatprep.subr.bf16.mxu1 %v6941_v9  ;;  %v6997_v8 = vcombine.high %v303_v63, %v307_v1  ;;  %v315_v9 = vld [vmem:[#allocation5 + $0x628] sm:$0xff]  ;;  %v7003_v13 = vcombine.high %v310_v5, %v314_v6  ;;  %v7002_v20 = vcombine.low %v310_v5, %v314_v6  ;;  %v366_v1 = vld [vmem:[#allocation5 + $0x7c0] sm:$0xff] }
  0xc0   :  { %v371_v5 = vld [vmem:[#allocation5 + $0x7e8] sm:$0xff] }
  0xc1   :  { %3293 = vmatmul.mubr.bf16.vlgmr.msra.gmra.mrb[0].mxu0 %v8731_v12  ;;  %3457 = vmatmul.mubr.bf16.vlgmr.msra.gmra.mrb[0].mxu1 %v8731_v12 }
  0xc2   :  { %3302 = vmatpush1.bf16.msra.mxu0 %v6938_v16  ;;  %3466 = vmatpush1.bf16.msra.mxu1 %v6940_v17  ;;  %v322_v16 = vld [vmem:[#allocation5 + $0x660] sm:$0xff]  ;;  %v319_v17 = vld [vmem:[#allocation5 + $0x648] sm:$0xff] }
  0xc3   :  { %3303 = vmatprep.subr.bf16.mxu0 %v6947_v18  ;;  %3467 = vmatprep.subr.bf16.mxu1 %v6949_v21  ;;  %v7005_v18 = vcombine.high %v311_v7, %v315_v9  ;;  %v7004_v21 = vcombine.low %v311_v7, %v315_v9  ;;  %v7011_v22 = vcombine.high %v318_v14, %v322_v16  ;;  %v374_v9 = vld [vmem:[#allocation5 + $0x800] sm:$0xff] }
  0xc4   :  { %3333 = vmatprep.mubr.bf16.mxu0 %v8737_v53  ;;  %3497 = vmatprep.mubr.bf16.mxu1 %v8737_v53  ;;  %v7010_v28 = vcombine.low %v318_v14, %v322_v16  ;;  %v7012_v29 = vcombine.low %v319_v17, %v323_v19  ;;  %v379_v14 = vld [vmem:[#allocation5 + $0x828] sm:$0xff] }
  0xc6   :  { %3304 = vmatpush1.bf16.msra.mxu0 %v6946_v24  ;;  %3468 = vmatpush1.bf16.msra.mxu1 %v6948_v25  ;;  %v330_v24 = vld [vmem:[#allocation5 + $0x6a0] sm:$0xff]  ;;  %v327_v25 = vld [vmem:[#allocation5 + $0x688] sm:$0xff] }
  0xc7   :  { %3305 = vmatprep.subr.bf16.mxu0 %v6955_v26  ;;  %3469 = vmatprep.subr.bf16.mxu1 %v6957_v30  ;;  %v7013_v26 = vcombine.high %v319_v17, %v323_v19  ;;  %v7019_v30 = vcombine.high %v326_v23, %v330_v24  ;;  %v7018_v36 = vcombine.low %v326_v23, %v330_v24  ;;  %v382_v17 = vld [vmem:[#allocation5 + $0x840] sm:$0xff]  ;;  %v8743_v24 = vld [vmem:[#allocation2 + $0x10] sm:$0xff] }
  0xc8   :  { %v7020_v37 = vcombine.low %v327_v25, %v331_v27 }
  0xca   :  { %3306 = vmatpush1.bf16.msra.mxu0 %v6954_v32  ;;  %3470 = vmatpush1.bf16.msra.mxu1 %v6956_v33  ;;  %v338_v32 = vld [vmem:[#allocation5 + $0x6e0] sm:$0xff]  ;;  %v335_v33 = vld [vmem:[#allocation5 + $0x6c8] sm:$0xff] }
  0xcb   :  { %3307 = vmatprep.subr.bf16.mxu0 %v6963_v34  ;;  %3471 = vmatprep.subr.bf16.mxu1 %v6965_v38  ;;  %v7021_v34 = vcombine.high %v327_v25, %v331_v27  ;;  %v7027_v38 = vcombine.high %v334_v31, %v338_v32  ;;  %v7026_v44 = vcombine.low %v334_v31, %v338_v32  ;;  %v391_v31 = vld [vmem:[#allocation5 + $0x888] sm:$0xff] }
  0xcc   :  { %v7028_v45 = vcombine.low %v335_v33, %v339_v35  ;;  %v8747_v25 = vcombine.low %v8733_v15, %v8733_v15 }
  0xce   :  { %3308 = vmatpush1.bf16.msra.mxu0 %v6962_v40  ;;  %3472 = vmatpush1.bf16.msra.mxu1 %v6964_v41  ;;  %v346_v40 = vld [vmem:[#allocation5 + $0x720] sm:$0xff]  ;;  %v343_v41 = vld [vmem:[#allocation5 + $0x708] sm:$0xff] }
  0xcf   :  { %3309 = vmatprep.subr.bf16.mxu0 %v6971_v42  ;;  %3473 = vmatprep.subr.bf16.mxu1 %v6973_v46  ;;  %v7029_v42 = vcombine.high %v335_v33, %v339_v35  ;;  %v7035_v46 = vcombine.high %v342_v39, %v346_v40  ;;  %v7034_v52 = vcombine.low %v342_v39, %v346_v40  ;;  %v395_v33 = vld [vmem:[#allocation5 + $0x8a8] sm:$0xff] }
  0xd0   :  { %v7036_v54 = vcombine.low %v343_v41, %v347_v43  ;;  %v399_v39 = vld [vmem:[#allocation5 + $0x8c8] sm:$0xff]  ;;  %v7085_v40 = vcombine.high %v391_v31, %v395_v33 }
  0xd2   :  { %3310 = vmatpush1.bf16.msra.mxu0 %v6970_v48  ;;  %3474 = vmatpush1.bf16.msra.mxu1 %v6972_v49  ;;  %v354_v48 = vld [vmem:[#allocation5 + $0x760] sm:$0xff]  ;;  %v351_v49 = vld [vmem:[#allocation5 + $0x748] sm:$0xff] }
  0xd3   :  { %3311 = vmatprep.subr.bf16.mxu0 %v6979_v50  ;;  %3475 = vmatprep.subr.bf16.mxu1 %v6981_v55  ;;  %v7037_v50 = vcombine.high %v343_v41, %v347_v43  ;;  %v7043_v55 = vcombine.high %v350_v47, %v354_v48  ;;  %v7042_v62 = vcombine.low %v350_v47, %v354_v48  ;;  %v403_v41 = vld [vmem:[#allocation5 + $0x8e8] sm:$0xff] }
  0xd4   :  { %v7044_v63 = vcombine.low %v351_v49, %v355_v51  ;;  %v7084_v43 = vcombine.low %v391_v31, %v395_v33  ;;  %v407_v47 = vld [vmem:[#allocation5 + $0x908] sm:$0xff]  ;;  %v7093_v48 = vcombine.high %v399_v39, %v403_v41 }
  0xd5   :  { %v451_v31 = vld [vmem:[#allocation5 + $0xa68] sm:$0xff] }
  0xd6   :  { %3312 = vmatpush1.bf16.msra.mxu0 %v6978_v58  ;;  %3476 = vmatpush1.bf16.msra.mxu1 %v6980_v59  ;;  %v362_v58 = vld [vmem:[#allocation5 + $0x7a0] sm:$0xff]  ;;  %v359_v59 = vld [vmem:[#allocation5 + $0x788] sm:$0xff] }
  0xd7   :  { %3313 = vmatprep.subr.bf16.mxu0 %v6987_v60  ;;  %3477 = vmatprep.subr.bf16.mxu1 %v6989_v0  ;;  %v7045_v60 = vcombine.high %v351_v49, %v355_v51  ;;  %v7051_v0 = vcombine.high %v358_v56, %v362_v58  ;;  %v7050_v6 = vcombine.low %v358_v56, %v362_v58  ;;  %v411_v49 = vld [vmem:[#allocation5 + $0x928] sm:$0xff] }
  0xd8   :  { %v7052_v7 = vcombine.low %v359_v59, %v363_v61  ;;  %v7092_v51 = vcombine.low %v399_v39, %v403_v41  ;;  %v415_v56 = vld [vmem:[#allocation5 + $0x948] sm:$0xff]  ;;  %v7101_v58 = vcombine.high %v407_v47, %v411_v49 }
  0xd9   :  { %v459_v39 = vld [vmem:[#allocation5 + $0xaa8] sm:$0xff] }
  0xda   :  { %3314 = vmatpush1.bf16.msra.mxu0 %v6986_v2  ;;  %3478 = vmatpush1.bf16.msra.mxu1 %v6988_v3  ;;  %v370_v2 = vld [vmem:[#allocation5 + $0x7e0] sm:$0xff]  ;;  %v367_v3 = vld [vmem:[#allocation5 + $0x7c8] sm:$0xff] }
  0xdb   :  { %3315 = vmatprep.subr.bf16.mxu0 %v6995_v4  ;;  %3479 = vmatprep.subr.bf16.mxu1 %v6997_v8  ;;  %v7053_v4 = vcombine.high %v359_v59, %v363_v61  ;;  %v7059_v8 = vcombine.high %v366_v1, %v370_v2  ;;  %v7058_v16 = vcombine.low %v366_v1, %v370_v2  ;;  %v419_v59 = vld [vmem:[#allocation5 + $0x968] sm:$0xff] }
  0xdc   :  { %v7100_v61 = vcombine.low %v407_v47, %v411_v49  ;;  %v423_v1 = vld [vmem:[#allocation5 + $0x988] sm:$0xff]  ;;  %v7109_v2 = vcombine.high %v415_v56, %v419_v59 }
  0xdd   :  { %v467_v47 = vld [vmem:[#allocation5 + $0xae8] sm:$0xff] }
  0xde   :  { %3316 = vmatpush1.bf16.msra.mxu0 %v6994_v10  ;;  %3480 = vmatpush1.bf16.msra.mxu1 %v6996_v11  ;;  %v378_v10 = vld [vmem:[#allocation5 + $0x820] sm:$0xff]  ;;  %v375_v11 = vld [vmem:[#allocation5 + $0x808] sm:$0xff] }
  0xdf   :  { %3317 = vmatprep.subr.bf16.mxu0 %v7003_v13  ;;  %3481 = vmatprep.subr.bf16.mxu1 %v7005_v18  ;;  %v7061_v13 = vcombine.high %v367_v3, %v371_v5  ;;  %v7060_v18 = vcombine.low %v367_v3, %v371_v5  ;;  %v7067_v19 = vcombine.high %v374_v9, %v378_v10  ;;  %v427_v3 = vld [vmem:[#allocation5 + $0x9a8] sm:$0xff] }
  0xe0   :  { %v7069_v23 = vcombine.high %v375_v11, %v379_v14  ;;  %v7068_v27 = vcombine.low %v375_v11, %v379_v14  ;;  %v7108_v5 = vcombine.low %v415_v56, %v419_v59  ;;  %v435_v11 = vld [vmem:[#allocation5 + $0x9e8] sm:$0xff]  ;;  %v7116_v14 = vcombine.low %v423_v1, %v427_v3 }
  0xe1   :  { %v475_v56 = vld [vmem:[#allocation5 + $0xb28] sm:$0xff] }
  0xe2   :  { %3318 = vmatpush1.bf16.msra.mxu0 %v7002_v20  ;;  %3482 = vmatpush1.bf16.msra.mxu1 %v7004_v21  ;;  %v386_v20 = vld [vmem:[#allocation5 + $0x860] sm:$0xff]  ;;  %v383_v21 = vld [vmem:[#allocation5 + $0x848] sm:$0xff] }
  0xe3   :  { %3319 = vmatprep.subr.bf16.mxu0 %v7011_v22  ;;  %3483 = vmatprep.subr.bf16.mxu1 %v7013_v26  ;;  %v387_v22 = vld [vmem:[#allocation5 + $0x868] sm:$0xff]  ;;  %v7066_v26 = vcombine.low %v374_v9, %v378_v10  ;;  %v7074_v15 = vcombine.low %v382_v17, %v386_v20  ;;  %v7117_v10 = vcombine.high %v423_v1, %v427_v3 }
  0xe4   :  { %v7077_v32 = vcombine.high %v383_v21, %v387_v22  ;;  %v7076_v35 = vcombine.low %v383_v21, %v387_v22  ;;  %v431_v9 = vld [vmem:[#allocation5 + $0x9c8] sm:$0xff] }
  0xe5   :  { %v443_v21 = vld [vmem:[#allocation5 + $0xa28] sm:$0xff] }
  0xe6   :  { %3320 = vmatpush1.bf16.msra.mxu0 %v7010_v28  ;;  %3484 = vmatpush1.bf16.msra.mxu1 %v7012_v29  ;;  %v7075_v28 = vcombine.high %v382_v17, %v386_v20  ;;  %v390_v29 = vld [vmem:[#allocation5 + $0x880] sm:$0xff]  ;;  %v7125_v20 = vcombine.high %v431_v9, %v435_v11  ;;  %v483_v1 = vld [vmem:[#allocation5 + $0xb68] sm:$0xff] }
  0xe7   :  { %3321 = vmatprep.subr.bf16.mxu0 %v7019_v30  ;;  %3485 = vmatprep.subr.bf16.mxu1 %v7021_v34  ;;  %v394_v30 = vld [vmem:[#allocation5 + $0x8a0] sm:$0xff]  ;;  %v8751_v34 = vcombine.high %v8743_v24, %v8743_v24 }
  0xe8   :  { %v438_v17 = vld [vmem:[#allocation5 + $0xa00] sm:$0xff] }
  0xea   :  { %3322 = vmatpush1.bf16.msra.mxu0 %v7018_v36  ;;  %3486 = vmatpush1.bf16.msra.mxu1 %v7020_v37  ;;  %v7083_v36 = vcombine.high %v390_v29, %v394_v30  ;;  %v398_v37 = vld [vmem:[#allocation5 + $0x8c0] sm:$0xff] }
  0xeb   :  { %3323 = vmatprep.subr.bf16.mxu0 %v7027_v38  ;;  %3487 = vmatprep.subr.bf16.mxu1 %v7029_v42  ;;  %v402_v38 = vld [vmem:[#allocation5 + $0x8e0] sm:$0xff]  ;;  %v7082_v42 = vcombine.low %v390_v29, %v394_v30  ;;  %v447_v29 = vld [vmem:[#allocation5 + $0xa48] sm:$0xff] }
  0xec   :  { %v7140_v41 = vcombine.low %v447_v29, %v451_v31 }
  0xee   :  { %3324 = vmatpush1.bf16.msra.mxu0 %v7026_v44  ;;  %3488 = vmatpush1.bf16.msra.mxu1 %v7028_v45  ;;  %v7091_v44 = vcombine.high %v398_v37, %v402_v38  ;;  %v406_v45 = vld [vmem:[#allocation5 + $0x900] sm:$0xff] }
  0xef   :  { %3325 = vmatprep.subr.bf16.mxu0 %v7035_v46  ;;  %3489 = vmatprep.subr.bf16.mxu1 %v7037_v50  ;;  %v410_v46 = vld [vmem:[#allocation5 + $0x920] sm:$0xff]  ;;  %v7090_v50 = vcombine.low %v398_v37, %v402_v38  ;;  %v455_v37 = vld [vmem:[#allocation5 + $0xa88] sm:$0xff]  ;;  %v7141_v38 = vcombine.high %v447_v29, %v451_v31 }
  0xf0   :  { %v7148_v49 = vcombine.low %v455_v37, %v459_v39  ;;  %v507_v29 = vld [vmem:[#allocation5 + $0xc28] sm:$0xff]  ;;  %v510_v31 = vld [vmem:[#allocation5 + $0xc40] sm:$0xff] }
  0xf2   :  { %3326 = vmatpush1.bf16.msra.mxu0 %v7034_v52  ;;  %3490 = vmatpush1.bf16.msra.mxu1 %v7036_v54  ;;  %v7099_v52 = vcombine.high %v406_v45, %v410_v46  ;;  %v414_v54 = vld [vmem:[#allocation5 + $0x940] sm:$0xff] }
  0xf3   :  { %3327 = vmatprep.subr.bf16.mxu0 %v7043_v55  ;;  %3491 = vmatprep.subr.bf16.mxu1 %v7045_v60  ;;  %v418_v55 = vld [vmem:[#allocation5 + $0x960] sm:$0xff]  ;;  %v7098_v60 = vcombine.low %v406_v45, %v410_v46  ;;  %v463_v45 = vld [vmem:[#allocation5 + $0xac8] sm:$0xff]  ;;  %v7149_v46 = vcombine.high %v455_v37, %v459_v39  ;;  %v8761_v39 = vcombine.low %v8743_v24, %v8743_v24 }
  0xf4   :  { %v7156_v59 = vcombine.low %v463_v45, %v467_v47 }
  0xf6   :  { %3328 = vmatpush1.bf16.msra.mxu0 %v7042_v62  ;;  %3492 = vmatpush1.bf16.msra.mxu1 %v7044_v63  ;;  %v7107_v62 = vcombine.high %v414_v54, %v418_v55  ;;  %v422_v63 = vld [vmem:[#allocation5 + $0x980] sm:$0xff] }
  0xf7   :  { %3329 = vmatprep.subr.bf16.mxu0 %v7051_v0  ;;  %3493 = vmatprep.subr.bf16.mxu1 %v7053_v4  ;;  %v426_v0 = vld [vmem:[#allocation5 + $0x9a0] sm:$0xff]  ;;  %v7106_v4 = vcombine.low %v414_v54, %v418_v55  ;;  %v471_v54 = vld [vmem:[#allocation5 + $0xb08] sm:$0xff]  ;;  %v7157_v55 = vcombine.high %v463_v45, %v467_v47 }
  0xf8   :  { %v7164_v3 = vcombine.low %v471_v54, %v475_v56  ;;  %v519_v45 = vld [vmem:[#allocation5 + $0xc88] sm:$0xff] }
  0xf9   :  { %v523_v47 = vld [vmem:[#allocation5 + $0xca8] sm:$0xff] }
  0xfa   :  { %3330 = vmatpush1.bf16.msra.mxu0 %v7050_v6  ;;  %3494 = vmatpush1.bf16.msra.mxu1 %v7052_v7  ;;  %v7115_v6 = vcombine.high %v422_v63, %v426_v0  ;;  %v430_v7 = vld [vmem:[#allocation5 + $0x9c0] sm:$0xff] }
  0xfb   :  { %3331 = vmatprep.subr.bf16.mxu0 %v7059_v8  ;;  %3495 = vmatprep.subr.bf16.mxu1 %v7061_v13  ;;  %v434_v8 = vld [vmem:[#allocation5 + $0x9e0] sm:$0xff]  ;;  %v7114_v13 = vcombine.low %v422_v63, %v426_v0  ;;  %v479_v63 = vld [vmem:[#allocation5 + $0xb48] sm:$0xff]  ;;  %v7165_v0 = vcombine.high %v471_v54, %v475_v56 }
  0xfc   :  { %v7122_v22 = vcombine.low %v430_v7, %v434_v8  ;;  %v527_v54 = vld [vmem:[#allocation5 + $0xcc8] sm:$0xff] }
  0xfd   :  { %v531_v56 = vld [vmem:[#allocation5 + $0xce8] sm:$0xff] }
  0xfe   :  { %3332 = vmatpush1.bf16.msra.mxu0 %v7058_v16  ;;  %3496 = vmatpush1.bf16.msra.mxu1 %v7060_v18  ;;  %v7123_v16 = vcombine.high %v430_v7, %v434_v8  ;;  %v442_v18 = vld [vmem:[#allocation5 + $0xa20] sm:$0xff]  ;;  %v487_v7 = vld [vmem:[#allocation5 + $0xb88] sm:$0xff]  ;;  %v7173_v8 = vcombine.high %v479_v63, %v483_v1 }
  0xff   :  { %3342 = vmatprep.subr.bf16.mxu0 %v7067_v19  ;;  %3506 = vmatprep.subr.bf16.mxu1 %v7069_v23  ;;  %v439_v19 = vld [vmem:[#allocation5 + $0xa08] sm:$0xff]  ;;  %v7124_v23 = vcombine.low %v431_v9, %v435_v11  ;;  %v7172_v11 = vcombine.low %v479_v63, %v483_v1 }
 0x100   :  { %v7133_v30 = vcombine.high %v439_v19, %v443_v21  ;;  %v7132_v33 = vcombine.low %v439_v19, %v443_v21  ;;  %v491_v9 = vld [vmem:[#allocation5 + $0xba8] sm:$0xff] }
 0x101   :  { %3334 = vmatmul.mubr.bf16.vlgmr.msra.gmra.mrb[0].mxu0 %v8747_v25  ;;  %3498 = vmatmul.mubr.bf16.vlgmr.msra.gmra.mrb[0].mxu1 %v8747_v25  ;;  %v499_v19 = vld [vmem:[#allocation5 + $0xbe8] sm:$0xff]  ;;  %v7180_v21 = vcombine.low %v487_v7, %v491_v9 }
 0x102   :  { %3343 = vmatpush1.bf16.msra.mxu0 %v7066_v26  ;;  %3507 = vmatpush1.bf16.msra.mxu1 %v7068_v27  ;;  %v7131_v26 = vcombine.high %v438_v17, %v442_v18  ;;  %v446_v27 = vld [vmem:[#allocation5 + $0xa40] sm:$0xff]  ;;  %v535_v63 = vld [vmem:[#allocation5 + $0xd08] sm:$0xff] }
 0x103   :  { %3344 = vmatprep.subr.bf16.mxu0 %v7075_v28  ;;  %3508 = vmatprep.subr.bf16.mxu1 %v7077_v32  ;;  %v450_v28 = vld [vmem:[#allocation5 + $0xa60] sm:$0xff]  ;;  %v7130_v32 = vcombine.low %v438_v17, %v442_v18  ;;  %v495_v17 = vld [vmem:[#allocation5 + $0xbc8] sm:$0xff]  ;;  %v7181_v18 = vcombine.high %v487_v7, %v491_v9 }
 0x104   :  { %3374 = vmatprep.mubr.bf16.mxu0 %v8751_v34  ;;  %3538 = vmatprep.mubr.bf16.mxu1 %v8751_v34  ;;  %v539_v1 = vld [vmem:[#allocation5 + $0xd28] sm:$0xff] }
 0x105   :  { %v543_v7 = vld [vmem:[#allocation5 + $0xd48] sm:$0xff] }
 0x106   :  { %3345 = vmatpush1.bf16.msra.mxu0 %v7074_v15  ;;  %3509 = vmatpush1.bf16.msra.mxu1 %v7076_v35  ;;  %v7139_v15 = vcombine.high %v446_v27, %v450_v28  ;;  %v454_v35 = vld [vmem:[#allocation5 + $0xa80] sm:$0xff]  ;;  %v547_v9 = vld [vmem:[#allocation5 + $0xd68] sm:$0xff] }
 0x107   :  { %3346 = vmatprep.subr.bf16.mxu0 %v7083_v36  ;;  %3510 = vmatprep.subr.bf16.mxu1 %v7085_v40  ;;  %v458_v36 = vld [vmem:[#allocation5 + $0xaa0] sm:$0xff]  ;;  %v7138_v40 = vcombine.low %v446_v27, %v450_v28  ;;  %v503_v27 = vld [vmem:[#allocation5 + $0xc08] sm:$0xff]  ;;  %v7189_v28 = vcombine.high %v495_v17, %v499_v19 }
 0x108   :  { %v7197_v37 = vcombine.high %v503_v27, %v507_v29 }
 0x10a   :  { %3347 = vmatpush1.bf16.msra.mxu0 %v7082_v42  ;;  %3511 = vmatpush1.bf16.msra.mxu1 %v7084_v43  ;;  %v7147_v42 = vcombine.high %v454_v35, %v458_v36  ;;  %v462_v43 = vld [vmem:[#allocation5 + $0xac0] sm:$0xff] }
 0x10b   :  { %3348 = vmatprep.subr.bf16.mxu0 %v7091_v44  ;;  %3512 = vmatprep.subr.bf16.mxu1 %v7093_v48  ;;  %v466_v44 = vld [vmem:[#allocation5 + $0xae0] sm:$0xff]  ;;  %v7146_v48 = vcombine.low %v454_v35, %v458_v36  ;;  %v511_v35 = vld [vmem:[#allocation5 + $0xc48] sm:$0xff] }
 0x10c   :  { %v515_v36 = vld [vmem:[#allocation5 + $0xc68] sm:$0xff] }
 0x10e   :  { %3349 = vmatpush1.bf16.msra.mxu0 %v7090_v50  ;;  %3513 = vmatpush1.bf16.msra.mxu1 %v7092_v51  ;;  %v7155_v50 = vcombine.high %v462_v43, %v466_v44  ;;  %v470_v51 = vld [vmem:[#allocation5 + $0xb00] sm:$0xff] }
 0x10f   :  { %3350 = vmatprep.subr.bf16.mxu0 %v7099_v52  ;;  %3514 = vmatprep.subr.bf16.mxu1 %v7101_v58  ;;  %v474_v52 = vld [vmem:[#allocation5 + $0xb20] sm:$0xff]  ;;  %v7154_v58 = vcombine.low %v462_v43, %v466_v44 }
 0x110   :  { %v518_v43 = vld [vmem:[#allocation5 + $0xc80] sm:$0xff] }
 0x111   :  { %v522_v44 = vld [vmem:[#allocation5 + $0xca0] sm:$0xff] }
 0x112   :  { %3351 = vmatpush1.bf16.msra.mxu0 %v7098_v60  ;;  %3515 = vmatpush1.bf16.msra.mxu1 %v7100_v61  ;;  %v7163_v60 = vcombine.high %v470_v51, %v474_v52  ;;  %v478_v61 = vld [vmem:[#allocation5 + $0xb40] sm:$0xff] }
 0x113   :  { %3352 = vmatprep.subr.bf16.mxu0 %v7107_v62  ;;  %3516 = vmatprep.subr.bf16.mxu1 %v7109_v2  ;;  %v482_v62 = vld [vmem:[#allocation5 + $0xb60] sm:$0xff]  ;;  %v7162_v2 = vcombine.low %v470_v51, %v474_v52 }
 0x114   :  { %v526_v51 = vld [vmem:[#allocation5 + $0xcc0] sm:$0xff] }
 0x115   :  { %v530_v52 = vld [vmem:[#allocation5 + $0xce0] sm:$0xff] }
 0x116   :  { %3353 = vmatpush1.bf16.msra.mxu0 %v7106_v4  ;;  %3517 = vmatpush1.bf16.msra.mxu1 %v7108_v5  ;;  %v7171_v4 = vcombine.high %v478_v61, %v482_v62  ;;  %v486_v5 = vld [vmem:[#allocation5 + $0xb80] sm:$0xff] }
 0x117   :  { %3354 = vmatprep.subr.bf16.mxu0 %v7115_v6  ;;  %3518 = vmatprep.subr.bf16.mxu1 %v7117_v10  ;;  %v490_v6 = vld [vmem:[#allocation5 + $0xba0] sm:$0xff]  ;;  %v7170_v10 = vcombine.low %v478_v61, %v482_v62 }
 0x118   :  { %v534_v61 = vld [vmem:[#allocation5 + $0xd00] sm:$0xff] }
 0x119   :  { %v538_v62 = vld [vmem:[#allocation5 + $0xd20] sm:$0xff] }
 0x11a   :  { %3355 = vmatpush1.bf16.msra.mxu0 %v7114_v13  ;;  %3519 = vmatpush1.bf16.msra.mxu1 %v7116_v14  ;;  %v7179_v13 = vcombine.high %v486_v5, %v490_v6  ;;  %v494_v14 = vld [vmem:[#allocation5 + $0xbc0] sm:$0xff] }
 0x11b   :  { %3356 = vmatprep.subr.bf16.mxu0 %v7123_v16  ;;  %3520 = vmatprep.subr.bf16.mxu1 %v7125_v20  ;;  %v498_v16 = vld [vmem:[#allocation5 + $0xbe0] sm:$0xff]  ;;  %v7178_v20 = vcombine.low %v486_v5, %v490_v6 }
 0x11c   :  { %v542_v5 = vld [vmem:[#allocation5 + $0xd40] sm:$0xff] }
 0x11d   :  { %v546_v6 = vld [vmem:[#allocation5 + $0xd60] sm:$0xff] }
 0x11e   :  { %3357 = vmatpush1.bf16.msra.mxu0 %v7122_v22  ;;  %3521 = vmatpush1.bf16.msra.mxu1 %v7124_v23  ;;  %v7187_v22 = vcombine.high %v494_v14, %v498_v16  ;;  %v502_v23 = vld [vmem:[#allocation5 + $0xc00] sm:$0xff] }
 0x11f   :  { %3358 = vmatprep.subr.bf16.mxu0 %v7131_v26  ;;  %3522 = vmatprep.subr.bf16.mxu1 %v7133_v30  ;;  %v506_v26 = vld [vmem:[#allocation5 + $0xc20] sm:$0xff]  ;;  %v7186_v30 = vcombine.low %v494_v14, %v498_v16 }
 0x120   :  { %v550_v14 = vld [vmem:[#allocation5 + $0xd80] sm:$0xff] }
 0x121   :  { %v554_v16 = vld [vmem:[#allocation5 + $0xda0] sm:$0xff] }
 0x122   :  { %3359 = vmatpush1.bf16.msra.mxu0 %v7130_v32  ;;  %3523 = vmatpush1.bf16.msra.mxu1 %v7132_v33  ;;  %v7188_v32 = vcombine.low %v495_v17, %v499_v19  ;;  %v7195_v33 = vcombine.high %v502_v23, %v506_v26  ;;  %v551_v17 = vld [vmem:[#allocation5 + $0xd88] sm:$0xff] }
 0x123   :  { %3360 = vmatprep.subr.bf16.mxu0 %v7139_v15  ;;  %3524 = vmatprep.subr.bf16.mxu1 %v7141_v38  ;;  %v514_v15 = vld [vmem:[#allocation5 + $0xc60] sm:$0xff]  ;;  %v8757_v38 = vld [vmem:[#allocation2 + $0x18] sm:$0xff]  ;;  %v555_v19 = vld [vmem:[#allocation5 + $0xda8] sm:$0xff] }
 0x124   :  { %v7202_v24 = vcombine.low %v510_v31, %v514_v15 }
 0x126   :  { %3361 = vmatpush1.bf16.msra.mxu0 %v7138_v40  ;;  %3525 = vmatpush1.bf16.msra.mxu1 %v7140_v41  ;;  %v7194_v40 = vcombine.low %v502_v23, %v506_v26  ;;  %v7196_v41 = vcombine.low %v503_v27, %v507_v29  ;;  %v558_v23 = vld [vmem:[#allocation5 + $0xdc0] sm:$0xff]  ;;  %v559_v27 = vld [vmem:[#allocation5 + $0xdc8] sm:$0xff] }
 0x127   :  { %3362 = vmatprep.subr.bf16.mxu0 %v7147_v42  ;;  %3526 = vmatprep.subr.bf16.mxu1 %v7149_v46  ;;  %v7203_v42 = vcombine.high %v510_v31, %v514_v15  ;;  %v7205_v46 = vcombine.high %v511_v35, %v515_v36  ;;  %v562_v26 = vld [vmem:[#allocation5 + $0xde0] sm:$0xff]  ;;  %v563_v29 = vld [vmem:[#allocation5 + $0xde8] sm:$0xff]  ;;  %v7244_v31 = vcombine.low %v551_v17, %v555_v19 }
 0x128   :  { %v570_v15 = vld [vmem:[#allocation5 + $0xe20] sm:$0xff] }
 0x12a   :  { %3363 = vmatpush1.bf16.msra.mxu0 %v7146_v48  ;;  %3527 = vmatpush1.bf16.msra.mxu1 %v7148_v49  ;;  %v8765_v48 = vcombine.high %v8757_v38, %v8757_v38  ;;  %v7204_v49 = vcombine.low %v511_v35, %v515_v36  ;;  %v567_v35 = vld [vmem:[#allocation5 + $0xe08] sm:$0xff]  ;;  %v7253_v36 = vcombine.high %v559_v27, %v563_v29 }
 0x12b   :  { %3364 = vmatprep.subr.bf16.mxu0 %v7155_v50  ;;  %3528 = vmatprep.subr.bf16.mxu1 %v7157_v55  ;;  %v7211_v50 = vcombine.high %v518_v43, %v522_v44  ;;  %v7213_v55 = vcombine.high %v519_v45, %v523_v47 }
 0x12e   :  { %3365 = vmatpush1.bf16.msra.mxu0 %v7154_v58  ;;  %3529 = vmatpush1.bf16.msra.mxu1 %v7156_v59  ;;  %v7210_v58 = vcombine.low %v518_v43, %v522_v44  ;;  %v7212_v59 = vcombine.low %v519_v45, %v523_v47  ;;  %v574_v43 = vld [vmem:[#allocation5 + $0xe40] sm:$0xff]  ;;  %v575_v45 = vld [vmem:[#allocation5 + $0xe48] sm:$0xff] }
 0x12f   :  { %3366 = vmatprep.subr.bf16.mxu0 %v7163_v60  ;;  %3530 = vmatprep.subr.bf16.mxu1 %v7165_v0  ;;  %v7219_v60 = vcombine.high %v526_v51, %v530_v52  ;;  %v7221_v0 = vcombine.high %v527_v54, %v531_v56  ;;  %v578_v44 = vld [vmem:[#allocation5 + $0xe60] sm:$0xff]  ;;  %v579_v47 = vld [vmem:[#allocation5 + $0xe68] sm:$0xff] }
 0x132   :  { %3367 = vmatpush1.bf16.msra.mxu0 %v7162_v2  ;;  %3531 = vmatpush1.bf16.msra.mxu1 %v7164_v3  ;;  %v7218_v2 = vcombine.low %v526_v51, %v530_v52  ;;  %v7220_v3 = vcombine.low %v527_v54, %v531_v56  ;;  %v582_v51 = vld [vmem:[#allocation5 + $0xe80] sm:$0xff]  ;;  %v583_v54 = vld [vmem:[#allocation5 + $0xe88] sm:$0xff] }
 0x133   :  { %3368 = vmatprep.subr.bf16.mxu0 %v7171_v4  ;;  %3532 = vmatprep.subr.bf16.mxu1 %v7173_v8  ;;  %v7227_v4 = vcombine.high %v534_v61, %v538_v62  ;;  %v7229_v8 = vcombine.high %v535_v63, %v539_v1  ;;  %v586_v52 = vld [vmem:[#allocation5 + $0xea0] sm:$0xff]  ;;  %v587_v56 = vld [vmem:[#allocation5 + $0xea8] sm:$0xff] }
 0x136   :  { %3369 = vmatpush1.bf16.msra.mxu0 %v7170_v10  ;;  %3533 = vmatpush1.bf16.msra.mxu1 %v7172_v11  ;;  %v7226_v10 = vcombine.low %v534_v61, %v538_v62  ;;  %v7228_v11 = vcombine.low %v535_v63, %v539_v1  ;;  %v590_v61 = vld [vmem:[#allocation5 + $0xec0] sm:$0xff]  ;;  %v591_v63 = vld [vmem:[#allocation5 + $0xec8] sm:$0xff] }
 0x137   :  { %3370 = vmatprep.subr.bf16.mxu0 %v7179_v13  ;;  %3534 = vmatprep.subr.bf16.mxu1 %v7181_v18  ;;  %v7235_v13 = vcombine.high %v542_v5, %v546_v6  ;;  %v7237_v18 = vcombine.high %v543_v7, %v547_v9  ;;  %v594_v62 = vld [vmem:[#allocation5 + $0xee0] sm:$0xff]  ;;  %v595_v1 = vld [vmem:[#allocation5 + $0xee8] sm:$0xff] }
 0x13a   :  { %3371 = vmatpush1.bf16.msra.mxu0 %v7178_v20  ;;  %3535 = vmatpush1.bf16.msra.mxu1 %v7180_v21  ;;  %v7234_v20 = vcombine.low %v542_v5, %v546_v6  ;;  %v7236_v21 = vcombine.low %v543_v7, %v547_v9  ;;  %v598_v5 = vld [vmem:[#allocation5 + $0xf00] sm:$0xff]  ;;  %v599_v7 = vld [vmem:[#allocation5 + $0xf08] sm:$0xff] }
 0x13b   :  { %3372 = vmatprep.subr.bf16.mxu0 %v7187_v22  ;;  %3536 = vmatprep.subr.bf16.mxu1 %v7189_v28  ;;  %v7243_v22 = vcombine.high %v550_v14, %v554_v16  ;;  %v7245_v28 = vcombine.high %v551_v17, %v555_v19  ;;  %v602_v6 = vld [vmem:[#allocation5 + $0xf20] sm:$0xff]  ;;  %v603_v9 = vld [vmem:[#allocation5 + $0xf28] sm:$0xff] }
 0x13c   :  { %v607_v17 = vld [vmem:[#allocation5 + $0xf48] sm:$0xff] }
 0x13d   :  { %v611_v19 = vld [vmem:[#allocation5 + $0xf68] sm:$0xff] }
 0x13e   :  { %3373 = vmatpush1.bf16.msra.mxu0 %v7186_v30  ;;  %3537 = vmatpush1.bf16.msra.mxu1 %v7188_v32  ;;  %v7242_v30 = vcombine.low %v550_v14, %v554_v16  ;;  %v7251_v32 = vcombine.high %v558_v23, %v562_v26  ;;  %v606_v14 = vld [vmem:[#allocation5 + $0xf40] sm:$0xff] }
 0x13f   :  { %3383 = vmatprep.subr.bf16.mxu0 %v7195_v33  ;;  %3547 = vmatprep.subr.bf16.mxu1 %v7197_v37  ;;  %v566_v33 = vld [vmem:[#allocation5 + $0xe00] sm:$0xff]  ;;  %v571_v37 = vld [vmem:[#allocation5 + $0xe28] sm:$0xff] }
 0x140   :  { %v610_v16 = vld [vmem:[#allocation5 + $0xf60] sm:$0xff] }
 0x141   :  { %3375 = vmatmul.mubr.bf16.vlgmr.msra.gmra.mrb[0].mxu0 %v8761_v39  ;;  %3539 = vmatmul.mubr.bf16.vlgmr.msra.gmra.mrb[0].mxu1 %v8761_v39 }
 0x142   :  { %3384 = vmatpush1.bf16.msra.mxu0 %v7194_v40  ;;  %3548 = vmatpush1.bf16.msra.mxu1 %v7196_v41  ;;  %v7250_v40 = vcombine.low %v558_v23, %v562_v26  ;;  %v7252_v41 = vcombine.low %v559_v27, %v563_v29  ;;  %v614_v23 = vld [vmem:[#allocation5 + $0xf80] sm:$0xff]  ;;  %v615_v27 = vld [vmem:[#allocation5 + $0xf88] sm:$0xff] }
 0x143   :  { %3385 = vmatprep.subr.bf16.mxu0 %v7203_v42  ;;  %3549 = vmatprep.subr.bf16.mxu1 %v7205_v46  ;;  %v7259_v42 = vcombine.high %v566_v33, %v570_v15  ;;  %v7261_v46 = vcombine.high %v567_v35, %v571_v37  ;;  %v618_v26 = vld [vmem:[#allocation5 + $0xfa0] sm:$0xff]  ;;  %v619_v29 = vld [vmem:[#allocation5 + $0xfa8] sm:$0xff] }
 0x144   :  { %3415 = vmatprep.mubr.bf16.mxu0 %v8765_v48  ;;  %3579 = vmatprep.mubr.bf16.mxu1 %v8765_v48 }
 0x146   :  { %3386 = vmatpush1.bf16.msra.mxu0 %v7202_v24  ;;  %3550 = vmatpush1.bf16.msra.mxu1 %v7204_v49  ;;  %v7258_v24 = vcombine.low %v566_v33, %v570_v15  ;;  %v7260_v49 = vcombine.low %v567_v35, %v571_v37  ;;  %v622_v33 = vld [vmem:[#allocation5 + $0xfc0] sm:$0xff]  ;;  %v623_v35 = vld [vmem:[#allocation5 + $0xfc8] sm:$0xff] }
 0x147   :  { %3387 = vmatprep.subr.bf16.mxu0 %v7211_v50  ;;  %3551 = vmatprep.subr.bf16.mxu1 %v7213_v55  ;;  %v7267_v50 = vcombine.high %v574_v43, %v578_v44  ;;  %v7269_v55 = vcombine.high %v575_v45, %v579_v47  ;;  %v626_v15 = vld [vmem:[#allocation5 + $0xfe0] sm:$0xff]  ;;  %v627_v37 = vld [vmem:[#allocation5 + $0xfe8] sm:$0xff] }
 0x14a   :  { %3388 = vmatpush1.bf16.msra.mxu0 %v7210_v58  ;;  %3552 = vmatpush1.bf16.msra.mxu1 %v7212_v59  ;;  %v7266_v58 = vcombine.low %v574_v43, %v578_v44  ;;  %v7268_v59 = vcombine.low %v575_v45, %v579_v47  ;;  %v120_v43 = vld [vmem:[#allocation5 + $0x10] sm:$0xff]  ;;  %v121_v45 = vld [vmem:[#allocation5 + $0x18] sm:$0xff] }
 0x14b   :  { %3389 = vmatprep.subr.bf16.mxu0 %v7219_v60  ;;  %3553 = vmatprep.subr.bf16.mxu1 %v7221_v0  ;;  %v7275_v60 = vcombine.high %v582_v51, %v586_v52  ;;  %v7277_v0 = vcombine.high %v583_v54, %v587_v56  ;;  %v124_v44 = vld [vmem:[#allocation5 + $0x30] sm:$0xff]  ;;  %v125_v47 = vld [vmem:[#allocation5 + $0x38] sm:$0xff] }
 0x14e   :  { %3390 = vmatpush1.bf16.msra.mxu0 %v7218_v2  ;;  %3554 = vmatpush1.bf16.msra.mxu1 %v7220_v3  ;;  %v7274_v2 = vcombine.low %v582_v51, %v586_v52  ;;  %v7276_v3 = vcombine.low %v583_v54, %v587_v56  ;;  %v128_v51 = vld [vmem:[#allocation5 + $0x50] sm:$0xff]  ;;  %v129_v54 = vld [vmem:[#allocation5 + $0x58] sm:$0xff] }
 0x14f   :  { %3391 = vmatprep.subr.bf16.mxu0 %v7227_v4  ;;  %3555 = vmatprep.subr.bf16.mxu1 %v7229_v8  ;;  %v7283_v4 = vcombine.high %v590_v61, %v594_v62  ;;  %v7285_v8 = vcombine.high %v591_v63, %v595_v1  ;;  %v132_v52 = vld [vmem:[#allocation5 + $0x70] sm:$0xff]  ;;  %v133_v56 = vld [vmem:[#allocation5 + $0x78] sm:$0xff] }
 0x152   :  { %3392 = vmatpush1.bf16.msra.mxu0 %v7226_v10  ;;  %3556 = vmatpush1.bf16.msra.mxu1 %v7228_v11  ;;  %v7282_v10 = vcombine.low %v590_v61, %v594_v62  ;;  %v7284_v11 = vcombine.low %v591_v63, %v595_v1  ;;  %v6823_v61 = vcombine.high %v128_v51, %v132_v52  ;;  %v136_v63 = vld [vmem:[#allocation5 + $0x90] sm:$0xff]  ;;  %v137_v1 = vld [vmem:[#allocation5 + $0x98] sm:$0xff] }
 0x153   :  { %3393 = vmatprep.subr.bf16.mxu0 %v7235_v13  ;;  %3557 = vmatprep.subr.bf16.mxu1 %v7237_v18  ;;  %v7291_v13 = vcombine.high %v598_v5, %v602_v6  ;;  %v7293_v18 = vcombine.high %v599_v7, %v603_v9  ;;  %v6825_v62 = vcombine.high %v129_v54, %v133_v56 }
 0x156   :  { %3394 = vmatpush1.bf16.msra.mxu0 %v7234_v20  ;;  %3558 = vmatpush1.bf16.msra.mxu1 %v7236_v21  ;;  %v7290_v20 = vcombine.low %v598_v5, %v602_v6  ;;  %v7292_v21 = vcombine.low %v599_v7, %v603_v9  ;;  %v144_v6 = vld [vmem:[#allocation5 + $0xd0] sm:$0xff]  ;;  %v149_v9 = vld [vmem:[#allocation5 + $0xf8] sm:$0xff] }
 0x157   :  { %3395 = vmatprep.subr.bf16.mxu0 %v7243_v22  ;;  %3559 = vmatprep.subr.bf16.mxu1 %v7245_v28  ;;  %v7299_v22 = vcombine.high %v606_v14, %v610_v16  ;;  %v7301_v28 = vcombine.high %v607_v17, %v611_v19  ;;  %v148_v7 = vld [vmem:[#allocation5 + $0xf0] sm:$0xff] }
 0x15a   :  { %3396 = vmatpush1.bf16.msra.mxu0 %v7242_v30  ;;  %3560 = vmatpush1.bf16.msra.mxu1 %v7244_v31  ;;  %v7298_v30 = vcombine.low %v606_v14, %v610_v16  ;;  %v7300_v31 = vcombine.low %v607_v17, %v611_v19  ;;  %v152_v16 = vld [vmem:[#allocation5 + $0x110] sm:$0xff]  ;;  %v157_v19 = vld [vmem:[#allocation5 + $0x138] sm:$0xff] }
 0x15b   :  { %3397 = vmatprep.subr.bf16.mxu0 %v7251_v32  ;;  %3561 = vmatprep.subr.bf16.mxu1 %v7253_v36  ;;  %v7307_v32 = vcombine.high %v614_v23, %v618_v26  ;;  %v7309_v36 = vcombine.high %v615_v27, %v619_v29  ;;  %v156_v17 = vld [vmem:[#allocation5 + $0x130] sm:$0xff] }
 0x15e   :  { %3398 = vmatpush1.bf16.msra.mxu0 %v7250_v40  ;;  %3562 = vmatpush1.bf16.msra.mxu1 %v7252_v41  ;;  %v7306_v40 = vcombine.low %v614_v23, %v618_v26  ;;  %v7308_v41 = vcombine.low %v615_v27, %v619_v29  ;;  %v160_v23 = vld [vmem:[#allocation5 + $0x150] sm:$0xff]  ;;  %v161_v27 = vld [vmem:[#allocation5 + $0x158] sm:$0xff]  ;;  %v6846_v29 = vcombine.low %v152_v16, %v156_v17 }
 0x15f   :  { %3399 = vmatprep.subr.bf16.mxu0 %v7259_v42  ;;  %3563 = vmatprep.subr.bf16.mxu1 %v7261_v46  ;;  %v7315_v42 = vcombine.high %v622_v33, %v626_v15  ;;  %v7317_v46 = vcombine.high %v623_v35, %v627_v37  ;;  %v164_v26 = vld [vmem:[#allocation5 + $0x170] sm:$0xff] }
 0x162   :  { %3400 = vmatpush1.bf16.msra.mxu0 %v7258_v24  ;;  %3564 = vmatpush1.bf16.msra.mxu1 %v7260_v49  ;;  %v7314_v24 = vcombine.low %v622_v33, %v626_v15  ;;  %v7316_v49 = vcombine.low %v623_v35, %v627_v37  ;;  %v168_v33 = vld [vmem:[#allocation5 + $0x190] sm:$0xff]  ;;  %v169_v35 = vld [vmem:[#allocation5 + $0x198] sm:$0xff]  ;;  %v6854_v37 = vcombine.low %v160_v23, %v164_v26 }
 0x163   :  { %3401 = vmatprep.subr.bf16.mxu0 %v7267_v50  ;;  %3565 = vmatprep.subr.bf16.mxu1 %v7269_v55  ;;  %v6815_v50 = vcombine.high %v120_v43, %v124_v44  ;;  %v6817_v55 = vcombine.high %v121_v45, %v125_v47  ;;  %v172_v15 = vld [vmem:[#allocation5 + $0x1b0] sm:$0xff] }
 0x166   :  { %3402 = vmatpush1.bf16.msra.mxu0 %v7266_v58  ;;  %3566 = vmatpush1.bf16.msra.mxu1 %v7268_v59  ;;  %v8773_v58 = vcombine.low %v8757_v38, %v8757_v38  ;;  %v6814_v59 = vcombine.low %v120_v43, %v124_v44  ;;  %v6824_v38 = vcombine.low %v129_v54, %v133_v56  ;;  %v176_v43 = vld [vmem:[#allocation5 + $0x1d0] sm:$0xff]  ;;  %v185_v54 = vld [vmem:[#allocation5 + $0x218] sm:$0xff] }
 0x167   :  { %3403 = vmatprep.subr.bf16.mxu0 %v7275_v60  ;;  %3567 = vmatprep.subr.bf16.mxu1 %v7277_v0  ;;  %v6816_v60 = vcombine.low %v121_v45, %v125_v47  ;;  %v140_v0 = vld [vmem:[#allocation5 + $0xb0] sm:$0xff]  ;;  %v177_v45 = vld [vmem:[#allocation5 + $0x1d8] sm:$0xff]  ;;  %v6862_v47 = vcombine.low %v168_v33, %v172_v15 }
 0x168   :  { %v180_v44 = vld [vmem:[#allocation5 + $0x1f0] sm:$0xff] }
 0x169   :  { %v6870_v56 = vcombine.low %v176_v43, %v180_v44 }
 0x16a   :  { %3404 = vmatpush1.bf16.msra.mxu0 %v7274_v2  ;;  %3568 = vmatpush1.bf16.msra.mxu1 %v7276_v3  ;;  %v141_v2 = vld [vmem:[#allocation5 + $0xb8] sm:$0xff]  ;;  %v6822_v3 = vcombine.low %v128_v51, %v132_v52  ;;  %v184_v51 = vld [vmem:[#allocation5 + $0x210] sm:$0xff] }
 0x16b   :  { %3405 = vmatprep.subr.bf16.mxu0 %v7283_v4  ;;  %3569 = vmatprep.subr.bf16.mxu1 %v7285_v8  ;;  %v6831_v4 = vcombine.high %v136_v63, %v140_v0  ;;  %v6833_v5 = vcombine.high %v137_v1, %v141_v2  ;;  %v145_v8 = vld [vmem:[#allocation5 + $0xd8] sm:$0xff]  ;;  %v188_v52 = vld [vmem:[#allocation5 + $0x230] sm:$0xff] }
 0x16c   :  { %v6841_v14 = vcombine.high %v145_v8, %v149_v9 }
 0x16e   :  { %3406 = vmatpush1.bf16.msra.mxu0 %v7282_v10  ;;  %3570 = vmatpush1.bf16.msra.mxu1 %v7284_v11  ;;  %v6830_v10 = vcombine.low %v136_v63, %v140_v0  ;;  %v6832_v11 = vcombine.low %v137_v1, %v141_v2  ;;  %v196_v63 = vld [vmem:[#allocation5 + $0x270] sm:$0xff]  ;;  %v193_v0 = vld [vmem:[#allocation5 + $0x258] sm:$0xff]  ;;  %v6878_v2 = vcombine.low %v184_v51, %v188_v52 }
 0x16f   :  { %3407 = vmatprep.subr.bf16.mxu0 %v7291_v13  ;;  %3571 = vmatprep.subr.bf16.mxu1 %v7293_v18  ;;  %v6839_v13 = vcombine.high %v144_v6, %v148_v7  ;;  %v153_v18 = vld [vmem:[#allocation5 + $0x118] sm:$0xff] }
 0x170   :  { %v197_v1 = vld [vmem:[#allocation5 + $0x278] sm:$0xff] }
 0x172   :  { %3408 = vmatpush1.bf16.msra.mxu0 %v7290_v20  ;;  %3572 = vmatpush1.bf16.msra.mxu1 %v7292_v21  ;;  %v6838_v20 = vcombine.low %v144_v6, %v148_v7  ;;  %v6840_v21 = vcombine.low %v145_v8, %v149_v9  ;;  %v204_v6 = vld [vmem:[#allocation5 + $0x2b0] sm:$0xff]  ;;  %v201_v7 = vld [vmem:[#allocation5 + $0x298] sm:$0xff] }
 0x173   :  { %3409 = vmatprep.subr.bf16.mxu0 %v7299_v22  ;;  %3573 = vmatprep.subr.bf16.mxu1 %v7301_v28  ;;  %v6847_v22 = vcombine.high %v152_v16, %v156_v17  ;;  %v165_v28 = vld [vmem:[#allocation5 + $0x178] sm:$0xff]  ;;  %v212_v16 = vld [vmem:[#allocation5 + $0x2f0] sm:$0xff] }
 0x174   :  { %v205_v8 = vld [vmem:[#allocation5 + $0x2b8] sm:$0xff] }
 0x175   :  { %v209_v17 = vld [vmem:[#allocation5 + $0x2d8] sm:$0xff] }
 0x176   :  { %3410 = vmatpush1.bf16.msra.mxu0 %v7298_v30  ;;  %3574 = vmatpush1.bf16.msra.mxu1 %v7300_v31  ;;  %v6848_v30 = vcombine.low %v153_v18, %v157_v19  ;;  %v6855_v31 = vcombine.high %v160_v23, %v164_v26  ;;  %v220_v23 = vld [vmem:[#allocation5 + $0x330] sm:$0xff]  ;;  %v217_v26 = vld [vmem:[#allocation5 + $0x318] sm:$0xff] }
 0x177   :  { %3411 = vmatprep.subr.bf16.mxu0 %v7307_v32  ;;  %3575 = vmatprep.subr.bf16.mxu1 %v7309_v36  ;;  %v6857_v32 = vcombine.high %v161_v27, %v165_v28  ;;  %v173_v36 = vld [vmem:[#allocation5 + $0x1b8] sm:$0xff] }
 0x17a   :  { %3412 = vmatpush1.bf16.msra.mxu0 %v7306_v40  ;;  %3576 = vmatpush1.bf16.msra.mxu1 %v7308_v41  ;;  %v6856_v40 = vcombine.low %v161_v27, %v165_v28  ;;  %v6863_v41 = vcombine.high %v168_v33, %v172_v15  ;;  %v221_v27 = vld [vmem:[#allocation5 + $0x338] sm:$0xff]  ;;  %v228_v33 = vld [vmem:[#allocation5 + $0x370] sm:$0xff] }
 0x17b   :  { %3413 = vmatprep.subr.bf16.mxu0 %v7315_v42  ;;  %3577 = vmatprep.subr.bf16.mxu1 %v7317_v46  ;;  %v6865_v42 = vcombine.high %v169_v35, %v173_v36  ;;  %v181_v46 = vld [vmem:[#allocation5 + $0x1f8] sm:$0xff] }
 0x17c   :  { %v225_v15 = vld [vmem:[#allocation5 + $0x358] sm:$0xff] }
 0x17e   :  { %3414 = vmatpush1.bf16.msra.mxu0 %v7314_v24  ;;  %3578 = vmatpush1.bf16.msra.mxu1 %v7316_v49  ;;  %v6864_v24 = vcombine.low %v169_v35, %v173_v36  ;;  %v6871_v49 = vcombine.high %v176_v43, %v180_v44  ;;  %v229_v35 = vld [vmem:[#allocation5 + $0x378] sm:$0xff]  ;;  %v236_v43 = vld [vmem:[#allocation5 + $0x3b0] sm:$0xff] }
 0x17f   :  { %3588 = vmatprep.subr.bf16.mxu0 %v6815_v50  ;;  %3752 = vmatprep.subr.bf16.mxu1 %v6817_v55  ;;  %v6873_v50 = vcombine.high %v177_v45, %v181_v46  ;;  %v189_v55 = vld [vmem:[#allocation5 + $0x238] sm:$0xff] }
 0x180   :  { %v233_v44 = vld [vmem:[#allocation5 + $0x398] sm:$0xff] }
 0x181   :  { %3416 = vmatmul.mubr.bf16.vlgmr.msra.gmra.mrb[0].mxu0 %v8773_v58  ;;  %3580 = vmatmul.mubr.bf16.vlgmr.msra.gmra.mrb[0].mxu1 %v8773_v58 }
 0x182   :  { %3589 = vmatpush1.bf16.msra.mxu0 %v6814_v59  ;;  %3753 = vmatpush1.bf16.msra.mxu1 %v6816_v60  ;;  %v6872_v59 = vcombine.low %v177_v45, %v181_v46  ;;  %v6879_v60 = vcombine.high %v184_v51, %v188_v52  ;;  %v237_v45 = vld [vmem:[#allocation5 + $0x3b8] sm:$0xff]  ;;  %v244_v51 = vld [vmem:[#allocation5 + $0x3f0] sm:$0xff] }
 0x183   :  { %3590 = vmatprep.subr.bf16.mxu0 %v6823_v61  ;;  %3754 = vmatprep.subr.bf16.mxu1 %v6825_v62  ;;  %v6881_v61 = vcombine.high %v185_v54, %v189_v55  ;;  %v192_v62 = vld [vmem:[#allocation5 + $0x250] sm:$0xff]  ;;  %v241_v52 = vld [vmem:[#allocation5 + $0x3d8] sm:$0xff] }
 0x184   :  { %3620 = vmatprep.mubr.bf16.mxu0 %v8725_v57  ;;  %3784 = vmatprep.mubr.bf16.mxu1 %v8725_v57  ;;  %v6849_v57 = vcombine.high %v153_v18, %v157_v19  ;;  %v6886_v9 = vcombine.low %v192_v62, %v196_v63  ;;  %v213_v18 = vld [vmem:[#allocation5 + $0x2f8] sm:$0xff] }
 0x186   :  { %3591 = vmatpush1.bf16.msra.mxu0 %v6822_v3  ;;  %3755 = vmatpush1.bf16.msra.mxu1 %v6824_v38  ;;  %v6880_v3 = vcombine.low %v185_v54, %v189_v55  ;;  %v6887_v38 = vcombine.high %v192_v62, %v196_v63  ;;  %v245_v54 = vld [vmem:[#allocation5 + $0x3f8] sm:$0xff]  ;;  %v252_v62 = vld [vmem:[#allocation5 + $0x430] sm:$0xff] }
 0x187   :  { %3592 = vmatprep.subr.bf16.mxu0 %v6831_v4  ;;  %3756 = vmatprep.subr.bf16.mxu1 %v6833_v5  ;;  %v6889_v4 = vcombine.high %v193_v0, %v197_v1  ;;  %v200_v5 = vld [vmem:[#allocation5 + $0x290] sm:$0xff]  ;;  %v249_v63 = vld [vmem:[#allocation5 + $0x418] sm:$0xff] }
 0x188   :  { %v6894_v19 = vcombine.low %v200_v5, %v204_v6 }
 0x18a   :  { %3593 = vmatpush1.bf16.msra.mxu0 %v6830_v10  ;;  %3757 = vmatpush1.bf16.msra.mxu1 %v6832_v11  ;;  %v6888_v10 = vcombine.low %v193_v0, %v197_v1  ;;  %v6895_v11 = vcombine.high %v200_v5, %v204_v6  ;;  %v253_v0 = vld [vmem:[#allocation5 + $0x438] sm:$0xff]  ;;  %v260_v5 = vld [vmem:[#allocation5 + $0x470] sm:$0xff] }
 0x18b   :  { %3594 = vmatprep.subr.bf16.mxu0 %v6839_v13  ;;  %3758 = vmatprep.subr.bf16.mxu1 %v6841_v14  ;;  %v6897_v13 = vcombine.high %v201_v7, %v205_v8  ;;  %v208_v14 = vld [vmem:[#allocation5 + $0x2d0] sm:$0xff]  ;;  %v257_v6 = vld [vmem:[#allocation5 + $0x458] sm:$0xff] }
 0x18c   :  { %v6902_v28 = vcombine.low %v208_v14, %v212_v16 }
 0x18e   :  { %3595 = vmatpush1.bf16.msra.mxu0 %v6838_v20  ;;  %3759 = vmatpush1.bf16.msra.mxu1 %v6840_v21  ;;  %v6896_v20 = vcombine.low %v201_v7, %v205_v8  ;;  %v6903_v21 = vcombine.high %v208_v14, %v212_v16  ;;  %v261_v7 = vld [vmem:[#allocation5 + $0x478] sm:$0xff]  ;;  %v268_v14 = vld [vmem:[#allocation5 + $0x4b0] sm:$0xff] }
 0x18f   :  { %3596 = vmatprep.subr.bf16.mxu0 %v6847_v22  ;;  %3760 = vmatprep.subr.bf16.mxu1 %v6849_v57  ;;  %v6905_v22 = vcombine.high %v209_v17, %v213_v18  ;;  %v216_v57 = vld [vmem:[#allocation5 + $0x310] sm:$0xff]  ;;  %v265_v16 = vld [vmem:[#allocation5 + $0x498] sm:$0xff] }
 0x190   :  { %v6910_v36 = vcombine.low %v216_v57, %v220_v23 }
 0x192   :  { %3597 = vmatpush1.bf16.msra.mxu0 %v6846_v29  ;;  %3761 = vmatpush1.bf16.msra.mxu1 %v6848_v30  ;;  %v6904_v29 = vcombine.low %v209_v17, %v213_v18  ;;  %v6911_v30 = vcombine.high %v216_v57, %v220_v23  ;;  %v269_v17 = vld [vmem:[#allocation5 + $0x4b8] sm:$0xff]  ;;  %v276_v57 = vld [vmem:[#allocation5 + $0x4f0] sm:$0xff] }
 0x193   :  { %3598 = vmatprep.subr.bf16.mxu0 %v6855_v31  ;;  %3762 = vmatprep.subr.bf16.mxu1 %v6857_v32  ;;  %v6913_v31 = vcombine.high %v217_v26, %v221_v27  ;;  %v224_v32 = vld [vmem:[#allocation5 + $0x350] sm:$0xff]  ;;  %v273_v23 = vld [vmem:[#allocation5 + $0x4d8] sm:$0xff] }
 0x194   :  { %v6918_v46 = vcombine.low %v224_v32, %v228_v33 }
 0x196   :  { %3599 = vmatpush1.bf16.msra.mxu0 %v6854_v37  ;;  %3763 = vmatpush1.bf16.msra.mxu1 %v6856_v40  ;;  %v6912_v37 = vcombine.low %v217_v26, %v221_v27  ;;  %v6919_v40 = vcombine.high %v224_v32, %v228_v33  ;;  %v277_v26 = vld [vmem:[#allocation5 + $0x4f8] sm:$0xff] }
 0x197   :  { %3600 = vmatprep.subr.bf16.mxu0 %v6863_v41  ;;  %3764 = vmatprep.subr.bf16.mxu1 %v6865_v42  ;;  %v6921_v41 = vcombine.high %v225_v15, %v229_v35  ;;  %v232_v42 = vld [vmem:[#allocation5 + $0x390] sm:$0xff]  ;;  %v281_v32 = vld [vmem:[#allocation5 + $0x518] sm:$0xff] }
 0x198   :  { %v6926_v55 = vcombine.low %v232_v42, %v236_v43  ;;  %v285_v33 = vld [vmem:[#allocation5 + $0x538] sm:$0xff] }
 0x19a   :  { %3601 = vmatpush1.bf16.msra.mxu0 %v6862_v47  ;;  %3765 = vmatpush1.bf16.msra.mxu1 %v6864_v24  ;;  %v6920_v47 = vcombine.low %v225_v15, %v229_v35  ;;  %v6927_v24 = vcombine.high %v232_v42, %v236_v43  ;;  %v6968_v35 = vcombine.low %v273_v23, %v277_v26  ;;  %v293_v42 = vld [vmem:[#allocation5 + $0x578] sm:$0xff] }
 0x19b   :  { %3602 = vmatprep.subr.bf16.mxu0 %v6871_v49  ;;  %3766 = vmatprep.subr.bf16.mxu1 %v6873_v50  ;;  %v6929_v49 = vcombine.high %v233_v44, %v237_v45  ;;  %v240_v50 = vld [vmem:[#allocation5 + $0x3d0] sm:$0xff] }
 0x19c   :  { %v6934_v1 = vcombine.low %v240_v50, %v244_v51 }
 0x19e   :  { %3603 = vmatpush1.bf16.msra.mxu0 %v6870_v56  ;;  %3767 = vmatpush1.bf16.msra.mxu1 %v6872_v59  ;;  %v6928_v56 = vcombine.low %v233_v44, %v237_v45  ;;  %v6935_v59 = vcombine.high %v240_v50, %v244_v51  ;;  %v6976_v44 = vcombine.low %v281_v32, %v285_v33  ;;  %v301_v50 = vld [vmem:[#allocation5 + $0x5b8] sm:$0xff] }
 0x19f   :  { %3604 = vmatprep.subr.bf16.mxu0 %v6879_v60  ;;  %3768 = vmatprep.subr.bf16.mxu1 %v6881_v61  ;;  %v6937_v60 = vcombine.high %v241_v52, %v245_v54  ;;  %v248_v61 = vld [vmem:[#allocation5 + $0x410] sm:$0xff] }
 0x1a0   :  { %v6942_v8 = vcombine.low %v248_v61, %v252_v62 }
 0x1a2   :  { %3605 = vmatpush1.bf16.msra.mxu0 %v6878_v2  ;;  %3769 = vmatpush1.bf16.msra.mxu1 %v6880_v3  ;;  %v6936_v2 = vcombine.low %v241_v52, %v245_v54  ;;  %v6943_v3 = vcombine.high %v248_v61, %v252_v62  ;;  %v309_v61 = vld [vmem:[#allocation5 + $0x5f8] sm:$0xff] }
 0x1a3   :  { %3606 = vmatprep.subr.bf16.mxu0 %v6887_v38  ;;  %3770 = vmatprep.subr.bf16.mxu1 %v6889_v4  ;;  %v6945_v38 = vcombine.high %v249_v63, %v253_v0  ;;  %v256_v4 = vld [vmem:[#allocation5 + $0x450] sm:$0xff] }
 0x1a4   :  { %v6950_v18 = vcombine.low %v256_v4, %v260_v5 }
 0x1a6   :  { %3607 = vmatpush1.bf16.msra.mxu0 %v6886_v9  ;;  %3771 = vmatpush1.bf16.msra.mxu1 %v6888_v10  ;;  %v6944_v9 = vcombine.low %v249_v63, %v253_v0  ;;  %v6951_v10 = vcombine.high %v256_v4, %v260_v5  ;;  %v317_v4 = vld [vmem:[#allocation5 + $0x638] sm:$0xff] }
 0x1a7   :  { %3608 = vmatprep.subr.bf16.mxu0 %v6895_v11  ;;  %3772 = vmatprep.subr.bf16.mxu1 %v6897_v13  ;;  %v6953_v11 = vcombine.high %v257_v6, %v261_v7  ;;  %v264_v13 = vld [vmem:[#allocation5 + $0x490] sm:$0xff] }
 0x1a8   :  { %v6958_v27 = vcombine.low %v264_v13, %v268_v14 }
 0x1aa   :  { %3609 = vmatpush1.bf16.msra.mxu0 %v6894_v19  ;;  %3773 = vmatpush1.bf16.msra.mxu1 %v6896_v20  ;;  %v6952_v19 = vcombine.low %v257_v6, %v261_v7  ;;  %v6959_v20 = vcombine.high %v264_v13, %v268_v14  ;;  %v325_v13 = vld [vmem:[#allocation5 + $0x678] sm:$0xff] }
 0x1ab   :  { %3610 = vmatprep.subr.bf16.mxu0 %v6903_v21  ;;  %3774 = vmatprep.subr.bf16.mxu1 %v6905_v22  ;;  %v6961_v21 = vcombine.high %v265_v16, %v269_v17  ;;  %v272_v22 = vld [vmem:[#allocation5 + $0x4d0] sm:$0xff] }
 0x1ac   :  { %v6966_v15 = vcombine.low %v272_v22, %v276_v57 }
 0x1ae   :  { %3611 = vmatpush1.bf16.msra.mxu0 %v6902_v28  ;;  %3775 = vmatpush1.bf16.msra.mxu1 %v6904_v29  ;;  %v6967_v28 = vcombine.high %v272_v22, %v276_v57  ;;  %v6969_v29 = vcombine.high %v273_v23, %v277_v26  ;;  %v333_v22 = vld [vmem:[#allocation5 + $0x6b8] sm:$0xff] }
 0x1af   :  { %3612 = vmatprep.subr.bf16.mxu0 %v6911_v30  ;;  %3776 = vmatprep.subr.bf16.mxu1 %v6913_v31  ;;  %v280_v30 = vld [vmem:[#allocation5 + $0x510] sm:$0xff] }
 0x1b0   :  { %v284_v31 = vld [vmem:[#allocation5 + $0x530] sm:$0xff] }
 0x1b1   :  { %v6974_v43 = vcombine.low %v280_v30, %v284_v31 }
 0x1b2   :  { %3613 = vmatpush1.bf16.msra.mxu0 %v6910_v36  ;;  %3777 = vmatpush1.bf16.msra.mxu1 %v6912_v37  ;;  %v6975_v36 = vcombine.high %v280_v30, %v284_v31  ;;  %v288_v37 = vld [vmem:[#allocation5 + $0x550] sm:$0xff]  ;;  %v341_v30 = vld [vmem:[#allocation5 + $0x6f8] sm:$0xff] }
 0x1b3   :  { %3614 = vmatprep.subr.bf16.mxu0 %v6919_v40  ;;  %3778 = vmatprep.subr.bf16.mxu1 %v6921_v41  ;;  %v292_v40 = vld [vmem:[#allocation5 + $0x570] sm:$0xff]  ;;  %v289_v41 = vld [vmem:[#allocation5 + $0x558] sm:$0xff] }
 0x1b4   :  { %v6983_v45 = vcombine.high %v288_v37, %v292_v40  ;;  %v6982_v51 = vcombine.low %v288_v37, %v292_v40  ;;  %v6984_v52 = vcombine.low %v289_v41, %v293_v42  ;;  %v349_v37 = vld [vmem:[#allocation5 + $0x738] sm:$0xff] }
 0x1b6   :  { %3615 = vmatpush1.bf16.msra.mxu0 %v6918_v46  ;;  %3779 = vmatpush1.bf16.msra.mxu1 %v6920_v47  ;;  %v6985_v46 = vcombine.high %v289_v41, %v293_v42  ;;  %v296_v47 = vld [vmem:[#allocation5 + $0x590] sm:$0xff] }
 0x1b7   :  { %3616 = vmatprep.subr.bf16.mxu0 %v6927_v24  ;;  %3780 = vmatprep.subr.bf16.mxu1 %v6929_v49  ;;  %v300_v24 = vld [vmem:[#allocation5 + $0x5b0] sm:$0xff]  ;;  %v297_v49 = vld [vmem:[#allocation5 + $0x598] sm:$0xff] }
 0x1b8   :  { %v6991_v54 = vcombine.high %v296_v47, %v300_v24  ;;  %v6990_v62 = vcombine.low %v296_v47, %v300_v24  ;;  %v6992_v63 = vcombine.low %v297_v49, %v301_v50  ;;  %v357_v47 = vld [vmem:[#allocation5 + $0x778] sm:$0xff] }
 0x1ba   :  { %3617 = vmatpush1.bf16.msra.mxu0 %v6926_v55  ;;  %3781 = vmatpush1.bf16.msra.mxu1 %v6928_v56  ;;  %v6993_v55 = vcombine.high %v297_v49, %v301_v50  ;;  %v304_v56 = vld [vmem:[#allocation5 + $0x5d0] sm:$0xff] }
 0x1bb   :  { %3618 = vmatprep.subr.bf16.mxu0 %v6935_v59  ;;  %3782 = vmatprep.subr.bf16.mxu1 %v6937_v60  ;;  %v308_v59 = vld [vmem:[#allocation5 + $0x5f0] sm:$0xff]  ;;  %v305_v60 = vld [vmem:[#allocation5 + $0x5d8] sm:$0xff] }
 0x1bc   :  { %v6999_v0 = vcombine.high %v304_v56, %v308_v59  ;;  %v6998_v5 = vcombine.low %v304_v56, %v308_v59  ;;  %v7000_v6 = vcombine.low %v305_v60, %v309_v61  ;;  %v365_v56 = vld [vmem:[#allocation5 + $0x7b8] sm:$0xff] }
 0x1be   :  { %3619 = vmatpush1.bf16.msra.mxu0 %v6934_v1  ;;  %3783 = vmatpush1.bf16.msra.mxu1 %v6936_v2  ;;  %v7001_v1 = vcombine.high %v305_v60, %v309_v61  ;;  %v312_v2 = vld [vmem:[#allocation5 + $0x610] sm:$0xff] }
 0x1bf   :  { %3629 = vmatprep.subr.bf16.mxu0 %v6943_v3  ;;  %3793 = vmatprep.subr.bf16.mxu1 %v6945_v38  ;;  %v316_v3 = vld [vmem:[#allocation5 + $0x630] sm:$0xff]  ;;  %v313_v38 = vld [vmem:[#allocation5 + $0x618] sm:$0xff] }
 0x1c0   :  { %v7007_v7 = vcombine.high %v312_v2, %v316_v3  ;;  %v7006_v14 = vcombine.low %v312_v2, %v316_v3  ;;  %v373_v2 = vld [vmem:[#allocation5 + $0x7f8] sm:$0xff] }
 0x1c1   :  { %3621 = vmatmul.mubr.bf16.vlgmr.msra.gmra.mrb[4].mxu0 %v8731_v12  ;;  %3785 = vmatmul.mubr.bf16.vlgmr.msra.gmra.mrb[4].mxu1 %v8731_v12  ;;  %v6960_v12 = vcombine.low %v265_v16, %v269_v17  ;;  %v7008_v16 = vcombine.low %v313_v38, %v317_v4 }
 0x1c2   :  { %3630 = vmatpush1.bf16.msra.mxu0 %v6942_v8  ;;  %3794 = vmatpush1.bf16.msra.mxu1 %v6944_v9  ;;  %v7009_v8 = vcombine.high %v313_v38, %v317_v4  ;;  %v320_v9 = vld [vmem:[#allocation5 + $0x650] sm:$0xff] }
 0x1c3   :  { %3631 = vmatprep.subr.bf16.mxu0 %v6951_v10  ;;  %3795 = vmatprep.subr.bf16.mxu1 %v6953_v11  ;;  %v324_v10 = vld [vmem:[#allocation5 + $0x670] sm:$0xff]  ;;  %v321_v11 = vld [vmem:[#allocation5 + $0x658] sm:$0xff] }
 0x1c4   :  { %3661 = vmatprep.mubr.bf16.mxu0 %v8737_v53  ;;  %3825 = vmatprep.mubr.bf16.mxu1 %v8737_v53  ;;  %v6977_v53 = vcombine.high %v281_v32, %v285_v33  ;;  %v7015_v17 = vcombine.high %v320_v9, %v324_v10  ;;  %v7014_v57 = vcombine.low %v320_v9, %v324_v10  ;;  %v381_v9 = vld [vmem:[#allocation5 + $0x838] sm:$0xff] }
 0x1c5   :  { %v7016_v23 = vcombine.low %v321_v11, %v325_v13 }
 0x1c6   :  { %3632 = vmatpush1.bf16.msra.mxu0 %v6950_v18  ;;  %3796 = vmatpush1.bf16.msra.mxu1 %v6952_v19  ;;  %v7017_v18 = vcombine.high %v321_v11, %v325_v13  ;;  %v328_v19 = vld [vmem:[#allocation5 + $0x690] sm:$0xff] }
 0x1c7   :  { %3633 = vmatprep.subr.bf16.mxu0 %v6959_v20  ;;  %3797 = vmatprep.subr.bf16.mxu1 %v6961_v21  ;;  %v332_v20 = vld [vmem:[#allocation5 + $0x6b0] sm:$0xff]  ;;  %v329_v21 = vld [vmem:[#allocation5 + $0x698] sm:$0xff] }
 0x1c8   :  { %v7023_v26 = vcombine.high %v328_v19, %v332_v20  ;;  %v7022_v31 = vcombine.low %v328_v19, %v332_v20  ;;  %v7024_v32 = vcombine.low %v329_v21, %v333_v22  ;;  %v389_v19 = vld [vmem:[#allocation5 + $0x878] sm:$0xff] }
 0x1ca   :  { %3634 = vmatpush1.bf16.msra.mxu0 %v6958_v27  ;;  %3798 = vmatpush1.bf16.msra.mxu1 %v6960_v12  ;;  %v7025_v27 = vcombine.high %v329_v21, %v333_v22  ;;  %v336_v12 = vld [vmem:[#allocation5 + $0x6d0] sm:$0xff] }
 0x1cb   :  { %3635 = vmatprep.subr.bf16.mxu0 %v6967_v28  ;;  %3799 = vmatprep.subr.bf16.mxu1 %v6969_v29  ;;  %v340_v28 = vld [vmem:[#allocation5 + $0x6f0] sm:$0xff]  ;;  %v337_v29 = vld [vmem:[#allocation5 + $0x6d8] sm:$0xff] }
 0x1cc   :  { %v7031_v33 = vcombine.high %v336_v12, %v340_v28  ;;  %v7030_v40 = vcombine.low %v336_v12, %v340_v28  ;;  %v7032_v41 = vcombine.low %v337_v29, %v341_v30  ;;  %v397_v12 = vld [vmem:[#allocation5 + $0x8b8] sm:$0xff] }
 0x1ce   :  { %3636 = vmatpush1.bf16.msra.mxu0 %v6966_v15  ;;  %3800 = vmatpush1.bf16.msra.mxu1 %v6968_v35  ;;  %v7033_v15 = vcombine.high %v337_v29, %v341_v30  ;;  %v344_v35 = vld [vmem:[#allocation5 + $0x710] sm:$0xff] }
 0x1cf   :  { %3637 = vmatprep.subr.bf16.mxu0 %v6975_v36  ;;  %3801 = vmatprep.subr.bf16.mxu1 %v6977_v53  ;;  %v348_v36 = vld [vmem:[#allocation5 + $0x730] sm:$0xff]  ;;  %v345_v53 = vld [vmem:[#allocation5 + $0x718] sm:$0xff] }
 0x1d0   :  { %v7039_v42 = vcombine.high %v344_v35, %v348_v36  ;;  %v7038_v24 = vcombine.low %v344_v35, %v348_v36  ;;  %v7040_v49 = vcombine.low %v345_v53, %v349_v37  ;;  %v405_v35 = vld [vmem:[#allocation5 + $0x8f8] sm:$0xff] }
 0x1d2   :  { %3638 = vmatpush1.bf16.msra.mxu0 %v6974_v43  ;;  %3802 = vmatpush1.bf16.msra.mxu1 %v6976_v44  ;;  %v7041_v43 = vcombine.high %v345_v53, %v349_v37  ;;  %v352_v44 = vld [vmem:[#allocation5 + $0x750] sm:$0xff] }
 0x1d3   :  { %3639 = vmatprep.subr.bf16.mxu0 %v6983_v45  ;;  %3803 = vmatprep.subr.bf16.mxu1 %v6985_v46  ;;  %v356_v45 = vld [vmem:[#allocation5 + $0x770] sm:$0xff]  ;;  %v353_v46 = vld [vmem:[#allocation5 + $0x758] sm:$0xff] }
 0x1d4   :  { %v7047_v50 = vcombine.high %v352_v44, %v356_v45  ;;  %v7046_v59 = vcombine.low %v352_v44, %v356_v45  ;;  %v7048_v60 = vcombine.low %v353_v46, %v357_v47 }
 0x1d6   :  { %3640 = vmatpush1.bf16.msra.mxu0 %v6982_v51  ;;  %3804 = vmatpush1.bf16.msra.mxu1 %v6984_v52  ;;  %v7049_v51 = vcombine.high %v353_v46, %v357_v47  ;;  %v360_v52 = vld [vmem:[#allocation5 + $0x790] sm:$0xff] }
 0x1d7   :  { %3641 = vmatprep.subr.bf16.mxu0 %v6991_v54  ;;  %3805 = vmatprep.subr.bf16.mxu1 %v6993_v55  ;;  %v364_v54 = vld [vmem:[#allocation5 + $0x7b0] sm:$0xff]  ;;  %v361_v55 = vld [vmem:[#allocation5 + $0x798] sm:$0xff] }
 0x1d8   :  { %v7055_v61 = vcombine.high %v360_v52, %v364_v54  ;;  %v7054_v3 = vcombine.low %v360_v52, %v364_v54  ;;  %v7056_v38 = vcombine.low %v361_v55, %v365_v56  ;;  %v416_v47 = vld [vmem:[#allocation5 + $0x950] sm:$0xff] }
 0x1da   :  { %3642 = vmatpush1.bf16.msra.mxu0 %v6990_v62  ;;  %3806 = vmatpush1.bf16.msra.mxu1 %v6992_v63  ;;  %v7057_v62 = vcombine.high %v361_v55, %v365_v56  ;;  %v368_v63 = vld [vmem:[#allocation5 + $0x7d0] sm:$0xff] }
 0x1db   :  { %3643 = vmatprep.subr.bf16.mxu0 %v6999_v0  ;;  %3807 = vmatprep.subr.bf16.mxu1 %v7001_v1  ;;  %v372_v0 = vld [vmem:[#allocation5 + $0x7f0] sm:$0xff]  ;;  %v369_v1 = vld [vmem:[#allocation5 + $0x7d8] sm:$0xff] }
 0x1dc   :  { %v7063_v4 = vcombine.high %v368_v63, %v372_v0  ;;  %v7062_v10 = vcombine.low %v368_v63, %v372_v0  ;;  %v7064_v11 = vcombine.low %v369_v1, %v373_v2  ;;  %v424_v56 = vld [vmem:[#allocation5 + $0x990] sm:$0xff] }
 0x1de   :  { %3644 = vmatpush1.bf16.msra.mxu0 %v6998_v5  ;;  %3808 = vmatpush1.bf16.msra.mxu1 %v7000_v6  ;;  %v7065_v5 = vcombine.high %v369_v1, %v373_v2  ;;  %v376_v6 = vld [vmem:[#allocation5 + $0x810] sm:$0xff] }
 0x1df   :  { %3645 = vmatprep.subr.bf16.mxu0 %v7007_v7  ;;  %3809 = vmatprep.subr.bf16.mxu1 %v7009_v8  ;;  %v380_v7 = vld [vmem:[#allocation5 + $0x830] sm:$0xff]  ;;  %v377_v8 = vld [vmem:[#allocation5 + $0x818] sm:$0xff] }
 0x1e0   :  { %v7071_v13 = vcombine.high %v376_v6, %v380_v7  ;;  %v7070_v20 = vcombine.low %v376_v6, %v380_v7  ;;  %v7072_v21 = vcombine.low %v377_v8, %v381_v9  ;;  %v432_v2 = vld [vmem:[#allocation5 + $0x9d0] sm:$0xff] }
 0x1e2   :  { %3646 = vmatpush1.bf16.msra.mxu0 %v7006_v14  ;;  %3810 = vmatpush1.bf16.msra.mxu1 %v7008_v16  ;;  %v7073_v14 = vcombine.high %v377_v8, %v381_v9  ;;  %v384_v16 = vld [vmem:[#allocation5 + $0x850] sm:$0xff] }
 0x1e3   :  { %3647 = vmatprep.subr.bf16.mxu0 %v7015_v17  ;;  %3811 = vmatprep.subr.bf16.mxu1 %v7017_v18  ;;  %v388_v17 = vld [vmem:[#allocation5 + $0x870] sm:$0xff]  ;;  %v385_v18 = vld [vmem:[#allocation5 + $0x858] sm:$0xff] }
 0x1e4   :  { %v7079_v22 = vcombine.high %v384_v16, %v388_v17  ;;  %v7078_v28 = vcombine.low %v384_v16, %v388_v17  ;;  %v7080_v29 = vcombine.low %v385_v18, %v389_v19  ;;  %v440_v9 = vld [vmem:[#allocation5 + $0xa10] sm:$0xff] }
 0x1e6   :  { %3648 = vmatpush1.bf16.msra.mxu0 %v7014_v57  ;;  %3812 = vmatpush1.bf16.msra.mxu1 %v7016_v23  ;;  %v7081_v57 = vcombine.high %v385_v18, %v389_v19  ;;  %v392_v23 = vld [vmem:[#allocation5 + $0x890] sm:$0xff] }
 0x1e7   :  { %3649 = vmatprep.subr.bf16.mxu0 %v7023_v26  ;;  %3813 = vmatprep.subr.bf16.mxu1 %v7025_v27  ;;  %v396_v26 = vld [vmem:[#allocation5 + $0x8b0] sm:$0xff]  ;;  %v393_v27 = vld [vmem:[#allocation5 + $0x898] sm:$0xff] }
 0x1e8   :  { %v7087_v30 = vcombine.high %v392_v23, %v396_v26  ;;  %v7086_v36 = vcombine.low %v392_v23, %v396_v26  ;;  %v448_v19 = vld [vmem:[#allocation5 + $0xa50] sm:$0xff] }
 0x1ea   :  { %3650 = vmatpush1.bf16.msra.mxu0 %v7022_v31  ;;  %3814 = vmatpush1.bf16.msra.mxu1 %v7024_v32  ;;  %v7089_v31 = vcombine.high %v393_v27, %v397_v12  ;;  %v400_v32 = vld [vmem:[#allocation5 + $0x8d0] sm:$0xff] }
 0x1eb   :  { %3651 = vmatprep.subr.bf16.mxu0 %v7031_v33  ;;  %3815 = vmatprep.subr.bf16.mxu1 %v7033_v15  ;;  %v404_v33 = vld [vmem:[#allocation5 + $0x8f0] sm:$0xff]  ;;  %v401_v15 = vld [vmem:[#allocation5 + $0x8d8] sm:$0xff] }
 0x1ec   :  { %v7095_v53 = vcombine.high %v400_v32, %v404_v33  ;;  %v7097_v37 = vcombine.high %v401_v15, %v405_v35  ;;  %v7094_v44 = vcombine.low %v400_v32, %v404_v33  ;;  %v7096_v45 = vcombine.low %v401_v15, %v405_v35  ;;  %v464_v35 = vld [vmem:[#allocation5 + $0xad0] sm:$0xff] }
 0x1ee   :  { %3652 = vmatpush1.bf16.msra.mxu0 %v7030_v40  ;;  %3816 = vmatpush1.bf16.msra.mxu1 %v7032_v41  ;;  %v408_v40 = vld [vmem:[#allocation5 + $0x910] sm:$0xff] }
 0x1ef   :  { %3653 = vmatprep.subr.bf16.mxu0 %v7039_v42  ;;  %3817 = vmatprep.subr.bf16.mxu1 %v7041_v43  ;;  %v412_v41 = vld [vmem:[#allocation5 + $0x930] sm:$0xff]  ;;  %v409_v42 = vld [vmem:[#allocation5 + $0x918] sm:$0xff] }
 0x1f0   :  { %v413_v43 = vld [vmem:[#allocation5 + $0x938] sm:$0xff]  ;;  %v7103_v46 = vcombine.high %v408_v40, %v412_v41 }
 0x1f1   :  { %v7104_v52 = vcombine.low %v409_v42, %v413_v43 }
 0x1f2   :  { %3654 = vmatpush1.bf16.msra.mxu0 %v7038_v24  ;;  %3818 = vmatpush1.bf16.msra.mxu1 %v7040_v49  ;;  %v420_v24 = vld [vmem:[#allocation5 + $0x970] sm:$0xff]  ;;  %v417_v49 = vld [vmem:[#allocation5 + $0x958] sm:$0xff] }
 0x1f3   :  { %3655 = vmatprep.subr.bf16.mxu0 %v7047_v50  ;;  %3819 = vmatprep.subr.bf16.mxu1 %v7049_v51  ;;  %v421_v50 = vld [vmem:[#allocation5 + $0x978] sm:$0xff]  ;;  %v7102_v51 = vcombine.low %v408_v40, %v412_v41  ;;  %v7111_v54 = vcombine.high %v416_v47, %v420_v24 }
 0x1f4   :  { %v7113_v55 = vcombine.high %v417_v49, %v421_v50  ;;  %v7112_v63 = vcombine.low %v417_v49, %v421_v50  ;;  %v480_v50 = vld [vmem:[#allocation5 + $0xb50] sm:$0xff] }
 0x1f6   :  { %3656 = vmatpush1.bf16.msra.mxu0 %v7046_v59  ;;  %3820 = vmatpush1.bf16.msra.mxu1 %v7048_v60  ;;  %v428_v59 = vld [vmem:[#allocation5 + $0x9b0] sm:$0xff]  ;;  %v425_v60 = vld [vmem:[#allocation5 + $0x998] sm:$0xff] }
 0x1f7   :  { %3657 = vmatprep.subr.bf16.mxu0 %v7055_v61  ;;  %3821 = vmatprep.subr.bf16.mxu1 %v7057_v62  ;;  %v429_v61 = vld [vmem:[#allocation5 + $0x9b8] sm:$0xff]  ;;  %v7110_v62 = vcombine.low %v416_v47, %v420_v24  ;;  %v7119_v0 = vcombine.high %v424_v56, %v428_v59 }
 0x1f8   :  { %v7121_v1 = vcombine.high %v425_v60, %v429_v61  ;;  %v7120_v6 = vcombine.low %v425_v60, %v429_v61  ;;  %v488_v61 = vld [vmem:[#allocation5 + $0xb90] sm:$0xff] }
 0x1fa   :  { %3658 = vmatpush1.bf16.msra.mxu0 %v7054_v3  ;;  %3822 = vmatpush1.bf16.msra.mxu1 %v7056_v38  ;;  %v436_v3 = vld [vmem:[#allocation5 + $0x9f0] sm:$0xff]  ;;  %v433_v38 = vld [vmem:[#allocation5 + $0x9d8] sm:$0xff] }
 0x1fb   :  { %3659 = vmatprep.subr.bf16.mxu0 %v7063_v4  ;;  %3823 = vmatprep.subr.bf16.mxu1 %v7065_v5  ;;  %v437_v4 = vld [vmem:[#allocation5 + $0x9f8] sm:$0xff]  ;;  %v7118_v5 = vcombine.low %v424_v56, %v428_v59  ;;  %v7127_v7 = vcombine.high %v432_v2, %v436_v3 }
 0x1fc   :  { %v7129_v8 = vcombine.high %v433_v38, %v437_v4  ;;  %v7128_v16 = vcombine.low %v433_v38, %v437_v4  ;;  %v496_v4 = vld [vmem:[#allocation5 + $0xbd0] sm:$0xff] }
 0x1fe   :  { %3660 = vmatpush1.bf16.msra.mxu0 %v7062_v10  ;;  %3824 = vmatpush1.bf16.msra.mxu1 %v7064_v11  ;;  %v444_v10 = vld [vmem:[#allocation5 + $0xa30] sm:$0xff]  ;;  %v441_v11 = vld [vmem:[#allocation5 + $0xa18] sm:$0xff] }
 0x1ff   :  { %3670 = vmatprep.subr.bf16.mxu0 %v7071_v13  ;;  %3834 = vmatprep.subr.bf16.mxu1 %v7073_v14  ;;  %v445_v13 = vld [vmem:[#allocation5 + $0xa38] sm:$0xff]  ;;  %v7126_v14 = vcombine.low %v432_v2, %v436_v3  ;;  %v7135_v17 = vcombine.high %v440_v9, %v444_v10 }
 0x200   :  { %v7137_v18 = vcombine.high %v441_v11, %v445_v13  ;;  %v7136_v23 = vcombine.low %v441_v11, %v445_v13  ;;  %v504_v13 = vld [vmem:[#allocation5 + $0xc10] sm:$0xff] }
 0x201   :  { %3662 = vmatmul.mubr.bf16.vlgmr.msra.gmra.mrb[4].mxu0 %v8747_v25  ;;  %3826 = vmatmul.mubr.bf16.vlgmr.msra.gmra.mrb[4].mxu1 %v8747_v25  ;;  %v7088_v25 = vcombine.low %v393_v27, %v397_v12  ;;  %v456_v12 = vld [vmem:[#allocation5 + $0xa90] sm:$0xff] }
 0x202   :  { %3671 = vmatpush1.bf16.msra.mxu0 %v7070_v20  ;;  %3835 = vmatpush1.bf16.msra.mxu1 %v7072_v21  ;;  %v452_v20 = vld [vmem:[#allocation5 + $0xa70] sm:$0xff]  ;;  %v449_v21 = vld [vmem:[#allocation5 + $0xa58] sm:$0xff] }
 0x203   :  { %3672 = vmatprep.subr.bf16.mxu0 %v7079_v22  ;;  %3836 = vmatprep.subr.bf16.mxu1 %v7081_v57  ;;  %v453_v22 = vld [vmem:[#allocation5 + $0xa78] sm:$0xff]  ;;  %v7134_v57 = vcombine.low %v440_v9, %v444_v10  ;;  %v7143_v26 = vcombine.high %v448_v19, %v452_v20 }
 0x204   :  { %3702 = vmatprep.mubr.bf16.mxu0 %v8751_v34  ;;  %3866 = vmatprep.mubr.bf16.mxu1 %v8751_v34  ;;  %v7105_v34 = vcombine.high %v409_v42, %v413_v43  ;;  %v7145_v27 = vcombine.high %v449_v21, %v453_v22  ;;  %v7144_v32 = vcombine.low %v449_v21, %v453_v22  ;;  %v472_v43 = vld [vmem:[#allocation5 + $0xb10] sm:$0xff] }
 0x205   :  { %v512_v22 = vld [vmem:[#allocation5 + $0xc50] sm:$0xff] }
 0x206   :  { %3673 = vmatpush1.bf16.msra.mxu0 %v7078_v28  ;;  %3837 = vmatpush1.bf16.msra.mxu1 %v7080_v29  ;;  %v460_v28 = vld [vmem:[#allocation5 + $0xab0] sm:$0xff]  ;;  %v457_v29 = vld [vmem:[#allocation5 + $0xa98] sm:$0xff] }
 0x207   :  { %3674 = vmatprep.subr.bf16.mxu0 %v7087_v30  ;;  %3838 = vmatprep.subr.bf16.mxu1 %v7089_v31  ;;  %v461_v30 = vld [vmem:[#allocation5 + $0xab8] sm:$0xff]  ;;  %v7142_v31 = vcombine.low %v448_v19, %v452_v20  ;;  %v7151_v33 = vcombine.high %v456_v12, %v460_v28 }
 0x208   :  { %v7153_v15 = vcombine.high %v457_v29, %v461_v30  ;;  %v7152_v40 = vcombine.low %v457_v29, %v461_v30  ;;  %v520_v30 = vld [vmem:[#allocation5 + $0xc90] sm:$0xff] }
 0x20a   :  { %3675 = vmatpush1.bf16.msra.mxu0 %v7086_v36  ;;  %3839 = vmatpush1.bf16.msra.mxu1 %v7088_v25  ;;  %v468_v36 = vld [vmem:[#allocation5 + $0xaf0] sm:$0xff]  ;;  %v465_v25 = vld [vmem:[#allocation5 + $0xad8] sm:$0xff] }
 0x20b   :  { %3676 = vmatprep.subr.bf16.mxu0 %v7095_v53  ;;  %3840 = vmatprep.subr.bf16.mxu1 %v7097_v37  ;;  %v469_v53 = vld [vmem:[#allocation5 + $0xaf8] sm:$0xff]  ;;  %v7150_v37 = vcombine.low %v456_v12, %v460_v28  ;;  %v7159_v41 = vcombine.high %v464_v35, %v468_v36 }
 0x20c   :  { %v7161_v42 = vcombine.high %v465_v25, %v469_v53  ;;  %v7160_v47 = vcombine.low %v465_v25, %v469_v53  ;;  %v528_v53 = vld [vmem:[#allocation5 + $0xcd0] sm:$0xff] }
 0x20e   :  { %3677 = vmatpush1.bf16.msra.mxu0 %v7094_v44  ;;  %3841 = vmatpush1.bf16.msra.mxu1 %v7096_v45  ;;  %v476_v44 = vld [vmem:[#allocation5 + $0xb30] sm:$0xff]  ;;  %v473_v45 = vld [vmem:[#allocation5 + $0xb18] sm:$0xff] }
 0x20f   :  { %3678 = vmatprep.subr.bf16.mxu0 %v7103_v46  ;;  %3842 = vmatprep.subr.bf16.mxu1 %v7105_v34  ;;  %v477_v46 = vld [vmem:[#allocation5 + $0xb38] sm:$0xff]  ;;  %v7158_v34 = vcombine.low %v464_v35, %v468_v36  ;;  %v7167_v24 = vcombine.high %v472_v43, %v476_v44 }
 0x210   :  { %v7169_v49 = vcombine.high %v473_v45, %v477_v46  ;;  %v7168_v56 = vcombine.low %v473_v45, %v477_v46  ;;  %v536_v45 = vld [vmem:[#allocation5 + $0xd10] sm:$0xff] }
 0x211   :  { %v540_v46 = vld [vmem:[#allocation5 + $0xd30] sm:$0xff] }
 0x212   :  { %3679 = vmatpush1.bf16.msra.mxu0 %v7102_v51  ;;  %3843 = vmatpush1.bf16.msra.mxu1 %v7104_v52  ;;  %v484_v51 = vld [vmem:[#allocation5 + $0xb70] sm:$0xff]  ;;  %v481_v52 = vld [vmem:[#allocation5 + $0xb58] sm:$0xff] }
 0x213   :  { %3680 = vmatprep.subr.bf16.mxu0 %v7111_v54  ;;  %3844 = vmatprep.subr.bf16.mxu1 %v7113_v55  ;;  %v485_v54 = vld [vmem:[#allocation5 + $0xb78] sm:$0xff]  ;;  %v7166_v55 = vcombine.low %v472_v43, %v476_v44  ;;  %v7175_v59 = vcombine.high %v480_v50, %v484_v51 }
 0x214   :  { %v7177_v60 = vcombine.high %v481_v52, %v485_v54  ;;  %v7176_v2 = vcombine.low %v481_v52, %v485_v54  ;;  %v548_v52 = vld [vmem:[#allocation5 + $0xd70] sm:$0xff]  ;;  %v545_v54 = vld [vmem:[#allocation5 + $0xd58] sm:$0xff] }
 0x216   :  { %3681 = vmatpush1.bf16.msra.mxu0 %v7110_v62  ;;  %3845 = vmatpush1.bf16.msra.mxu1 %v7112_v63  ;;  %v492_v62 = vld [vmem:[#allocation5 + $0xbb0] sm:$0xff]  ;;  %v489_v63 = vld [vmem:[#allocation5 + $0xb98] sm:$0xff] }
 0x217   :  { %3682 = vmatprep.subr.bf16.mxu0 %v7119_v0  ;;  %3846 = vmatprep.subr.bf16.mxu1 %v7121_v1  ;;  %v493_v0 = vld [vmem:[#allocation5 + $0xbb8] sm:$0xff]  ;;  %v7174_v1 = vcombine.low %v480_v50, %v484_v51  ;;  %v7183_v3 = vcombine.high %v488_v61, %v492_v62  ;;  %v7231_v50 = vcombine.high %v536_v45, %v540_v46  ;;  %v544_v51 = vld [vmem:[#allocation5 + $0xd50] sm:$0xff] }
 0x218   :  { %v7185_v38 = vcombine.high %v489_v63, %v493_v0  ;;  %v7184_v9 = vcombine.low %v489_v63, %v493_v0  ;;  %v556_v63 = vld [vmem:[#allocation5 + $0xdb0] sm:$0xff]  ;;  %v553_v0 = vld [vmem:[#allocation5 + $0xd98] sm:$0xff] }
 0x21a   :  { %3683 = vmatpush1.bf16.msra.mxu0 %v7118_v5  ;;  %3847 = vmatpush1.bf16.msra.mxu1 %v7120_v6  ;;  %v500_v5 = vld [vmem:[#allocation5 + $0xbf0] sm:$0xff]  ;;  %v497_v6 = vld [vmem:[#allocation5 + $0xbd8] sm:$0xff] }
 0x21b   :  { %3684 = vmatprep.subr.bf16.mxu0 %v7127_v7  ;;  %3848 = vmatprep.subr.bf16.mxu1 %v7129_v8  ;;  %v501_v7 = vld [vmem:[#allocation5 + $0xbf8] sm:$0xff]  ;;  %v7182_v8 = vcombine.low %v488_v61, %v492_v62  ;;  %v7191_v10 = vcombine.high %v496_v4, %v500_v5  ;;  %v552_v62 = vld [vmem:[#allocation5 + $0xd90] sm:$0xff] }
 0x21c   :  { %v7193_v11 = vcombine.high %v497_v6, %v501_v7  ;;  %v7192_v19 = vcombine.low %v497_v6, %v501_v7  ;;  %v560_v6 = vld [vmem:[#allocation5 + $0xdd0] sm:$0xff] }
 0x21d   :  { %v564_v7 = vld [vmem:[#allocation5 + $0xdf0] sm:$0xff] }
 0x21e   :  { %3685 = vmatpush1.bf16.msra.mxu0 %v7126_v14  ;;  %3849 = vmatpush1.bf16.msra.mxu1 %v7128_v16  ;;  %v508_v14 = vld [vmem:[#allocation5 + $0xc30] sm:$0xff]  ;;  %v505_v16 = vld [vmem:[#allocation5 + $0xc18] sm:$0xff] }
 0x21f   :  { %3686 = vmatprep.subr.bf16.mxu0 %v7135_v17  ;;  %3850 = vmatprep.subr.bf16.mxu1 %v7137_v18  ;;  %v509_v17 = vld [vmem:[#allocation5 + $0xc38] sm:$0xff]  ;;  %v7190_v18 = vcombine.low %v496_v4, %v500_v5  ;;  %v7199_v20 = vcombine.high %v504_v13, %v508_v14 }
 0x220   :  { %v7201_v21 = vcombine.high %v505_v16, %v509_v17  ;;  %v7200_v12 = vcombine.low %v505_v16, %v509_v17  ;;  %v7246_v16 = vcombine.low %v552_v62, %v556_v63 }
 0x222   :  { %3687 = vmatpush1.bf16.msra.mxu0 %v7134_v57  ;;  %3851 = vmatpush1.bf16.msra.mxu1 %v7136_v23  ;;  %v516_v57 = vld [vmem:[#allocation5 + $0xc70] sm:$0xff]  ;;  %v513_v23 = vld [vmem:[#allocation5 + $0xc58] sm:$0xff] }
 0x223   :  { %3688 = vmatprep.subr.bf16.mxu0 %v7143_v26  ;;  %3852 = vmatprep.subr.bf16.mxu1 %v7145_v27  ;;  %v517_v26 = vld [vmem:[#allocation5 + $0xc78] sm:$0xff]  ;;  %v7198_v27 = vcombine.low %v504_v13, %v508_v14  ;;  %v7207_v28 = vcombine.high %v512_v22, %v516_v57 }
 0x224   :  { %v7209_v29 = vcombine.high %v513_v23, %v517_v26  ;;  %v7208_v35 = vcombine.low %v513_v23, %v517_v26  ;;  %v572_v23 = vld [vmem:[#allocation5 + $0xe30] sm:$0xff]  ;;  %v569_v26 = vld [vmem:[#allocation5 + $0xe18] sm:$0xff] }
 0x226   :  { %3689 = vmatpush1.bf16.msra.mxu0 %v7142_v31  ;;  %3853 = vmatpush1.bf16.msra.mxu1 %v7144_v32  ;;  %v524_v31 = vld [vmem:[#allocation5 + $0xcb0] sm:$0xff]  ;;  %v521_v32 = vld [vmem:[#allocation5 + $0xc98] sm:$0xff] }
 0x227   :  { %3690 = vmatprep.subr.bf16.mxu0 %v7151_v33  ;;  %3854 = vmatprep.subr.bf16.mxu1 %v7153_v15  ;;  %v525_v33 = vld [vmem:[#allocation5 + $0xcb8] sm:$0xff]  ;;  %v7206_v15 = vcombine.low %v512_v22, %v516_v57  ;;  %v7215_v36 = vcombine.high %v520_v30, %v524_v31  ;;  %v568_v57 = vld [vmem:[#allocation5 + $0xe10] sm:$0xff] }
 0x228   :  { %v7217_v25 = vcombine.high %v521_v32, %v525_v33 }
 0x22a   :  { %3691 = vmatpush1.bf16.msra.mxu0 %v7150_v37  ;;  %3855 = vmatpush1.bf16.msra.mxu1 %v7152_v40  ;;  %v532_v37 = vld [vmem:[#allocation5 + $0xcf0] sm:$0xff]  ;;  %v529_v40 = vld [vmem:[#allocation5 + $0xcd8] sm:$0xff] }
 0x22b   :  { %3692 = vmatprep.subr.bf16.mxu0 %v7159_v41  ;;  %3856 = vmatprep.subr.bf16.mxu1 %v7161_v42  ;;  %v533_v41 = vld [vmem:[#allocation5 + $0xcf8] sm:$0xff]  ;;  %v7214_v42 = vcombine.low %v520_v30, %v524_v31  ;;  %v7223_v43 = vcombine.high %v528_v53, %v532_v37  ;;  %v576_v31 = vld [vmem:[#allocation5 + $0xe50] sm:$0xff] }
 0x22c   :  { %v7225_v44 = vcombine.high %v529_v40, %v533_v41 }
 0x22e   :  { %3693 = vmatpush1.bf16.msra.mxu0 %v7158_v34  ;;  %3857 = vmatpush1.bf16.msra.mxu1 %v7160_v47  ;;  %v537_v34 = vld [vmem:[#allocation5 + $0xd18] sm:$0xff] }
 0x22f   :  { %3694 = vmatprep.subr.bf16.mxu0 %v7167_v24  ;;  %3858 = vmatprep.subr.bf16.mxu1 %v7169_v49  ;;  %v541_v47 = vld [vmem:[#allocation5 + $0xd38] sm:$0xff]  ;;  %v7222_v24 = vcombine.low %v528_v53, %v532_v37  ;;  %v7224_v49 = vcombine.low %v529_v40, %v533_v41  ;;  %v584_v37 = vld [vmem:[#allocation5 + $0xe90] sm:$0xff] }
 0x230   :  { %v588_v40 = vld [vmem:[#allocation5 + $0xeb0] sm:$0xff]  ;;  %v585_v41 = vld [vmem:[#allocation5 + $0xe98] sm:$0xff] }
 0x232   :  { %3695 = vmatpush1.bf16.msra.mxu0 %v7166_v55  ;;  %3859 = vmatpush1.bf16.msra.mxu1 %v7168_v56  ;;  %v549_v55 = vld [vmem:[#allocation5 + $0xd78] sm:$0xff]  ;;  %v7230_v56 = vcombine.low %v536_v45, %v540_v46  ;;  %v592_v46 = vld [vmem:[#allocation5 + $0xed0] sm:$0xff] }
 0x233   :  { %3696 = vmatprep.subr.bf16.mxu0 %v7175_v59  ;;  %3860 = vmatprep.subr.bf16.mxu1 %v7177_v60  ;;  %v7232_v59 = vcombine.low %v537_v34, %v541_v47  ;;  %v7239_v60 = vcombine.high %v544_v51, %v548_v52  ;;  %v7241_v61 = vcombine.high %v545_v54, %v549_v55 }
 0x236   :  { %3697 = vmatpush1.bf16.msra.mxu0 %v7174_v1  ;;  %3861 = vmatpush1.bf16.msra.mxu1 %v7176_v2  ;;  %v557_v1 = vld [vmem:[#allocation5 + $0xdb8] sm:$0xff]  ;;  %v7238_v2 = vcombine.low %v544_v51, %v548_v52  ;;  %v600_v52 = vld [vmem:[#allocation5 + $0xf10] sm:$0xff] }
 0x237   :  { %3698 = vmatprep.subr.bf16.mxu0 %v7183_v3  ;;  %3862 = vmatprep.subr.bf16.mxu1 %v7185_v38  ;;  %v7240_v3 = vcombine.low %v545_v54, %v549_v55  ;;  %v7247_v38 = vcombine.high %v552_v62, %v556_v63  ;;  %v7249_v5 = vcombine.high %v553_v0, %v557_v1  ;;  %v604_v54 = vld [vmem:[#allocation5 + $0xf30] sm:$0xff]  ;;  %v632_v55 = vlaneseq }
 0x238   :  { %v7295_v62 = vcombine.high %v600_v52, %v604_v54 }
 0x23a   :  { %3699 = vmatpush1.bf16.msra.mxu0 %v7182_v8  ;;  %3863 = vmatpush1.bf16.msra.mxu1 %v7184_v9 }
 0x23b   :  { %3700 = vmatprep.subr.bf16.mxu0 %v7191_v10  ;;  %3864 = vmatprep.subr.bf16.mxu1 %v7193_v11  ;;  %v561_v10 = vld [vmem:[#allocation5 + $0xdd8] sm:$0xff] }
 0x23c   :  { %v565_v11 = vld [vmem:[#allocation5 + $0xdf8] sm:$0xff] }
 0x23d   :  { %v7257_v22 = vcombine.high %v561_v10, %v565_v11 }
 0x23e   :  { %3701 = vmatpush1.bf16.msra.mxu0 %v7190_v18  ;;  %3865 = vmatpush1.bf16.msra.mxu1 %v7192_v19  ;;  %v7248_v19 = vcombine.low %v553_v0, %v557_v1  ;;  %v608_v0 = vld [vmem:[#allocation5 + $0xf50] sm:$0xff] }
 0x23f   :  { %3711 = vmatprep.subr.bf16.mxu0 %v7199_v20  ;;  %3875 = vmatprep.subr.bf16.mxu1 %v7201_v21  ;;  %v7255_v20 = vcombine.high %v560_v6, %v564_v7  ;;  %v612_v1 = vld [vmem:[#allocation5 + $0xf70] sm:$0xff] }
 0x241   :  { %3703 = vmatmul.mubr.bf16.vlgmr.msra.gmra.mrb[4].mxu0 %v8761_v39  ;;  %3867 = vmatmul.mubr.bf16.vlgmr.msra.gmra.mrb[4].mxu1 %v8761_v39  ;;  %v7216_v39 = vcombine.low %v521_v32, %v525_v33  ;;  %v580_v32 = vld [vmem:[#allocation5 + $0xe70] sm:$0xff]  ;;  %v577_v33 = vld [vmem:[#allocation5 + $0xe58] sm:$0xff] }
 0x242   :  { %3712 = vmatpush1.bf16.msra.mxu0 %v7198_v27  ;;  %3876 = vmatpush1.bf16.msra.mxu1 %v7200_v12  ;;  %v573_v27 = vld [vmem:[#allocation5 + $0xe38] sm:$0xff]  ;;  %v7254_v12 = vcombine.low %v560_v6, %v564_v7  ;;  %v7303_v7 = vcombine.high %v608_v0, %v612_v1 }
 0x243   :  { %3713 = vmatprep.subr.bf16.mxu0 %v7207_v28  ;;  %3877 = vmatprep.subr.bf16.mxu1 %v7209_v29  ;;  %v7256_v28 = vcombine.low %v561_v10, %v565_v11  ;;  %v7263_v29 = vcombine.high %v568_v57, %v572_v23  ;;  %v7265_v30 = vcombine.high %v569_v26, %v573_v27  ;;  %v616_v11 = vld [vmem:[#allocation5 + $0xf90] sm:$0xff] }
 0x244   :  { %3743 = vmatprep.mubr.bf16.mxu0 %v8765_v48  ;;  %3907 = vmatprep.mubr.bf16.mxu1 %v8765_v48  ;;  %v7233_v48 = vcombine.high %v537_v34, %v541_v47  ;;  %v596_v34 = vld [vmem:[#allocation5 + $0xef0] sm:$0xff]  ;;  %v593_v47 = vld [vmem:[#allocation5 + $0xed8] sm:$0xff] }
 0x246   :  { %3714 = vmatpush1.bf16.msra.mxu0 %v7206_v15  ;;  %3878 = vmatpush1.bf16.msra.mxu1 %v7208_v35  ;;  %v581_v15 = vld [vmem:[#allocation5 + $0xe78] sm:$0xff]  ;;  %v7262_v35 = vcombine.low %v568_v57, %v572_v23  ;;  %v624_v23 = vld [vmem:[#allocation5 + $0xfd0] sm:$0xff] }
 0x247   :  { %3715 = vmatprep.subr.bf16.mxu0 %v7215_v36  ;;  %3879 = vmatprep.subr.bf16.mxu1 %v7217_v25  ;;  %v7264_v36 = vcombine.low %v569_v26, %v573_v27  ;;  %v7271_v25 = vcombine.high %v576_v31, %v580_v32  ;;  %v7273_v53 = vcombine.high %v577_v33, %v581_v15  ;;  %v628_v26 = vld [vmem:[#allocation5 + $0xff0] sm:$0xff] }
 0x24a   :  { %3716 = vmatpush1.bf16.msra.mxu0 %v7214_v42  ;;  %3880 = vmatpush1.bf16.msra.mxu1 %v7216_v39  ;;  %v589_v42 = vld [vmem:[#allocation5 + $0xeb8] sm:$0xff]  ;;  %v7270_v39 = vcombine.low %v576_v31, %v580_v32  ;;  %v7319_v31 = vcombine.high %v624_v23, %v628_v26 }
 0x24b   :  { %3717 = vmatprep.subr.bf16.mxu0 %v7223_v43  ;;  %3881 = vmatprep.subr.bf16.mxu1 %v7225_v44  ;;  %v7272_v43 = vcombine.low %v577_v33, %v581_v15  ;;  %v7279_v44 = vcombine.high %v584_v37, %v588_v40  ;;  %v7281_v45 = vcombine.high %v585_v41, %v589_v42 }
 0x24c   :  { %v7318_v15 = vcombine.low %v624_v23, %v628_v26  ;;  %v7890_v23 = vld [vmem:[#allocation8 + $0x164] ss:$16 sps:$4 sm:$0xff]   ;;  %v7893_v26 = vld [vmem:[#allocation8 + $0x16c] ss:$16 sps:$4 sm:$0xff]  }
 0x24e   :  { %3718 = vmatpush1.bf16.msra.mxu0 %v7222_v24  ;;  %3882 = vmatpush1.bf16.msra.mxu1 %v7224_v49  ;;  %v597_v24 = vld [vmem:[#allocation5 + $0xef8] sm:$0xff]  ;;  %v7278_v49 = vcombine.low %v584_v37, %v588_v40  ;;  %v7825_v40 = vld [vmem:[#allocation8 + $0x8] ss:$16 sps:$4 sm:$0xff]  }
 0x24f   :  { %3719 = vmatprep.subr.bf16.mxu0 %v7231_v50  ;;  %3883 = vmatprep.subr.bf16.mxu1 %v7233_v48  ;;  %v7280_v50 = vcombine.low %v585_v41, %v589_v42  ;;  %v7287_v48 = vcombine.high %v592_v46, %v596_v34  ;;  %v7289_v51 = vcombine.high %v593_v47, %v597_v24  ;;  %v7822_v37 = vld [vmem:[#allocation8] ss:$16 sps:$4 sm:$0xff]   ;;  %v7830_v41 = vld [vmem:[#allocation8 + $0x24] ss:$16 sps:$4 sm:$0xff]  }
 0x252   :  { %3720 = vmatpush1.bf16.msra.mxu0 %v7230_v56  ;;  %3884 = vmatpush1.bf16.msra.mxu1 %v7232_v59  ;;  %v601_v56 = vld [vmem:[#allocation5 + $0xf18] sm:$0xff] }
 0x253   :  { %3721 = vmatprep.subr.bf16.mxu0 %v7239_v60  ;;  %3885 = vmatprep.subr.bf16.mxu1 %v7241_v61  ;;  %v605_v59 = vld [vmem:[#allocation5 + $0xf38] sm:$0xff]  ;;  %v7286_v60 = vcombine.low %v592_v46, %v596_v34  ;;  %v7288_v61 = vcombine.low %v593_v47, %v597_v24  ;;  %v7837_v34 = vld [vmem:[#allocation8 + $0x48] ss:$16 sps:$4 sm:$0xff]   ;;  %v7845_v24 = vld [vmem:[#allocation8 + $0x6c] ss:$16 sps:$4 sm:$0xff]  }
 0x254   :  { %v8791_v4 = vpop.f32.mrb[0].mxu0  ;;  %v8793_v8 = vpop.f32.mrb[0].mxu1  ;;  %v7297_v63 = vcombine.high %v601_v56, %v605_v59  ;;  %v7296_v6 = vcombine.low %v601_v56, %v605_v59  ;;  %v7834_v46 = vld [vmem:[#allocation8 + $0x40] ss:$16 sps:$4 sm:$0xff]   ;;  %v7842_v47 = vld [vmem:[#allocation8 + $0x64] ss:$16 sps:$4 sm:$0xff]  }
 0x255   :  { %v8795_v9 = vpop.f32.mrb[1].mxu0  ;;  %v8797_v13 = vpop.f32.mrb[1].mxu1  ;;  %v7852_v56 = vld [vmem:[#allocation8 + $0xa0] ss:$16 sps:$4 sm:$0xff]   ;;  %v7855_v59 = vld [vmem:[#allocation8 + $0xa8] ss:$16 sps:$4 sm:$0xff]  }
 0x256   :  { %v3421_v14 = vpop.f32.mrb[2].mxu0  ;;  %3722 = vmatpush1.bf16.msra.mxu0 %v7238_v2  ;;  %v3585_v17 = vpop.f32.mrb[2].mxu1  ;;  %3886 = vmatpush1.bf16.msra.mxu1 %v7240_v3  ;;  %v8799_v2 = vshrl.u32 %v632_v55, 7  ;;  %v609_v3 = vld [vmem:[#allocation5 + $0xf58] sm:$0xff]  ;;  %v7857_v55 = vld [vmem:[#allocation8 + $0xac] ss:$16 sps:$4 sm:$0xff]  }
 0x257   :  { %v3422_v18 = vpop.f32.mrb[3].mxu0  ;;  %3723 = vmatprep.subr.bf16.mxu0 %v7247_v38  ;;  %v3586_v21 = vpop.f32.mrb[3].mxu1  ;;  %3887 = vmatprep.subr.bf16.mxu1 %v7249_v5  ;;  %v613_v38 = vld [vmem:[#allocation5 + $0xf78] sm:$0xff]  ;;  %v7294_v5 = vcombine.low %v600_v52, %v604_v54  ;;  %v620_v14 = vld [vmem:[#allocation5 + $0xfb0] sm:$0xff] }
 0x258   :  { %v7305_v10 = vcombine.high %v609_v3, %v613_v38  ;;  %v617_v17 = vld [vmem:[#allocation5 + $0xf98] sm:$0xff]  ;;  %v7304_v21 = vcombine.low %v609_v3, %v613_v38  ;;  %v7849_v52 = vld [vmem:[#allocation8 + $0x88] ss:$16 sps:$4 sm:$0xff]  }
 0x259   :  { %v621_v18 = vld [vmem:[#allocation5 + $0xfb8] sm:$0xff]  ;;  %v7867_v38 = vld [vmem:[#allocation8 + $0xe8] ss:$16 sps:$4 sm:$0xff]  }
 0x25a   :  { %3724 = vmatpush1.bf16.msra.mxu0 %v7246_v16  ;;  %3888 = vmatpush1.bf16.msra.mxu1 %v7248_v19  ;;  %v8802_v16 = vsub.s32 1, %v8799_v2  ;;  %v8804_v19 = vld [vmem:[#allocation7] sm:$0xff]  ;;  %v7313_v57 = vcombine.high %v617_v17, %v621_v18  ;;  %v7854_v54 = vld [vmem:[#allocation8 + $0xa4] ss:$16 sps:$4 sm:$0xff]   ;;  %v7864_v3 = vld [vmem:[#allocation8 + $0xe0] ss:$16 sps:$4 sm:$0xff]  }
 0x25b   :  { %3725 = vmatprep.subr.bf16.mxu0 %v7255_v20  ;;  %3889 = vmatprep.subr.bf16.mxu1 %v7257_v22  ;;  %v7302_v20 = vcombine.low %v608_v0, %v612_v1  ;;  %v7311_v22 = vcombine.high %v616_v11, %v620_v14  ;;  %v7866_v0 = vld [vmem:[#allocation8 + $0xe4] ss:$16 sps:$4 sm:$0xff]   ;;  %v7869_v1 = vld [vmem:[#allocation8 + $0xec] ss:$16 sps:$4 sm:$0xff]  }
 0x25c   :  { %v639_v27 = vrot.slane %v8804_v19, %v8802_v16 }
 0x25e   :  { %3726 = vmatpush1.bf16.msra.mxu0 %v7254_v12  ;;  %3890 = vmatpush1.bf16.msra.mxu1 %v7256_v28  ;;  %v625_v12 = vld [vmem:[#allocation5 + $0xfd8] sm:$0xff]  ;;  %v7707_v33 = vadd.f32 %v8795_v9, %v639_v27  ;;  %v7833_v9 = vld [vmem:[#allocation8 + $0x2c] ss:$16 sps:$4 sm:$0xff]  }
 0x25f   :  { %3727 = vmatprep.subr.bf16.mxu0 %v7263_v29  ;;  %3891 = vmatprep.subr.bf16.mxu1 %v7265_v30  ;;  %v629_v28 = vld [vmem:[#allocation5 + $0xff8] sm:$0xff]  ;;  %v7310_v29 = vcombine.low %v616_v11, %v620_v14  ;;  %v7312_v30 = vcombine.low %v617_v17, %v621_v18  ;;  %v7881_v14 = vld [vmem:[#allocation8 + $0x12c] ss:$16 sps:$4 sm:$0xff]   ;;  %v7879_v18 = vld [vmem:[#allocation8 + $0x128] ss:$16 sps:$4 sm:$0xff]  }
 0x260   :  { %v7321_v32 = vcombine.high %v625_v12, %v629_v28  ;;  %v7878_v11 = vld [vmem:[#allocation8 + $0x124] ss:$16 sps:$4 sm:$0xff]   ;;  %v7876_v17 = vld [vmem:[#allocation8 + $0x120] ss:$16 sps:$4 sm:$0xff]  }
 0x261   :  { %v7888_v27 = vld [vmem:[#allocation8 + $0x160] ss:$16 sps:$4 sm:$0xff]  }
 0x262   :  { %3728 = vmatpush1.bf16.msra.mxu0 %v7262_v35  ;;  %3892 = vmatpush1.bf16.msra.mxu1 %v7264_v36  ;;  %v7320_v35 = vcombine.low %v625_v12, %v629_v28  ;;  %v7824_v36 = vld [vmem:[#allocation8 + $0x4] ss:$16 sps:$4 sm:$0xff]   ;;  %v7891_v12 = vld [vmem:[#allocation8 + $0x168] ss:$16 sps:$4 sm:$0xff]  }
 0x263   :  { %3729 = vmatprep.subr.bf16.mxu0 %v7271_v25  ;;  %3893 = vmatprep.subr.bf16.mxu1 %v7273_v53  ;;  %v7827_v25 = vld [vmem:[#allocation8 + $0xc] ss:$16 sps:$4 sm:$0xff]   ;;  %v3917_v53 = vmax.f32 %v7707_v33, 0.0  ;;  %v7896_v28 = vld [vmem:[#allocation8 + $0x184] ss:$16 sps:$4 sm:$0xff]  }
 0x264   :  { %v7902_v33 = vld [vmem:[#allocation8 + $0x1a4] ss:$16 sps:$4 sm:$0xff]  }
 0x265   :  { %v3925_v42 = vpack.c.bf16 %v3917_v53, %v3917_v53  ;;  %v7903_v53 = vld [vmem:[#allocation8 + $0x1a8] ss:$16 sps:$4 sm:$0xff]  }
 0x266   :  { %3730 = vmatpush1.bf16.msra.mxu0 %v7270_v39  ;;  %3894 = vmatpush1.bf16.msra.mxu1 %v7272_v43  ;;  %v7828_v39 = vld [vmem:[#allocation8 + $0x20] ss:$16 sps:$4 sm:$0xff]   ;;  %v7831_v43 = vld [vmem:[#allocation8 + $0x28] ss:$16 sps:$4 sm:$0xff]  }
 0x267   :  { %3731 = vmatprep.subr.bf16.mxu0 %v7279_v44  ;;  %3895 = vmatprep.subr.bf16.mxu1 %v7281_v45  ;;  %v7836_v44 = vld [vmem:[#allocation8 + $0x44] ss:$16 sps:$4 sm:$0xff]   ;;  %v7839_v45 = vld [vmem:[#allocation8 + $0x4c] ss:$16 sps:$4 sm:$0xff]  }
 0x26a   :  { %3732 = vmatpush1.bf16.msra.mxu0 %v7278_v49  ;;  %3896 = vmatpush1.bf16.msra.mxu1 %v7280_v50  ;;  %v7843_v49 = vld [vmem:[#allocation8 + $0x68] ss:$16 sps:$4 sm:$0xff]   ;;  %v7848_v50 = vld [vmem:[#allocation8 + $0x84] ss:$16 sps:$4 sm:$0xff]  }
 0x26b   :  { %3733 = vmatprep.subr.bf16.mxu0 %v7287_v48  ;;  %3897 = vmatprep.subr.bf16.mxu1 %v7289_v51  ;;  %v7851_v48 = vld [vmem:[#allocation8 + $0x8c] ss:$16 sps:$4 sm:$0xff]   ;;  %v7846_v51 = vld [vmem:[#allocation8 + $0x80] ss:$16 sps:$4 sm:$0xff]  }
 0x26e   :  { %3734 = vmatpush1.bf16.msra.mxu0 %v7286_v60  ;;  %3898 = vmatpush1.bf16.msra.mxu1 %v7288_v61  ;;  %v7860_v60 = vld [vmem:[#allocation8 + $0xc4] ss:$16 sps:$4 sm:$0xff]   ;;  %v7863_v61 = vld [vmem:[#allocation8 + $0xcc] ss:$16 sps:$4 sm:$0xff]  }
 0x26f   :  { %3735 = vmatprep.subr.bf16.mxu0 %v7295_v62  ;;  %3899 = vmatprep.subr.bf16.mxu1 %v7297_v63  ;;  %v7858_v62 = vld [vmem:[#allocation8 + $0xc0] ss:$16 sps:$4 sm:$0xff]   ;;  %v7861_v63 = vld [vmem:[#allocation8 + $0xc8] ss:$16 sps:$4 sm:$0xff]  }
 0x272   :  { %3736 = vmatpush1.bf16.msra.mxu0 %v7294_v5  ;;  %3900 = vmatpush1.bf16.msra.mxu1 %v7296_v6  ;;  %v7872_v5 = vld [vmem:[#allocation8 + $0x104] ss:$16 sps:$4 sm:$0xff]   ;;  %v7875_v6 = vld [vmem:[#allocation8 + $0x10c] ss:$16 sps:$4 sm:$0xff]  }
 0x273   :  { %3737 = vmatprep.subr.bf16.mxu0 %v7303_v7  ;;  %3901 = vmatprep.subr.bf16.mxu1 %v7305_v10  ;;  %v7870_v7 = vld [vmem:[#allocation8 + $0x100] ss:$16 sps:$4 sm:$0xff]   ;;  %v7873_v10 = vld [vmem:[#allocation8 + $0x108] ss:$16 sps:$4 sm:$0xff]  }
 0x276   :  { %3738 = vmatpush1.bf16.msra.mxu0 %v7302_v20  ;;  %3902 = vmatpush1.bf16.msra.mxu1 %v7304_v21  ;;  %v7884_v20 = vld [vmem:[#allocation8 + $0x144] ss:$16 sps:$4 sm:$0xff]   ;;  %v7887_v21 = vld [vmem:[#allocation8 + $0x14c] ss:$16 sps:$4 sm:$0xff]  }
 0x277   :  { %3739 = vmatprep.subr.bf16.mxu0 %v7311_v22  ;;  %3903 = vmatprep.subr.bf16.mxu1 %v7313_v57  ;;  %v7882_v22 = vld [vmem:[#allocation8 + $0x140] ss:$16 sps:$4 sm:$0xff]   ;;  %v7885_v57 = vld [vmem:[#allocation8 + $0x148] ss:$16 sps:$4 sm:$0xff]  }
 0x27a   :  { %3740 = vmatpush1.bf16.msra.mxu0 %v7310_v29  ;;  %3904 = vmatpush1.bf16.msra.mxu1 %v7312_v30  ;;  %v7899_v29 = vld [vmem:[#allocation8 + $0x18c] ss:$16 sps:$4 sm:$0xff]   ;;  %v7894_v30 = vld [vmem:[#allocation8 + $0x180] ss:$16 sps:$4 sm:$0xff]  }
 0x27b   :  { %3741 = vmatprep.subr.bf16.mxu0 %v7319_v31  ;;  %3905 = vmatprep.subr.bf16.mxu1 %v7321_v32  ;;  %v8812_v31 = vsub.s32 0, %v8799_v2  ;;  %v7897_v32 = vld [vmem:[#allocation8 + $0x188] ss:$16 sps:$4 sm:$0xff]  }
 0x27e   :  { %3742 = vmatpush1.bf16.msra.mxu0 %v7318_v15  ;;  %3906 = vmatpush1.bf16.msra.mxu1 %v7320_v35  ;;  %v7905_v15 = vld [vmem:[#allocation8 + $0x1ac] ss:$16 sps:$4 sm:$0xff]   ;;  %v8815_v35 = vsub.s32 3, %v8799_v2 }
 0x27f   :  { %5490 = vmatprep.subr.bf16.mxu0 %v7824_v36  ;;  %5654 = vmatprep.subr.bf16.mxu1 %v7827_v25  ;;  %v7900_v36 = vld [vmem:[#allocation8 + $0x1a0] ss:$16 sps:$4 sm:$0xff]   ;;  %v635_v25 = vrot.slane %v8804_v19, %v8812_v31 }
 0x281   :  { %3744 = vmatmul.mubr.bf16.vlgmr.msra.gmra.mrb[4].mxu0 %v8773_v58  ;;  %3908 = vmatmul.mubr.bf16.vlgmr.msra.gmra.mrb[4].mxu1 %v8773_v58  ;;  %v7840_v58 = vld [vmem:[#allocation8 + $0x60] ss:$16 sps:$4 sm:$0xff]  }
 0x282   :  { %5491 = vmatpush1.bf16.msra.mxu0 %v7822_v37  ;;  %5522 = vmatprep.mubr.bf16.mxu0 %v3925_v42  ;;  %v7908_v37 = vld [vmem:[#allocation8 + $0x1c4] ss:$16 sps:$4 sm:$0xff]  }
 0x283   :  { %5655 = vmatpush1.bf16.msra.mxu1 %v7825_v40  ;;  %5686 = vmatprep.mubr.bf16.mxu1 %v3925_v42  ;;  %v7911_v40 = vld [vmem:[#allocation8 + $0x1cc] ss:$16 sps:$4 sm:$0xff]   ;;  %v7906_v42 = vld [vmem:[#allocation8 + $0x1c0] ss:$16 sps:$4 sm:$0xff]  }
 0x284   :  { %5492 = vmatprep.subr.bf16.mxu0 %v7830_v41  ;;  %5656 = vmatprep.subr.bf16.mxu1 %v7833_v9  ;;  %v647_v41 = vrot.slane %v8804_v19, %v8815_v35  ;;  %v7706_v9 = vadd.f32 %v8791_v4, %v635_v25  ;;  %v7918_v4 = vld [vmem:[#allocation8 + $0x200] ss:$16 sps:$4 sm:$0xff]   ;;  %v7983_v25 = vld [vmem:[#allocation8 + $0x34c] ss:$16 sps:$4 sm:$0xff]  }
 0x286   :  { %5493 = vmatpush1.bf16.msra.mxu0 %v7828_v39  ;;  %v7909_v39 = vld [vmem:[#allocation8 + $0x1c8] ss:$16 sps:$4 sm:$0xff]  }
 0x287   :  { %5657 = vmatpush1.bf16.msra.mxu1 %v7831_v43  ;;  %5494 = vmatprep.subr.bf16.mxu0 %v7836_v44  ;;  %v7914_v43 = vld [vmem:[#allocation8 + $0x1e4] ss:$16 sps:$4 sm:$0xff]   ;;  %v7917_v44 = vld [vmem:[#allocation8 + $0x1ec] ss:$16 sps:$4 sm:$0xff]  }
 0x288   :  { %5658 = vmatprep.subr.bf16.mxu1 %v7839_v45  ;;  %v7709_v45 = vadd.f32 %v8797_v13, %v647_v41  ;;  %v7929_v13 = vld [vmem:[#allocation8 + $0x22c] ss:$16 sps:$4 sm:$0xff]  }
 0x289   :  { %v7989_v41 = vld [vmem:[#allocation8 + $0x36c] ss:$16 sps:$4 sm:$0xff]  }
 0x28a   :  { %5495 = vmatpush1.bf16.msra.mxu0 %v7834_v46  ;;  %v7912_v46 = vld [vmem:[#allocation8 + $0x1e0] ss:$16 sps:$4 sm:$0xff]  }
 0x28b   :  { %5659 = vmatpush1.bf16.msra.mxu1 %v7837_v34  ;;  %5496 = vmatprep.subr.bf16.mxu0 %v7842_v47  ;;  %v3916_v34 = vmax.f32 %v7706_v9, 0.0  ;;  %v7915_v47 = vld [vmem:[#allocation8 + $0x1e8] ss:$16 sps:$4 sm:$0xff]  }
 0x28c   :  { %5660 = vmatprep.subr.bf16.mxu1 %v7845_v24  ;;  %v7920_v24 = vld [vmem:[#allocation8 + $0x204] ss:$16 sps:$4 sm:$0xff]   ;;  %v7987_v9 = vld [vmem:[#allocation8 + $0x368] ss:$16 sps:$4 sm:$0xff]  }
 0x28e   :  { %5497 = vmatpush1.bf16.msra.mxu0 %v7840_v58  ;;  %v7923_v58 = vld [vmem:[#allocation8 + $0x20c] ss:$16 sps:$4 sm:$0xff]  }
 0x28f   :  { %5661 = vmatpush1.bf16.msra.mxu1 %v7843_v49  ;;  %5498 = vmatprep.subr.bf16.mxu0 %v7848_v50  ;;  %v3919_v49 = vmax.f32 %v7709_v45, 0.0  ;;  %v3924_v50 = vpack.c.bf16 %v3916_v34, %v3916_v34  ;;  %v8824_v45 = vsub.s32 2, %v8799_v2  ;;  %v7998_v34 = vld [vmem:[#allocation8 + $0x3a4] ss:$16 sps:$4 sm:$0xff]  }
 0x290   :  { %5662 = vmatprep.subr.bf16.mxu1 %v7851_v48  ;;  %v7921_v48 = vld [vmem:[#allocation8 + $0x208] ss:$16 sps:$4 sm:$0xff]  }
 0x292   :  { %5499 = vmatpush1.bf16.msra.mxu0 %v7846_v51  ;;  %v7926_v51 = vld [vmem:[#allocation8 + $0x224] ss:$16 sps:$4 sm:$0xff]  }
 0x293   :  { %5663 = vmatpush1.bf16.msra.mxu1 %v7849_v52  ;;  %5500 = vmatprep.subr.bf16.mxu0 %v7854_v54  ;;  %v3927_v52 = vpack.c.bf16 %v3919_v49, %v3919_v49  ;;  %v7924_v54 = vld [vmem:[#allocation8 + $0x220] ss:$16 sps:$4 sm:$0xff]   ;;  %v7999_v49 = vld [vmem:[#allocation8 + $0x3a8] ss:$16 sps:$4 sm:$0xff]  }
 0x294   :  { %5664 = vmatprep.subr.bf16.mxu1 %v7857_v55  ;;  %v7927_v55 = vld [vmem:[#allocation8 + $0x228] ss:$16 sps:$4 sm:$0xff]  }
 0x296   :  { %5501 = vmatpush1.bf16.msra.mxu0 %v7852_v56  ;;  %v7932_v56 = vld [vmem:[#allocation8 + $0x244] ss:$16 sps:$4 sm:$0xff]  }
 0x297   :  { %5665 = vmatpush1.bf16.msra.mxu1 %v7855_v59  ;;  %5502 = vmatprep.subr.bf16.mxu0 %v7860_v60  ;;  %v7935_v59 = vld [vmem:[#allocation8 + $0x24c] ss:$16 sps:$4 sm:$0xff]   ;;  %v7930_v60 = vld [vmem:[#allocation8 + $0x240] ss:$16 sps:$4 sm:$0xff]  }
 0x298   :  { %5666 = vmatprep.subr.bf16.mxu1 %v7863_v61  ;;  %v7933_v61 = vld [vmem:[#allocation8 + $0x248] ss:$16 sps:$4 sm:$0xff]  }
 0x29a   :  { %5503 = vmatpush1.bf16.msra.mxu0 %v7858_v62  ;;  %v7938_v62 = vld [vmem:[#allocation8 + $0x264] ss:$16 sps:$4 sm:$0xff]  }
 0x29b   :  { %5667 = vmatpush1.bf16.msra.mxu1 %v7861_v63  ;;  %5504 = vmatprep.subr.bf16.mxu0 %v7866_v0  ;;  %v7941_v63 = vld [vmem:[#allocation8 + $0x26c] ss:$16 sps:$4 sm:$0xff]   ;;  %v7936_v0 = vld [vmem:[#allocation8 + $0x260] ss:$16 sps:$4 sm:$0xff]  }
 0x29c   :  { %5668 = vmatprep.subr.bf16.mxu1 %v7869_v1  ;;  %v7939_v1 = vld [vmem:[#allocation8 + $0x268] ss:$16 sps:$4 sm:$0xff]  }
 0x29e   :  { %5505 = vmatpush1.bf16.msra.mxu0 %v7864_v3  ;;  %v7944_v3 = vld [vmem:[#allocation8 + $0x284] ss:$16 sps:$4 sm:$0xff]  }
 0x29f   :  { %5669 = vmatpush1.bf16.msra.mxu1 %v7867_v38  ;;  %5506 = vmatprep.subr.bf16.mxu0 %v7872_v5  ;;  %v7947_v38 = vld [vmem:[#allocation8 + $0x28c] ss:$16 sps:$4 sm:$0xff]   ;;  %v7942_v5 = vld [vmem:[#allocation8 + $0x280] ss:$16 sps:$4 sm:$0xff]  }
 0x2a0   :  { %5670 = vmatprep.subr.bf16.mxu1 %v7875_v6  ;;  %v7945_v6 = vld [vmem:[#allocation8 + $0x288] ss:$16 sps:$4 sm:$0xff]  }
 0x2a2   :  { %5507 = vmatpush1.bf16.msra.mxu0 %v7870_v7  ;;  %v7950_v7 = vld [vmem:[#allocation8 + $0x2a4] ss:$16 sps:$4 sm:$0xff]  }
 0x2a3   :  { %5671 = vmatpush1.bf16.msra.mxu1 %v7873_v10  ;;  %5508 = vmatprep.subr.bf16.mxu0 %v7878_v11  ;;  %v7953_v10 = vld [vmem:[#allocation8 + $0x2ac] ss:$16 sps:$4 sm:$0xff]   ;;  %v7948_v11 = vld [vmem:[#allocation8 + $0x2a0] ss:$16 sps:$4 sm:$0xff]  }
 0x2a4   :  { %5672 = vmatprep.subr.bf16.mxu1 %v7881_v14  ;;  %v7951_v14 = vld [vmem:[#allocation8 + $0x2a8] ss:$16 sps:$4 sm:$0xff]  }
 0x2a6   :  { %5509 = vmatpush1.bf16.msra.mxu0 %v7876_v17  ;;  %v7956_v17 = vld [vmem:[#allocation8 + $0x2c4] ss:$16 sps:$4 sm:$0xff]  }
 0x2a7   :  { %5673 = vmatpush1.bf16.msra.mxu1 %v7879_v18  ;;  %5510 = vmatprep.subr.bf16.mxu0 %v7884_v20  ;;  %v7959_v18 = vld [vmem:[#allocation8 + $0x2cc] ss:$16 sps:$4 sm:$0xff]   ;;  %v7954_v20 = vld [vmem:[#allocation8 + $0x2c0] ss:$16 sps:$4 sm:$0xff]  }
 0x2a8   :  { %5674 = vmatprep.subr.bf16.mxu1 %v7887_v21  ;;  %v7957_v21 = vld [vmem:[#allocation8 + $0x2c8] ss:$16 sps:$4 sm:$0xff]  }
 0x2aa   :  { %5511 = vmatpush1.bf16.msra.mxu0 %v7882_v22  ;;  %v7962_v22 = vld [vmem:[#allocation8 + $0x2e4] ss:$16 sps:$4 sm:$0xff]  }
 0x2ab   :  { %5675 = vmatpush1.bf16.msra.mxu1 %v7885_v57  ;;  %5512 = vmatprep.subr.bf16.mxu0 %v7890_v23  ;;  %v7965_v57 = vld [vmem:[#allocation8 + $0x2ec] ss:$16 sps:$4 sm:$0xff]   ;;  %v7960_v23 = vld [vmem:[#allocation8 + $0x2e0] ss:$16 sps:$4 sm:$0xff]  }
 0x2ac   :  { %5676 = vmatprep.subr.bf16.mxu1 %v7893_v26  ;;  %v7963_v26 = vld [vmem:[#allocation8 + $0x2e8] ss:$16 sps:$4 sm:$0xff]  }
 0x2ae   :  { %5513 = vmatpush1.bf16.msra.mxu0 %v7888_v27  ;;  %v7968_v27 = vld [vmem:[#allocation8 + $0x304] ss:$16 sps:$4 sm:$0xff]  }
 0x2af   :  { %5677 = vmatpush1.bf16.msra.mxu1 %v7891_v12  ;;  %5514 = vmatprep.subr.bf16.mxu0 %v7896_v28  ;;  %v7971_v12 = vld [vmem:[#allocation8 + $0x30c] ss:$16 sps:$4 sm:$0xff]   ;;  %v7966_v28 = vld [vmem:[#allocation8 + $0x300] ss:$16 sps:$4 sm:$0xff]  }
 0x2b0   :  { %5678 = vmatprep.subr.bf16.mxu1 %v7899_v29  ;;  %v7969_v29 = vld [vmem:[#allocation8 + $0x308] ss:$16 sps:$4 sm:$0xff]  }
 0x2b2   :  { %5515 = vmatpush1.bf16.msra.mxu0 %v7894_v30  ;;  %v7974_v30 = vld [vmem:[#allocation8 + $0x324] ss:$16 sps:$4 sm:$0xff]  }
 0x2b3   :  { %5679 = vmatpush1.bf16.msra.mxu1 %v7897_v32  ;;  %5516 = vmatprep.subr.bf16.mxu0 %v7902_v33  ;;  %v7977_v32 = vld [vmem:[#allocation8 + $0x32c] ss:$16 sps:$4 sm:$0xff]   ;;  %v7972_v33 = vld [vmem:[#allocation8 + $0x320] ss:$16 sps:$4 sm:$0xff]  }
 0x2b4   :  { %5680 = vmatprep.subr.bf16.mxu1 %v7905_v15  ;;  %v7975_v15 = vld [vmem:[#allocation8 + $0x328] ss:$16 sps:$4 sm:$0xff]  }
 0x2b6   :  { %5517 = vmatpush1.bf16.msra.mxu0 %v7900_v36  ;;  %v7980_v36 = vld [vmem:[#allocation8 + $0x344] ss:$16 sps:$4 sm:$0xff]  }
 0x2b7   :  { %5681 = vmatpush1.bf16.msra.mxu1 %v7903_v53  ;;  %5518 = vmatprep.subr.bf16.mxu0 %v7908_v37  ;;  %v7978_v53 = vld [vmem:[#allocation8 + $0x340] ss:$16 sps:$4 sm:$0xff]   ;;  %v7981_v37 = vld [vmem:[#allocation8 + $0x348] ss:$16 sps:$4 sm:$0xff]  }
 0x2b8   :  { %5682 = vmatprep.subr.bf16.mxu1 %v7911_v40  ;;  %v7986_v40 = vld [vmem:[#allocation8 + $0x364] ss:$16 sps:$4 sm:$0xff]  }
 0x2ba   :  { %5519 = vmatpush1.bf16.msra.mxu0 %v7906_v42  ;;  %v7984_v42 = vld [vmem:[#allocation8 + $0x360] ss:$16 sps:$4 sm:$0xff]  }
 0x2bb   :  { %5683 = vmatpush1.bf16.msra.mxu1 %v7909_v39  ;;  %5520 = vmatprep.subr.bf16.mxu0 %v7914_v43  ;;  %v7992_v39 = vld [vmem:[#allocation8 + $0x384] ss:$16 sps:$4 sm:$0xff]   ;;  %v7995_v43 = vld [vmem:[#allocation8 + $0x38c] ss:$16 sps:$4 sm:$0xff]  }
 0x2bc   :  { %5684 = vmatprep.subr.bf16.mxu1 %v7917_v44  ;;  %v7990_v44 = vld [vmem:[#allocation8 + $0x380] ss:$16 sps:$4 sm:$0xff]  }
 0x2be   :  { %5521 = vmatpush1.bf16.msra.mxu0 %v7912_v46  ;;  %v7993_v46 = vld [vmem:[#allocation8 + $0x388] ss:$16 sps:$4 sm:$0xff]  }
 0x2bf   :  { %5685 = vmatpush1.bf16.msra.mxu1 %v7915_v47  ;;  %5531 = vmatprep.subr.bf16.mxu0 %v7920_v24  ;;  %v8001_v47 = vld [vmem:[#allocation8 + $0x3ac] ss:$16 sps:$4 sm:$0xff]   ;;  %v7996_v24 = vld [vmem:[#allocation8 + $0x3a0] ss:$16 sps:$4 sm:$0xff]  }
 0x2c0   :  { %5695 = vmatprep.subr.bf16.mxu1 %v7923_v58  ;;  %v643_v58 = vrot.slane %v8804_v19, %v8824_v45 }
 0x2c1   :  { %5523 = vmatmul.mubr.bf16.vlgmr.msra.gmra.mrb[8].mxu0 %v3924_v50 }
 0x2c2   :  { %5687 = vmatmul.mubr.bf16.vlgmr.msra.gmra.mrb[8].mxu1 %v3924_v50  ;;  %5532 = vmatpush1.bf16.msra.mxu0 %v7918_v4  ;;  %v8004_v4 = vld [vmem:[#allocation8 + $0x3c4] ss:$16 sps:$4 sm:$0xff]   ;;  %v8007_v50 = vld [vmem:[#allocation8 + $0x3cc] ss:$16 sps:$4 sm:$0xff]  }
 0x2c3   :  { %5563 = vmatprep.mubr.bf16.mxu0 %v3927_v52  ;;  %5696 = vmatpush1.bf16.msra.mxu1 %v7921_v48  ;;  %v8002_v48 = vld [vmem:[#allocation8 + $0x3c0] ss:$16 sps:$4 sm:$0xff]  }
 0x2c4   :  { %5727 = vmatprep.mubr.bf16.mxu1 %v3927_v52  ;;  %5533 = vmatprep.subr.bf16.mxu0 %v7926_v51  ;;  %v7708_v51 = vadd.f32 %v8793_v8, %v643_v58  ;;  %v8005_v52 = vld [vmem:[#allocation8 + $0x3c8] ss:$16 sps:$4 sm:$0xff]   ;;  %v8085_v58 = vld [vmem:[#allocation8 + $0x56c] ss:$16 sps:$4 sm:$0xff]  }
 0x2c5   :  { %5697 = vmatprep.subr.bf16.mxu1 %v7929_v13  ;;  %v8010_v13 = vld [vmem:[#allocation8 + $0x3e4] ss:$16 sps:$4 sm:$0xff]   ;;  %v8017_v8 = vld [vmem:[#allocation8 + $0x408] ss:$16 sps:$4 sm:$0xff]  }
 0x2c6   :  { %5534 = vmatpush1.bf16.msra.mxu0 %v7924_v54  ;;  %v8013_v54 = vld [vmem:[#allocation8 + $0x3ec] ss:$16 sps:$4 sm:$0xff]  }
 0x2c7   :  { %5698 = vmatpush1.bf16.msra.mxu1 %v7927_v55  ;;  %5535 = vmatprep.subr.bf16.mxu0 %v7932_v56  ;;  %v8008_v55 = vld [vmem:[#allocation8 + $0x3e0] ss:$16 sps:$4 sm:$0xff]   ;;  %v3918_v56 = vmax.f32 %v7708_v51, 0.0 }
 0x2c8   :  { %5699 = vmatprep.subr.bf16.mxu1 %v7935_v59  ;;  %v8011_v59 = vld [vmem:[#allocation8 + $0x3e8] ss:$16 sps:$4 sm:$0xff]   ;;  %v8086_v51 = vld [vmem:[#allocation8 + $0x580] ss:$16 sps:$4 sm:$0xff]  }
 0x2ca   :  { %5536 = vmatpush1.bf16.msra.mxu0 %v7930_v60  ;;  %v8016_v60 = vld [vmem:[#allocation8 + $0x404] ss:$16 sps:$4 sm:$0xff]  }
 0x2cb   :  { %5700 = vmatpush1.bf16.msra.mxu1 %v7933_v61  ;;  %5537 = vmatprep.subr.bf16.mxu0 %v7938_v62  ;;  %v8019_v61 = vld [vmem:[#allocation8 + $0x40c] ss:$16 sps:$4 sm:$0xff]   ;;  %v8014_v62 = vld [vmem:[#allocation8 + $0x400] ss:$16 sps:$4 sm:$0xff]  }
 0x2cc   :  { %5701 = vmatprep.subr.bf16.mxu1 %v7941_v63  ;;  %v3926_v63 = vpack.c.bf16 %v3918_v56, %v3918_v56  ;;  %v8095_v56 = vld [vmem:[#allocation8 + $0x5a8] ss:$16 sps:$4 sm:$0xff]  }
 0x2ce   :  { %5538 = vmatpush1.bf16.msra.mxu0 %v7936_v0  ;;  %v8022_v0 = vld [vmem:[#allocation8 + $0x424] ss:$16 sps:$4 sm:$0xff]  }
 0x2cf   :  { %5702 = vmatpush1.bf16.msra.mxu1 %v7939_v1  ;;  %5539 = vmatprep.subr.bf16.mxu0 %v7944_v3  ;;  %v8025_v1 = vld [vmem:[#allocation8 + $0x42c] ss:$16 sps:$4 sm:$0xff]   ;;  %v8020_v3 = vld [vmem:[#allocation8 + $0x420] ss:$16 sps:$4 sm:$0xff]  }
 0x2d0   :  { %5703 = vmatprep.subr.bf16.mxu1 %v7947_v38  ;;  %v8023_v38 = vld [vmem:[#allocation8 + $0x428] ss:$16 sps:$4 sm:$0xff]  }
 0x2d2   :  { %5540 = vmatpush1.bf16.msra.mxu0 %v7942_v5  ;;  %v8028_v5 = vld [vmem:[#allocation8 + $0x444] ss:$16 sps:$4 sm:$0xff]  }
 0x2d3   :  { %5704 = vmatpush1.bf16.msra.mxu1 %v7945_v6  ;;  %5541 = vmatprep.subr.bf16.mxu0 %v7950_v7  ;;  %v8031_v6 = vld [vmem:[#allocation8 + $0x44c] ss:$16 sps:$4 sm:$0xff]   ;;  %v8026_v7 = vld [vmem:[#allocation8 + $0x440] ss:$16 sps:$4 sm:$0xff]  }
 0x2d4   :  { %5705 = vmatprep.subr.bf16.mxu1 %v7953_v10  ;;  %v8029_v10 = vld [vmem:[#allocation8 + $0x448] ss:$16 sps:$4 sm:$0xff]  }
 0x2d6   :  { %5542 = vmatpush1.bf16.msra.mxu0 %v7948_v11  ;;  %v8034_v11 = vld [vmem:[#allocation8 + $0x464] ss:$16 sps:$4 sm:$0xff]  }
 0x2d7   :  { %5706 = vmatpush1.bf16.msra.mxu1 %v7951_v14  ;;  %5543 = vmatprep.subr.bf16.mxu0 %v7956_v17  ;;  %v8037_v14 = vld [vmem:[#allocation8 + $0x46c] ss:$16 sps:$4 sm:$0xff]   ;;  %v8032_v17 = vld [vmem:[#allocation8 + $0x460] ss:$16 sps:$4 sm:$0xff]  }
 0x2d8   :  { %5707 = vmatprep.subr.bf16.mxu1 %v7959_v18  ;;  %v8035_v18 = vld [vmem:[#allocation8 + $0x468] ss:$16 sps:$4 sm:$0xff]  }
 0x2da   :  { %5544 = vmatpush1.bf16.msra.mxu0 %v7954_v20  ;;  %v8040_v20 = vld [vmem:[#allocation8 + $0x484] ss:$16 sps:$4 sm:$0xff]  }
 0x2db   :  { %5708 = vmatpush1.bf16.msra.mxu1 %v7957_v21  ;;  %5545 = vmatprep.subr.bf16.mxu0 %v7962_v22  ;;  %v8043_v21 = vld [vmem:[#allocation8 + $0x48c] ss:$16 sps:$4 sm:$0xff]   ;;  %v8038_v22 = vld [vmem:[#allocation8 + $0x480] ss:$16 sps:$4 sm:$0xff]  }
 0x2dc   :  { %5709 = vmatprep.subr.bf16.mxu1 %v7965_v57  ;;  %v8041_v57 = vld [vmem:[#allocation8 + $0x488] ss:$16 sps:$4 sm:$0xff]  }
 0x2de   :  { %5546 = vmatpush1.bf16.msra.mxu0 %v7960_v23  ;;  %v8046_v23 = vld [vmem:[#allocation8 + $0x4a4] ss:$16 sps:$4 sm:$0xff]  }
 0x2df   :  { %5710 = vmatpush1.bf16.msra.mxu1 %v7963_v26  ;;  %5547 = vmatprep.subr.bf16.mxu0 %v7968_v27  ;;  %v8049_v26 = vld [vmem:[#allocation8 + $0x4ac] ss:$16 sps:$4 sm:$0xff]   ;;  %v8044_v27 = vld [vmem:[#allocation8 + $0x4a0] ss:$16 sps:$4 sm:$0xff]  }
 0x2e0   :  { %5711 = vmatprep.subr.bf16.mxu1 %v7971_v12  ;;  %v8047_v12 = vld [vmem:[#allocation8 + $0x4a8] ss:$16 sps:$4 sm:$0xff]  }
 0x2e2   :  { %5548 = vmatpush1.bf16.msra.mxu0 %v7966_v28  ;;  %v8052_v28 = vld [vmem:[#allocation8 + $0x4c4] ss:$16 sps:$4 sm:$0xff]  }
 0x2e3   :  { %5712 = vmatpush1.bf16.msra.mxu1 %v7969_v29  ;;  %5549 = vmatprep.subr.bf16.mxu0 %v7974_v30  ;;  %v8055_v29 = vld [vmem:[#allocation8 + $0x4cc] ss:$16 sps:$4 sm:$0xff]   ;;  %v8050_v30 = vld [vmem:[#allocation8 + $0x4c0] ss:$16 sps:$4 sm:$0xff]  }
 0x2e4   :  { %5713 = vmatprep.subr.bf16.mxu1 %v7977_v32  ;;  %v8053_v32 = vld [vmem:[#allocation8 + $0x4c8] ss:$16 sps:$4 sm:$0xff]  }
 0x2e6   :  { %5550 = vmatpush1.bf16.msra.mxu0 %v7972_v33  ;;  %v8058_v33 = vld [vmem:[#allocation8 + $0x4e4] ss:$16 sps:$4 sm:$0xff]  }
 0x2e7   :  { %5714 = vmatpush1.bf16.msra.mxu1 %v7975_v15  ;;  %5551 = vmatprep.subr.bf16.mxu0 %v7980_v36  ;;  %v8061_v15 = vld [vmem:[#allocation8 + $0x4ec] ss:$16 sps:$4 sm:$0xff]   ;;  %v8056_v36 = vld [vmem:[#allocation8 + $0x4e0] ss:$16 sps:$4 sm:$0xff]  }
 0x2e8   :  { %5715 = vmatprep.subr.bf16.mxu1 %v7983_v25  ;;  %v8059_v25 = vld [vmem:[#allocation8 + $0x4e8] ss:$16 sps:$4 sm:$0xff]  }
 0x2ea   :  { %5552 = vmatpush1.bf16.msra.mxu0 %v7978_v53  ;;  %v8064_v53 = vld [vmem:[#allocation8 + $0x504] ss:$16 sps:$4 sm:$0xff]  }
 0x2eb   :  { %5716 = vmatpush1.bf16.msra.mxu1 %v7981_v37  ;;  %5553 = vmatprep.subr.bf16.mxu0 %v7986_v40  ;;  %v8067_v37 = vld [vmem:[#allocation8 + $0x50c] ss:$16 sps:$4 sm:$0xff]   ;;  %v8062_v40 = vld [vmem:[#allocation8 + $0x500] ss:$16 sps:$4 sm:$0xff]  }
 0x2ec   :  { %5717 = vmatprep.subr.bf16.mxu1 %v7989_v41  ;;  %v8065_v41 = vld [vmem:[#allocation8 + $0x508] ss:$16 sps:$4 sm:$0xff]  }
 0x2ee   :  { %5554 = vmatpush1.bf16.msra.mxu0 %v7984_v42  ;;  %v8070_v42 = vld [vmem:[#allocation8 + $0x524] ss:$16 sps:$4 sm:$0xff]  }
 0x2ef   :  { %5718 = vmatpush1.bf16.msra.mxu1 %v7987_v9  ;;  %5555 = vmatprep.subr.bf16.mxu0 %v7992_v39  ;;  %v8073_v9 = vld [vmem:[#allocation8 + $0x52c] ss:$16 sps:$4 sm:$0xff]   ;;  %v8068_v39 = vld [vmem:[#allocation8 + $0x520] ss:$16 sps:$4 sm:$0xff]  }
 0x2f0   :  { %5719 = vmatprep.subr.bf16.mxu1 %v7995_v43  ;;  %v8071_v43 = vld [vmem:[#allocation8 + $0x528] ss:$16 sps:$4 sm:$0xff]  }
 0x2f2   :  { %5556 = vmatpush1.bf16.msra.mxu0 %v7990_v44  ;;  %v8076_v44 = vld [vmem:[#allocation8 + $0x544] ss:$16 sps:$4 sm:$0xff]  }
 0x2f3   :  { %5720 = vmatpush1.bf16.msra.mxu1 %v7993_v46  ;;  %5557 = vmatprep.subr.bf16.mxu0 %v7998_v34  ;;  %v8079_v46 = vld [vmem:[#allocation8 + $0x54c] ss:$16 sps:$4 sm:$0xff]   ;;  %v8074_v34 = vld [vmem:[#allocation8 + $0x540] ss:$16 sps:$4 sm:$0xff]  }
 0x2f4   :  { %5721 = vmatprep.subr.bf16.mxu1 %v8001_v47  ;;  %v8077_v47 = vld [vmem:[#allocation8 + $0x548] ss:$16 sps:$4 sm:$0xff]  }
 0x2f6   :  { %5558 = vmatpush1.bf16.msra.mxu0 %v7996_v24  ;;  %v8082_v24 = vld [vmem:[#allocation8 + $0x564] ss:$16 sps:$4 sm:$0xff]  }
 0x2f7   :  { %5722 = vmatpush1.bf16.msra.mxu1 %v7999_v49  ;;  %5559 = vmatprep.subr.bf16.mxu0 %v8004_v4  ;;  %v8080_v49 = vld [vmem:[#allocation8 + $0x560] ss:$16 sps:$4 sm:$0xff]   ;;  %v8083_v4 = vld [vmem:[#allocation8 + $0x568] ss:$16 sps:$4 sm:$0xff]  }
 0x2f8   :  { %5723 = vmatprep.subr.bf16.mxu1 %v8007_v50  ;;  %v8088_v50 = vld [vmem:[#allocation8 + $0x584] ss:$16 sps:$4 sm:$0xff]  }
 0x2fa   :  { %5560 = vmatpush1.bf16.msra.mxu0 %v8002_v48  ;;  %v8091_v48 = vld [vmem:[#allocation8 + $0x58c] ss:$16 sps:$4 sm:$0xff]  }
 0x2fb   :  { %5724 = vmatpush1.bf16.msra.mxu1 %v8005_v52  ;;  %5561 = vmatprep.subr.bf16.mxu0 %v8010_v13  ;;  %v8089_v52 = vld [vmem:[#allocation8 + $0x588] ss:$16 sps:$4 sm:$0xff]   ;;  %v8094_v13 = vld [vmem:[#allocation8 + $0x5a4] ss:$16 sps:$4 sm:$0xff]  }
 0x2fc   :  { %5725 = vmatprep.subr.bf16.mxu1 %v8013_v54  ;;  %v8097_v54 = vld [vmem:[#allocation8 + $0x5ac] ss:$16 sps:$4 sm:$0xff]  }
 0x2fe   :  { %5562 = vmatpush1.bf16.msra.mxu0 %v8008_v55  ;;  %v8092_v55 = vld [vmem:[#allocation8 + $0x5a0] ss:$16 sps:$4 sm:$0xff]  }
 0x2ff   :  { %5726 = vmatpush1.bf16.msra.mxu1 %v8011_v59  ;;  %5572 = vmatprep.subr.bf16.mxu0 %v8016_v60  ;;  %v8100_v59 = vld [vmem:[#allocation8 + $0x5c4] ss:$16 sps:$4 sm:$0xff]   ;;  %v8103_v60 = vld [vmem:[#allocation8 + $0x5cc] ss:$16 sps:$4 sm:$0xff]  }
 0x300   :  { %5736 = vmatprep.subr.bf16.mxu1 %v8019_v61  ;;  %v8098_v61 = vld [vmem:[#allocation8 + $0x5c0] ss:$16 sps:$4 sm:$0xff]  }
 0x301   :  { %5564 = vmatmul.mubr.bf16.vlgmr.msra.gmra.mrb[8].mxu0 %v3926_v63 }
 0x302   :  { %5728 = vmatmul.mubr.bf16.vlgmr.msra.gmra.mrb[8].mxu1 %v3926_v63  ;;  %5573 = vmatpush1.bf16.msra.mxu0 %v8014_v62  ;;  %v8101_v62 = vld [vmem:[#allocation8 + $0x5c8] ss:$16 sps:$4 sm:$0xff]   ;;  %v8106_v63 = vld [vmem:[#allocation8 + $0x5e4] ss:$16 sps:$4 sm:$0xff]  }
 0x303   :  { %5737 = vmatpush1.bf16.msra.mxu1 %v8017_v8  ;;  %5574 = vmatprep.subr.bf16.mxu0 %v8022_v0  ;;  %v8109_v8 = vld [vmem:[#allocation8 + $0x5ec] ss:$16 sps:$4 sm:$0xff]   ;;  %v8104_v0 = vld [vmem:[#allocation8 + $0x5e0] ss:$16 sps:$4 sm:$0xff]  }
 0x304   :  { %5738 = vmatprep.subr.bf16.mxu1 %v8025_v1  ;;  %v8107_v1 = vld [vmem:[#allocation8 + $0x5e8] ss:$16 sps:$4 sm:$0xff]  }
 0x306   :  { %5575 = vmatpush1.bf16.msra.mxu0 %v8020_v3  ;;  %v8112_v3 = vld [vmem:[#allocation8 + $0x604] ss:$16 sps:$4 sm:$0xff]  }
 0x307   :  { %5739 = vmatpush1.bf16.msra.mxu1 %v8023_v38  ;;  %5576 = vmatprep.subr.bf16.mxu0 %v8028_v5  ;;  %v8115_v38 = vld [vmem:[#allocation8 + $0x60c] ss:$16 sps:$4 sm:$0xff]   ;;  %v650_v5 = vsub.s32 4, %v8799_v2 }
 0x308   :  { %5740 = vmatprep.subr.bf16.mxu1 %v8031_v6  ;;  %v654_v6 = vsub.s32 5, %v8799_v2 }
 0x30a   :  { %5577 = vmatpush1.bf16.msra.mxu0 %v8026_v7  ;;  %v662_v7 = vsub.s32 7, %v8799_v2 }
 0x30b   :  { %5741 = vmatpush1.bf16.msra.mxu1 %v8029_v10  ;;  %5578 = vmatprep.subr.bf16.mxu0 %v8034_v11  ;;  %v651_v10 = vrot.slane %v8804_v19, %v650_v5  ;;  %v655_v11 = vrot.slane %v8804_v19, %v654_v6  ;;  %v8164_v5 = vld [vmem:[#allocation8 + $0x720] ss:$16 sps:$4 sm:$0xff]   ;;  %v8167_v6 = vld [vmem:[#allocation8 + $0x728] ss:$16 sps:$4 sm:$0xff]  }
 0x30c   :  { %5742 = vmatprep.subr.bf16.mxu1 %v8037_v14  ;;  %v663_v14 = vrot.slane %v8804_v19, %v662_v7  ;;  %v8118_v19 = vld [vmem:[#allocation8 + $0x624] ss:$16 sps:$4 sm:$0xff]  }
 0x30d   :  { %v8172_v7 = vld [vmem:[#allocation8 + $0x744] ss:$16 sps:$4 sm:$0xff]  }
 0x30e   :  { %5579 = vmatpush1.bf16.msra.mxu0 %v8032_v17 }
 0x30f   :  { %5743 = vmatpush1.bf16.msra.mxu1 %v8035_v18  ;;  %5580 = vmatprep.subr.bf16.mxu0 %v8040_v20 }
 0x310   :  { %5744 = vmatprep.subr.bf16.mxu1 %v8043_v21 }
 0x312   :  { %5581 = vmatpush1.bf16.msra.mxu0 %v8038_v22 }
 0x313   :  { %5745 = vmatpush1.bf16.msra.mxu1 %v8041_v57  ;;  %5582 = vmatprep.subr.bf16.mxu0 %v8046_v23 }
 0x314   :  { %5746 = vmatprep.subr.bf16.mxu1 %v8049_v26 }
 0x316   :  { %5583 = vmatpush1.bf16.msra.mxu0 %v8044_v27 }
 0x317   :  { %5747 = vmatpush1.bf16.msra.mxu1 %v8047_v12  ;;  %5584 = vmatprep.subr.bf16.mxu0 %v8052_v28 }
 0x318   :  { %5748 = vmatprep.subr.bf16.mxu1 %v8055_v29 }
 0x31a   :  { %5585 = vmatpush1.bf16.msra.mxu0 %v8050_v30 }
 0x31b   :  { %5749 = vmatpush1.bf16.msra.mxu1 %v8053_v32  ;;  %5586 = vmatprep.subr.bf16.mxu0 %v8058_v33 }
 0x31c   :  { %5750 = vmatprep.subr.bf16.mxu1 %v8061_v15  ;;  %v8110_v15 = vld [vmem:[#allocation8 + $0x600] ss:$16 sps:$4 sm:$0xff]  }
 0x31e   :  { %5587 = vmatpush1.bf16.msra.mxu0 %v8056_v36  ;;  %v8113_v36 = vld [vmem:[#allocation8 + $0x608] ss:$16 sps:$4 sm:$0xff]  }
 0x31f   :  { %5751 = vmatpush1.bf16.msra.mxu1 %v8059_v25  ;;  %5588 = vmatprep.subr.bf16.mxu0 %v8064_v53  ;;  %v8121_v53 = vld [vmem:[#allocation8 + $0x62c] ss:$16 sps:$4 sm:$0xff]  }
 0x320   :  { %5752 = vmatprep.subr.bf16.mxu1 %v8067_v37 }
 0x322   :  { %5589 = vmatpush1.bf16.msra.mxu0 %v8062_v40  ;;  %v8116_v40 = vld [vmem:[#allocation8 + $0x620] ss:$16 sps:$4 sm:$0xff]  }
 0x323   :  { %5753 = vmatpush1.bf16.msra.mxu1 %v8065_v41  ;;  %5590 = vmatprep.subr.bf16.mxu0 %v8070_v42  ;;  %v8119_v41 = vld [vmem:[#allocation8 + $0x628] ss:$16 sps:$4 sm:$0xff]   ;;  %v8124_v42 = vld [vmem:[#allocation8 + $0x644] ss:$16 sps:$4 sm:$0xff]  }
 0x324   :  { %5754 = vmatprep.subr.bf16.mxu1 %v8073_v9  ;;  %v8127_v9 = vld [vmem:[#allocation8 + $0x64c] ss:$16 sps:$4 sm:$0xff]  }
 0x326   :  { %5591 = vmatpush1.bf16.msra.mxu0 %v8068_v39  ;;  %v8122_v39 = vld [vmem:[#allocation8 + $0x640] ss:$16 sps:$4 sm:$0xff]  }
 0x327   :  { %5755 = vmatpush1.bf16.msra.mxu1 %v8071_v43  ;;  %5592 = vmatprep.subr.bf16.mxu0 %v8076_v44  ;;  %v8125_v43 = vld [vmem:[#allocation8 + $0x648] ss:$16 sps:$4 sm:$0xff]   ;;  %v8130_v44 = vld [vmem:[#allocation8 + $0x664] ss:$16 sps:$4 sm:$0xff]  }
 0x328   :  { %5756 = vmatprep.subr.bf16.mxu1 %v8079_v46  ;;  %v8133_v46 = vld [vmem:[#allocation8 + $0x66c] ss:$16 sps:$4 sm:$0xff]  }
 0x32a   :  { %5593 = vmatpush1.bf16.msra.mxu0 %v8074_v34  ;;  %v8128_v34 = vld [vmem:[#allocation8 + $0x660] ss:$16 sps:$4 sm:$0xff]  }
 0x32b   :  { %5757 = vmatpush1.bf16.msra.mxu1 %v8077_v47  ;;  %5594 = vmatprep.subr.bf16.mxu0 %v8082_v24  ;;  %v8131_v47 = vld [vmem:[#allocation8 + $0x668] ss:$16 sps:$4 sm:$0xff]   ;;  %v8136_v24 = vld [vmem:[#allocation8 + $0x684] ss:$16 sps:$4 sm:$0xff]  }
 0x32c   :  { %5758 = vmatprep.subr.bf16.mxu1 %v8085_v58  ;;  %v8139_v58 = vld [vmem:[#allocation8 + $0x68c] ss:$16 sps:$4 sm:$0xff]  }
 0x32e   :  { %5595 = vmatpush1.bf16.msra.mxu0 %v8080_v49  ;;  %v8134_v49 = vld [vmem:[#allocation8 + $0x680] ss:$16 sps:$4 sm:$0xff]  }
 0x32f   :  { %5759 = vmatpush1.bf16.msra.mxu1 %v8083_v4  ;;  %5596 = vmatprep.subr.bf16.mxu0 %v8088_v50  ;;  %v8137_v4 = vld [vmem:[#allocation8 + $0x688] ss:$16 sps:$4 sm:$0xff]   ;;  %v8142_v50 = vld [vmem:[#allocation8 + $0x6a4] ss:$16 sps:$4 sm:$0xff]  }
 0x330   :  { %5760 = vmatprep.subr.bf16.mxu1 %v8091_v48  ;;  %v8145_v48 = vld [vmem:[#allocation8 + $0x6ac] ss:$16 sps:$4 sm:$0xff]  }
 0x332   :  { %5597 = vmatpush1.bf16.msra.mxu0 %v8086_v51  ;;  %v8140_v51 = vld [vmem:[#allocation8 + $0x6a0] ss:$16 sps:$4 sm:$0xff]  }
 0x333   :  { %5761 = vmatpush1.bf16.msra.mxu1 %v8089_v52  ;;  %5598 = vmatprep.subr.bf16.mxu0 %v8094_v13  ;;  %v8143_v52 = vld [vmem:[#allocation8 + $0x6a8] ss:$16 sps:$4 sm:$0xff]   ;;  %v8148_v13 = vld [vmem:[#allocation8 + $0x6c4] ss:$16 sps:$4 sm:$0xff]  }
 0x334   :  { %5762 = vmatprep.subr.bf16.mxu1 %v8097_v54  ;;  %v8151_v54 = vld [vmem:[#allocation8 + $0x6cc] ss:$16 sps:$4 sm:$0xff]  }
 0x336   :  { %5599 = vmatpush1.bf16.msra.mxu0 %v8092_v55  ;;  %v8146_v55 = vld [vmem:[#allocation8 + $0x6c0] ss:$16 sps:$4 sm:$0xff]  }
 0x337   :  { %5763 = vmatpush1.bf16.msra.mxu1 %v8095_v56  ;;  %5600 = vmatprep.subr.bf16.mxu0 %v8100_v59  ;;  %v8149_v56 = vld [vmem:[#allocation8 + $0x6c8] ss:$16 sps:$4 sm:$0xff]   ;;  %v8154_v59 = vld [vmem:[#allocation8 + $0x6e4] ss:$16 sps:$4 sm:$0xff]  }
 0x338   :  { %5764 = vmatprep.subr.bf16.mxu1 %v8103_v60  ;;  %v8157_v60 = vld [vmem:[#allocation8 + $0x6ec] ss:$16 sps:$4 sm:$0xff]  }
 0x33a   :  { %5601 = vmatpush1.bf16.msra.mxu0 %v8098_v61  ;;  %v8152_v61 = vld [vmem:[#allocation8 + $0x6e0] ss:$16 sps:$4 sm:$0xff]  }
 0x33b   :  { %5765 = vmatpush1.bf16.msra.mxu1 %v8101_v62  ;;  %5602 = vmatprep.subr.bf16.mxu0 %v8106_v63  ;;  %v8155_v62 = vld [vmem:[#allocation8 + $0x6e8] ss:$16 sps:$4 sm:$0xff]   ;;  %v8160_v63 = vld [vmem:[#allocation8 + $0x704] ss:$16 sps:$4 sm:$0xff]  }
 0x33c   :  { %5766 = vmatprep.subr.bf16.mxu1 %v8109_v8  ;;  %v8163_v8 = vld [vmem:[#allocation8 + $0x70c] ss:$16 sps:$4 sm:$0xff]  }
 0x33e   :  { %5603 = vmatpush1.bf16.msra.mxu0 %v8104_v0  ;;  %v8158_v0 = vld [vmem:[#allocation8 + $0x700] ss:$16 sps:$4 sm:$0xff]  }
 0x33f   :  { %5767 = vmatpush1.bf16.msra.mxu1 %v8107_v1  ;;  %5613 = vmatprep.subr.bf16.mxu0 %v8112_v3  ;;  %v8161_v1 = vld [vmem:[#allocation8 + $0x708] ss:$16 sps:$4 sm:$0xff]   ;;  %v8166_v3 = vld [vmem:[#allocation8 + $0x724] ss:$16 sps:$4 sm:$0xff]  }
 0x340   :  { %5777 = vmatprep.subr.bf16.mxu1 %v8115_v38  ;;  %v8169_v38 = vld [vmem:[#allocation8 + $0x72c] ss:$16 sps:$4 sm:$0xff]  }
 0x354   :  { %v3745_v17 = vpop.f32.mrb[4].mxu0  ;;  %v8835_v20 = vpop.f32.mrb[4].mxu1 }
 0x355   :  { %v7710_v18 = vadd.f32 %v3745_v17, %v651_v10  ;;  %v3747_v21 = vpop.f32.mrb[5].mxu0  ;;  %v3911_v57 = vpop.f32.mrb[5].mxu1  ;;  %v8175_v10 = vld [vmem:[#allocation8 + $0x74c] ss:$16 sps:$4 sm:$0xff]   ;;  %v8178_v17 = vld [vmem:[#allocation8 + $0x764] ss:$16 sps:$4 sm:$0xff]  }
 0x356   :  { %v7711_v22 = vadd.f32 %v3747_v21, %v655_v11  ;;  %v3749_v23 = vpop.f32.mrb[6].mxu0  ;;  %v7713_v27 = vadd.f32 %v3911_v57, %v663_v14  ;;  %v3913_v12 = vpop.f32.mrb[6].mxu1  ;;  %v8170_v11 = vld [vmem:[#allocation8 + $0x740] ss:$16 sps:$4 sm:$0xff]   ;;  %v8173_v14 = vld [vmem:[#allocation8 + $0x748] ss:$16 sps:$4 sm:$0xff]  }
 0x357   :  { %v3920_v26 = vmax.f32 %v7710_v18, 0.0  ;;  %v3750_v28 = vpop.f32.mrb[7].mxu0  ;;  %v3914_v30 = vpop.f32.mrb[7].mxu1  ;;  %v8181_v18 = vld [vmem:[#allocation8 + $0x76c] ss:$16 sps:$4 sm:$0xff]   ;;  %v658_v12 = vsub.s32 6, %v8799_v2 }
 0x358   :  { %v3921_v29 = vmax.f32 %v7711_v22, 0.0  ;;  %v3923_v32 = vmax.f32 %v7713_v27, 0.0  ;;  %v8176_v21 = vld [vmem:[#allocation8 + $0x760] ss:$16 sps:$4 sm:$0xff]   ;;  %v8179_v22 = vld [vmem:[#allocation8 + $0x768] ss:$16 sps:$4 sm:$0xff]  }
 0x359   :  { %v3928_v25 = vpack.c.bf16 %v3920_v26, %v3920_v26  ;;  %v8184_v57 = vld [vmem:[#allocation8 + $0x784] ss:$16 sps:$4 sm:$0xff]   ;;  %v8187_v23 = vld [vmem:[#allocation8 + $0x78c] ss:$16 sps:$4 sm:$0xff]   ;;  %v8182_v26 = vld [vmem:[#allocation8 + $0x780] ss:$16 sps:$4 sm:$0xff]  }
 0x35a   :  { %v3929_v33 = vpack.c.bf16 %v3921_v29, %v3921_v29  ;;  %v3931_v37 = vpack.c.bf16 %v3923_v32, %v3923_v32  ;;  %v8185_v27 = vld [vmem:[#allocation8 + $0x788] ss:$16 sps:$4 sm:$0xff]   ;;  %v8190_v28 = vld [vmem:[#allocation8 + $0x7a4] ss:$16 sps:$4 sm:$0xff]   ;;  %v8193_v29 = vld [vmem:[#allocation8 + $0x7ac] ss:$16 sps:$4 sm:$0xff]  }
 0x35b   :  { %v8188_v30 = vld [vmem:[#allocation8 + $0x7a0] ss:$16 sps:$4 sm:$0xff]   ;;  %v8191_v32 = vld [vmem:[#allocation8 + $0x7a8] ss:$16 sps:$4 sm:$0xff]  }
 0x35c   :  { %5604 = vmatprep.mubr.bf16.mxu0 %v3929_v33  ;;  %5768 = vmatprep.mubr.bf16.mxu1 %v3929_v33  ;;  %v8398_v33 = vld [vmem:[#allocation7] sm:$0xff] }
 0x35d   :  { %5605 = vmatmul.mubr.bf16.vlgmr.msra.gmra.mrb[8].mxu0 %v3928_v25  ;;  %5769 = vmatmul.mubr.bf16.vlgmr.msra.gmra.mrb[8].mxu1 %v3928_v25  ;;  %v8199_v25 = vld [vmem:[#allocation8 + $0x7cc] ss:$16 sps:$4 sm:$0xff]  }
 0x35e   :  { %5614 = vmatpush1.bf16.msra.mxu0 %v8110_v15  ;;  %5778 = vmatpush1.bf16.msra.mxu1 %v8113_v36  ;;  %v659_v15 = vrot.slane %v8398_v33, %v658_v12  ;;  %v8196_v36 = vld [vmem:[#allocation8 + $0x7c4] ss:$16 sps:$4 sm:$0xff]   ;;  %v8275_v33 = vld [vmem:[#allocation11 + $0x168] ss:$16 sps:$4 sm:$0xff]  }
 0x35f   :  { %5645 = vmatprep.mubr.bf16.mxu0 %v3931_v37  ;;  %5809 = vmatprep.mubr.bf16.mxu1 %v3931_v37  ;;  %v8202_v37 = vld [vmem:[#allocation8 + $0x7e4] ss:$16 sps:$4 sm:$0xff]  }
 0x360   :  { %5615 = vmatprep.subr.bf16.mxu0 %v8118_v19  ;;  %5779 = vmatprep.subr.bf16.mxu1 %v8121_v53  ;;  %v8194_v19 = vld [vmem:[#allocation8 + $0x7c0] ss:$16 sps:$4 sm:$0xff]   ;;  %v8197_v53 = vld [vmem:[#allocation8 + $0x7c8] ss:$16 sps:$4 sm:$0xff]   ;;  %v7712_v2 = vadd.f32 %v8835_v20, %v659_v15  ;;  %v8266_v12 = vld [vmem:[#allocation11 + $0x140] ss:$16 sps:$4 sm:$0xff]  }
 0x361   :  { %v8214_v20 = vld [vmem:[#allocation11 + $0x24] ss:$16 sps:$4 sm:$0xff]  }
 0x362   :  { %5616 = vmatpush1.bf16.msra.mxu0 %v8116_v40  ;;  %5780 = vmatpush1.bf16.msra.mxu1 %v8119_v41  ;;  %v8205_v40 = vld [vmem:[#allocation8 + $0x7ec] ss:$16 sps:$4 sm:$0xff]   ;;  %v8200_v41 = vld [vmem:[#allocation8 + $0x7e0] ss:$16 sps:$4 sm:$0xff]   ;;  %v8280_v15 = vld [vmem:[#allocation11 + $0x184] ss:$16 sps:$4 sm:$0xff]  }
 0x363   :  { %5617 = vmatprep.subr.bf16.mxu0 %v8124_v42  ;;  %5781 = vmatprep.subr.bf16.mxu1 %v8127_v9  ;;  %v8203_v42 = vld [vmem:[#allocation8 + $0x7e8] ss:$16 sps:$4 sm:$0xff]   ;;  %v3922_v9 = vmax.f32 %v7712_v2, 0.0  ;;  %v8289_v2 = vld [vmem:[#allocation11 + $0x1ac] ss:$16 sps:$4 sm:$0xff]  }
 0x366   :  { %5618 = vmatpush1.bf16.msra.mxu0 %v8122_v39  ;;  %5782 = vmatpush1.bf16.msra.mxu1 %v8125_v43  ;;  %v8208_v39 = vld [vmem:[#allocation11 + $0x4] ss:$16 sps:$4 sm:$0xff]   ;;  %v8211_v43 = vld [vmem:[#allocation11 + $0xc] ss:$16 sps:$4 sm:$0xff]  }
 0x367   :  { %5619 = vmatprep.subr.bf16.mxu0 %v8130_v44  ;;  %5783 = vmatprep.subr.bf16.mxu1 %v8133_v46  ;;  %v8206_v44 = vld [vmem:[#allocation11] ss:$16 sps:$4 sm:$0xff]   ;;  %v8209_v46 = vld [vmem:[#allocation11 + $0x8] ss:$16 sps:$4 sm:$0xff]  }
 0x36a   :  { %5620 = vmatpush1.bf16.msra.mxu0 %v8128_v34  ;;  %5784 = vmatpush1.bf16.msra.mxu1 %v8131_v47  ;;  %v3930_v34 = vpack.c.bf16 %v3922_v9, %v3922_v9  ;;  %v8217_v47 = vld [vmem:[#allocation11 + $0x2c] ss:$16 sps:$4 sm:$0xff]   ;;  %v8290_v9 = vld [vmem:[#allocation11 + $0x1c0] ss:$16 sps:$4 sm:$0xff]  }
 0x36b   :  { %5621 = vmatprep.subr.bf16.mxu0 %v8136_v24  ;;  %5785 = vmatprep.subr.bf16.mxu1 %v8139_v58  ;;  %v8212_v24 = vld [vmem:[#allocation11 + $0x20] ss:$16 sps:$4 sm:$0xff]   ;;  %v8215_v58 = vld [vmem:[#allocation11 + $0x28] ss:$16 sps:$4 sm:$0xff]  }
 0x36e   :  { %5622 = vmatpush1.bf16.msra.mxu0 %v8134_v49  ;;  %5786 = vmatpush1.bf16.msra.mxu1 %v8137_v4  ;;  %v8220_v49 = vld [vmem:[#allocation11 + $0x44] ss:$16 sps:$4 sm:$0xff]   ;;  %v8223_v4 = vld [vmem:[#allocation11 + $0x4c] ss:$16 sps:$4 sm:$0xff]  }
 0x36f   :  { %5623 = vmatprep.subr.bf16.mxu0 %v8142_v50  ;;  %5787 = vmatprep.subr.bf16.mxu1 %v8145_v48  ;;  %v8218_v50 = vld [vmem:[#allocation11 + $0x40] ss:$16 sps:$4 sm:$0xff]   ;;  %v8221_v48 = vld [vmem:[#allocation11 + $0x48] ss:$16 sps:$4 sm:$0xff]  }
 0x372   :  { %5624 = vmatpush1.bf16.msra.mxu0 %v8140_v51  ;;  %5788 = vmatpush1.bf16.msra.mxu1 %v8143_v52  ;;  %v8226_v51 = vld [vmem:[#allocation11 + $0x64] ss:$16 sps:$4 sm:$0xff]   ;;  %v8229_v52 = vld [vmem:[#allocation11 + $0x6c] ss:$16 sps:$4 sm:$0xff]  }
 0x373   :  { %5625 = vmatprep.subr.bf16.mxu0 %v8148_v13  ;;  %5789 = vmatprep.subr.bf16.mxu1 %v8151_v54  ;;  %v8224_v13 = vld [vmem:[#allocation11 + $0x60] ss:$16 sps:$4 sm:$0xff]   ;;  %v8227_v54 = vld [vmem:[#allocation11 + $0x68] ss:$16 sps:$4 sm:$0xff]  }
 0x376   :  { %5626 = vmatpush1.bf16.msra.mxu0 %v8146_v55  ;;  %5790 = vmatpush1.bf16.msra.mxu1 %v8149_v56  ;;  %v8232_v55 = vld [vmem:[#allocation11 + $0x84] ss:$16 sps:$4 sm:$0xff]   ;;  %v8235_v56 = vld [vmem:[#allocation11 + $0x8c] ss:$16 sps:$4 sm:$0xff]  }
 0x377   :  { %5627 = vmatprep.subr.bf16.mxu0 %v8154_v59  ;;  %5791 = vmatprep.subr.bf16.mxu1 %v8157_v60  ;;  %v8230_v59 = vld [vmem:[#allocation11 + $0x80] ss:$16 sps:$4 sm:$0xff]   ;;  %v8233_v60 = vld [vmem:[#allocation11 + $0x88] ss:$16 sps:$4 sm:$0xff]  }
 0x37a   :  { %5628 = vmatpush1.bf16.msra.mxu0 %v8152_v61  ;;  %5792 = vmatpush1.bf16.msra.mxu1 %v8155_v62  ;;  %v8238_v61 = vld [vmem:[#allocation11 + $0xa4] ss:$16 sps:$4 sm:$0xff]   ;;  %v8241_v62 = vld [vmem:[#allocation11 + $0xac] ss:$16 sps:$4 sm:$0xff]  }
 0x37b   :  { %5629 = vmatprep.subr.bf16.mxu0 %v8160_v63  ;;  %5793 = vmatprep.subr.bf16.mxu1 %v8163_v8  ;;  %v8236_v63 = vld [vmem:[#allocation11 + $0xa0] ss:$16 sps:$4 sm:$0xff]   ;;  %v8239_v8 = vld [vmem:[#allocation11 + $0xa8] ss:$16 sps:$4 sm:$0xff]  }
 0x37e   :  { %5630 = vmatpush1.bf16.msra.mxu0 %v8158_v0  ;;  %5794 = vmatpush1.bf16.msra.mxu1 %v8161_v1  ;;  %v8244_v0 = vld [vmem:[#allocation11 + $0xc4] ss:$16 sps:$4 sm:$0xff]   ;;  %v8247_v1 = vld [vmem:[#allocation11 + $0xcc] ss:$16 sps:$4 sm:$0xff]  }
 0x37f   :  { %5631 = vmatprep.subr.bf16.mxu0 %v8166_v3  ;;  %5795 = vmatprep.subr.bf16.mxu1 %v8169_v38  ;;  %v8242_v3 = vld [vmem:[#allocation11 + $0xc0] ss:$16 sps:$4 sm:$0xff]   ;;  %v8245_v38 = vld [vmem:[#allocation11 + $0xc8] ss:$16 sps:$4 sm:$0xff]  }
 0x382   :  { %5632 = vmatpush1.bf16.msra.mxu0 %v8164_v5  ;;  %5796 = vmatpush1.bf16.msra.mxu1 %v8167_v6  ;;  %v8250_v5 = vld [vmem:[#allocation11 + $0xe4] ss:$16 sps:$4 sm:$0xff]   ;;  %v8253_v6 = vld [vmem:[#allocation11 + $0xec] ss:$16 sps:$4 sm:$0xff]  }
 0x383   :  { %5633 = vmatprep.subr.bf16.mxu0 %v8172_v7  ;;  %5797 = vmatprep.subr.bf16.mxu1 %v8175_v10  ;;  %v8248_v7 = vld [vmem:[#allocation11 + $0xe0] ss:$16 sps:$4 sm:$0xff]   ;;  %v8251_v10 = vld [vmem:[#allocation11 + $0xe8] ss:$16 sps:$4 sm:$0xff]  }
 0x386   :  { %5634 = vmatpush1.bf16.msra.mxu0 %v8170_v11  ;;  %5798 = vmatpush1.bf16.msra.mxu1 %v8173_v14  ;;  %v8256_v11 = vld [vmem:[#allocation11 + $0x104] ss:$16 sps:$4 sm:$0xff]   ;;  %v8259_v14 = vld [vmem:[#allocation11 + $0x10c] ss:$16 sps:$4 sm:$0xff]  }
 0x387   :  { %5635 = vmatprep.subr.bf16.mxu0 %v8178_v17  ;;  %5799 = vmatprep.subr.bf16.mxu1 %v8181_v18  ;;  %v8254_v17 = vld [vmem:[#allocation11 + $0x100] ss:$16 sps:$4 sm:$0xff]   ;;  %v8257_v18 = vld [vmem:[#allocation11 + $0x108] ss:$16 sps:$4 sm:$0xff]  }
 0x38a   :  { %5636 = vmatpush1.bf16.msra.mxu0 %v8176_v21  ;;  %5800 = vmatpush1.bf16.msra.mxu1 %v8179_v22  ;;  %v8262_v21 = vld [vmem:[#allocation11 + $0x124] ss:$16 sps:$4 sm:$0xff]   ;;  %v8265_v22 = vld [vmem:[#allocation11 + $0x12c] ss:$16 sps:$4 sm:$0xff]  }
 0x38b   :  { %5637 = vmatprep.subr.bf16.mxu0 %v8184_v57  ;;  %5801 = vmatprep.subr.bf16.mxu1 %v8187_v23  ;;  %v8260_v57 = vld [vmem:[#allocation11 + $0x120] ss:$16 sps:$4 sm:$0xff]   ;;  %v8263_v23 = vld [vmem:[#allocation11 + $0x128] ss:$16 sps:$4 sm:$0xff]  }
 0x38e   :  { %5638 = vmatpush1.bf16.msra.mxu0 %v8182_v26  ;;  %5802 = vmatpush1.bf16.msra.mxu1 %v8185_v27  ;;  %v8268_v26 = vld [vmem:[#allocation11 + $0x144] ss:$16 sps:$4 sm:$0xff]   ;;  %v8271_v27 = vld [vmem:[#allocation11 + $0x14c] ss:$16 sps:$4 sm:$0xff]  }
 0x38f   :  { %5639 = vmatprep.subr.bf16.mxu0 %v8190_v28  ;;  %5803 = vmatprep.subr.bf16.mxu1 %v8193_v29  ;;  %v8269_v28 = vld [vmem:[#allocation11 + $0x148] ss:$16 sps:$4 sm:$0xff]   ;;  %v8274_v29 = vld [vmem:[#allocation11 + $0x164] ss:$16 sps:$4 sm:$0xff]  }
 0x392   :  { %5640 = vmatpush1.bf16.msra.mxu0 %v8188_v30  ;;  %5804 = vmatpush1.bf16.msra.mxu1 %v8191_v32  ;;  %v8277_v30 = vld [vmem:[#allocation11 + $0x16c] ss:$16 sps:$4 sm:$0xff]   ;;  %v8272_v32 = vld [vmem:[#allocation11 + $0x160] ss:$16 sps:$4 sm:$0xff]  }
 0x393   :  { %5641 = vmatprep.subr.bf16.mxu0 %v8196_v36  ;;  %5805 = vmatprep.subr.bf16.mxu1 %v8199_v25  ;;  %v8283_v36 = vld [vmem:[#allocation11 + $0x18c] ss:$16 sps:$4 sm:$0xff]   ;;  %v8278_v25 = vld [vmem:[#allocation11 + $0x180] ss:$16 sps:$4 sm:$0xff]  }
 0x396   :  { %5642 = vmatpush1.bf16.msra.mxu0 %v8194_v19  ;;  %5806 = vmatpush1.bf16.msra.mxu1 %v8197_v53  ;;  %v8281_v19 = vld [vmem:[#allocation11 + $0x188] ss:$16 sps:$4 sm:$0xff]   ;;  %v8286_v53 = vld [vmem:[#allocation11 + $0x1a4] ss:$16 sps:$4 sm:$0xff]  }
 0x397   :  { %5643 = vmatprep.subr.bf16.mxu0 %v8202_v37  ;;  %5807 = vmatprep.subr.bf16.mxu1 %v8205_v40  ;;  %v8284_v37 = vld [vmem:[#allocation11 + $0x1a0] ss:$16 sps:$4 sm:$0xff]   ;;  %v8287_v40 = vld [vmem:[#allocation11 + $0x1a8] ss:$16 sps:$4 sm:$0xff]  }
 0x39a   :  { %5644 = vmatpush1.bf16.msra.mxu0 %v8200_v41  ;;  %5808 = vmatpush1.bf16.msra.mxu1 %v8203_v42  ;;  %v8292_v41 = vld [vmem:[#allocation11 + $0x1c4] ss:$16 sps:$4 sm:$0xff]   ;;  %v8295_v42 = vld [vmem:[#allocation11 + $0x1cc] ss:$16 sps:$4 sm:$0xff]  }
 0x39b   :  { %6616 = vmatprep.subr.bf16.mxu0 %v8208_v39  ;;  %6698 = vmatprep.subr.bf16.mxu1 %v8211_v43  ;;  %v8293_v39 = vld [vmem:[#allocation11 + $0x1c8] ss:$16 sps:$4 sm:$0xff]   ;;  %v8298_v43 = vld [vmem:[#allocation11 + $0x1e4] ss:$16 sps:$4 sm:$0xff]  }
 0x39d   :  { %5646 = vmatmul.mubr.bf16.vlgmr.msra.gmra.mrb[8].mxu0 %v3930_v34  ;;  %5810 = vmatmul.mubr.bf16.vlgmr.msra.gmra.mrb[8].mxu1 %v3930_v34  ;;  %v8299_v34 = vld [vmem:[#allocation11 + $0x1e8] ss:$16 sps:$4 sm:$0xff]  }
 0x39e   :  { %6617 = vmatpush1.bf16.msra.mxu0 %v8206_v44  ;;  %6699 = vmatpush1.bf16.msra.mxu1 %v8209_v46  ;;  %v8301_v44 = vld [vmem:[#allocation11 + $0x1ec] ss:$16 sps:$4 sm:$0xff]   ;;  %v8296_v46 = vld [vmem:[#allocation11 + $0x1e0] ss:$16 sps:$4 sm:$0xff]  }
 0x39f   :  { %6618 = vmatprep.subr.bf16.mxu0 %v8214_v20  ;;  %6700 = vmatprep.subr.bf16.mxu1 %v8217_v47  ;;  %v8304_v20 = vld [vmem:[#allocation11 + $0x204] ss:$16 sps:$4 sm:$0xff]   ;;  %v8307_v47 = vld [vmem:[#allocation11 + $0x20c] ss:$16 sps:$4 sm:$0xff]  }
 0x3a2   :  { %6619 = vmatpush1.bf16.msra.mxu0 %v8212_v24  ;;  %6701 = vmatpush1.bf16.msra.mxu1 %v8215_v58  ;;  %v8839_v24 = vld [vmem:[#allocation10] sm:$0xf] }
 0x3a3   :  { %6620 = vmatprep.subr.bf16.mxu0 %v8220_v49  ;;  %6702 = vmatprep.subr.bf16.mxu1 %v8223_v4  ;;  %v4193_v58 = vrot.slane %v8839_v24, %v8812_v31  ;;  %v4197_v49 = vrot.slane %v8839_v24, %v8802_v16  ;;  %v4205_v4 = vrot.slane %v8839_v24, %v8815_v35 }
 0x3a6   :  { %6621 = vmatpush1.bf16.msra.mxu0 %v8218_v50  ;;  %6703 = vmatpush1.bf16.msra.mxu1 %v8221_v48 }
 0x3a7   :  { %6622 = vmatprep.subr.bf16.mxu0 %v8226_v51  ;;  %6704 = vmatprep.subr.bf16.mxu1 %v8229_v52 }
 0x3aa   :  { %6623 = vmatpush1.bf16.msra.mxu0 %v8224_v13  ;;  %6705 = vmatpush1.bf16.msra.mxu1 %v8227_v54 }
 0x3ab   :  { %6624 = vmatprep.subr.bf16.mxu0 %v8232_v55  ;;  %6706 = vmatprep.subr.bf16.mxu1 %v8235_v56 }
 0x3ae   :  { %6625 = vmatpush1.bf16.msra.mxu0 %v8230_v59  ;;  %6707 = vmatpush1.bf16.msra.mxu1 %v8233_v60 }
 0x3af   :  { %6626 = vmatprep.subr.bf16.mxu0 %v8238_v61  ;;  %6708 = vmatprep.subr.bf16.mxu1 %v8241_v62 }
 0x3b2   :  { %6627 = vmatpush1.bf16.msra.mxu0 %v8236_v63  ;;  %6709 = vmatpush1.bf16.msra.mxu1 %v8239_v8 }
 0x3b3   :  { %6628 = vmatprep.subr.bf16.mxu0 %v8244_v0  ;;  %6710 = vmatprep.subr.bf16.mxu1 %v8247_v1  ;;  %v8302_v1 = vld [vmem:[#allocation11 + $0x200] ss:$16 sps:$4 sm:$0xff]  }
 0x3b6   :  { %6629 = vmatpush1.bf16.msra.mxu0 %v8242_v3  ;;  %6711 = vmatpush1.bf16.msra.mxu1 %v8245_v38  ;;  %v8305_v3 = vld [vmem:[#allocation11 + $0x208] ss:$16 sps:$4 sm:$0xff]  }
 0x3b7   :  { %6630 = vmatprep.subr.bf16.mxu0 %v8250_v5  ;;  %6712 = vmatprep.subr.bf16.mxu1 %v8253_v6  ;;  %v8310_v5 = vld [vmem:[#allocation11 + $0x224] ss:$16 sps:$4 sm:$0xff]   ;;  %v8313_v6 = vld [vmem:[#allocation11 + $0x22c] ss:$16 sps:$4 sm:$0xff]  }
 0x3ba   :  { %6631 = vmatpush1.bf16.msra.mxu0 %v8248_v7  ;;  %6713 = vmatpush1.bf16.msra.mxu1 %v8251_v10  ;;  %v8308_v10 = vld [vmem:[#allocation11 + $0x220] ss:$16 sps:$4 sm:$0xff]  }
 0x3bb   :  { %6632 = vmatprep.subr.bf16.mxu0 %v8256_v11  ;;  %6714 = vmatprep.subr.bf16.mxu1 %v8259_v14  ;;  %v8311_v11 = vld [vmem:[#allocation11 + $0x228] ss:$16 sps:$4 sm:$0xff]   ;;  %v8316_v14 = vld [vmem:[#allocation11 + $0x244] ss:$16 sps:$4 sm:$0xff]  }
 0x3be   :  { %6633 = vmatpush1.bf16.msra.mxu0 %v8254_v17  ;;  %6715 = vmatpush1.bf16.msra.mxu1 %v8257_v18  ;;  %v8319_v17 = vld [vmem:[#allocation11 + $0x24c] ss:$16 sps:$4 sm:$0xff]   ;;  %v8314_v18 = vld [vmem:[#allocation11 + $0x240] ss:$16 sps:$4 sm:$0xff]  }
 0x3bf   :  { %6634 = vmatprep.subr.bf16.mxu0 %v8262_v21  ;;  %6716 = vmatprep.subr.bf16.mxu1 %v8265_v22  ;;  %v8317_v21 = vld [vmem:[#allocation11 + $0x248] ss:$16 sps:$4 sm:$0xff]   ;;  %v8322_v22 = vld [vmem:[#allocation11 + $0x264] ss:$16 sps:$4 sm:$0xff]  }
 0x3c2   :  { %6635 = vmatpush1.bf16.msra.mxu0 %v8260_v57  ;;  %6717 = vmatpush1.bf16.msra.mxu1 %v8263_v23  ;;  %v8325_v57 = vld [vmem:[#allocation11 + $0x26c] ss:$16 sps:$4 sm:$0xff]   ;;  %v8320_v23 = vld [vmem:[#allocation11 + $0x260] ss:$16 sps:$4 sm:$0xff]  }
 0x3c3   :  { %6636 = vmatprep.subr.bf16.mxu0 %v8268_v26  ;;  %6718 = vmatprep.subr.bf16.mxu1 %v8271_v27  ;;  %v8323_v26 = vld [vmem:[#allocation11 + $0x268] ss:$16 sps:$4 sm:$0xff]   ;;  %v8328_v27 = vld [vmem:[#allocation11 + $0x284] ss:$16 sps:$4 sm:$0xff]  }
 0x3c6   :  { %6637 = vmatpush1.bf16.msra.mxu0 %v8266_v12  ;;  %6719 = vmatpush1.bf16.msra.mxu1 %v8269_v28  ;;  %v8331_v12 = vld [vmem:[#allocation11 + $0x28c] ss:$16 sps:$4 sm:$0xff]   ;;  %v8326_v28 = vld [vmem:[#allocation11 + $0x280] ss:$16 sps:$4 sm:$0xff]  }
 0x3c7   :  { %6638 = vmatprep.subr.bf16.mxu0 %v8274_v29  ;;  %6720 = vmatprep.subr.bf16.mxu1 %v8277_v30  ;;  %v8329_v29 = vld [vmem:[#allocation11 + $0x288] ss:$16 sps:$4 sm:$0xff]   ;;  %v8334_v30 = vld [vmem:[#allocation11 + $0x2a4] ss:$16 sps:$4 sm:$0xff]  }
 0x3ca   :  { %6639 = vmatpush1.bf16.msra.mxu0 %v8272_v32  ;;  %6721 = vmatpush1.bf16.msra.mxu1 %v8275_v33  ;;  %v8337_v32 = vld [vmem:[#allocation11 + $0x2ac] ss:$16 sps:$4 sm:$0xff]   ;;  %v8332_v33 = vld [vmem:[#allocation11 + $0x2a0] ss:$16 sps:$4 sm:$0xff]  }
 0x3cb   :  { %6640 = vmatprep.subr.bf16.mxu0 %v8280_v15  ;;  %6722 = vmatprep.subr.bf16.mxu1 %v8283_v36  ;;  %v8335_v15 = vld [vmem:[#allocation11 + $0x2a8] ss:$16 sps:$4 sm:$0xff]   ;;  %v8340_v36 = vld [vmem:[#allocation11 + $0x2c4] ss:$16 sps:$4 sm:$0xff]  }
 0x3ce   :  { %6641 = vmatpush1.bf16.msra.mxu0 %v8278_v25  ;;  %6723 = vmatpush1.bf16.msra.mxu1 %v8281_v19  ;;  %v8343_v25 = vld [vmem:[#allocation11 + $0x2cc] ss:$16 sps:$4 sm:$0xff]   ;;  %v8338_v19 = vld [vmem:[#allocation11 + $0x2c0] ss:$16 sps:$4 sm:$0xff]  }
 0x3cf   :  { %6642 = vmatprep.subr.bf16.mxu0 %v8286_v53  ;;  %6724 = vmatprep.subr.bf16.mxu1 %v8289_v2  ;;  %v8341_v53 = vld [vmem:[#allocation11 + $0x2c8] ss:$16 sps:$4 sm:$0xff]   ;;  %v8346_v2 = vld [vmem:[#allocation11 + $0x2e4] ss:$16 sps:$4 sm:$0xff]  }
 0x3d2   :  { %6643 = vmatpush1.bf16.msra.mxu0 %v8284_v37  ;;  %6725 = vmatpush1.bf16.msra.mxu1 %v8287_v40  ;;  %v8349_v37 = vld [vmem:[#allocation11 + $0x2ec] ss:$16 sps:$4 sm:$0xff]   ;;  %v8344_v40 = vld [vmem:[#allocation11 + $0x2e0] ss:$16 sps:$4 sm:$0xff]  }
 0x3d3   :  { %6644 = vmatprep.subr.bf16.mxu0 %v8292_v41  ;;  %6726 = vmatprep.subr.bf16.mxu1 %v8295_v42  ;;  %v8347_v41 = vld [vmem:[#allocation11 + $0x2e8] ss:$16 sps:$4 sm:$0xff]   ;;  %v8352_v42 = vld [vmem:[#allocation11 + $0x304] ss:$16 sps:$4 sm:$0xff]  }
 0x3d6   :  { %6645 = vmatpush1.bf16.msra.mxu0 %v8290_v9  ;;  %6727 = vmatpush1.bf16.msra.mxu1 %v8293_v39  ;;  %v8355_v9 = vld [vmem:[#allocation11 + $0x30c] ss:$16 sps:$4 sm:$0xff]   ;;  %v8350_v39 = vld [vmem:[#allocation11 + $0x300] ss:$16 sps:$4 sm:$0xff]  }
 0x3d7   :  { %6646 = vmatprep.subr.bf16.mxu0 %v8298_v43  ;;  %6728 = vmatprep.subr.bf16.mxu1 %v8301_v44  ;;  %v8353_v43 = vld [vmem:[#allocation11 + $0x308] ss:$16 sps:$4 sm:$0xff]   ;;  %v8358_v44 = vld [vmem:[#allocation11 + $0x324] ss:$16 sps:$4 sm:$0xff]  }
 0x3da   :  { %6647 = vmatpush1.bf16.msra.mxu0 %v8296_v46  ;;  %6729 = vmatpush1.bf16.msra.mxu1 %v8299_v34  ;;  %v8361_v46 = vld [vmem:[#allocation11 + $0x32c] ss:$16 sps:$4 sm:$0xff]   ;;  %v8356_v34 = vld [vmem:[#allocation11 + $0x320] ss:$16 sps:$4 sm:$0xff]  }
 0x3db   :  { %6657 = vmatprep.subr.bf16.mxu0 %v8304_v20  ;;  %6739 = vmatprep.subr.bf16.mxu1 %v8307_v47  ;;  %v8359_v20 = vld [vmem:[#allocation11 + $0x328] ss:$16 sps:$4 sm:$0xff]   ;;  %v8364_v47 = vld [vmem:[#allocation11 + $0x344] ss:$16 sps:$4 sm:$0xff]  }
 0x470   :  { %v5647_v50 = vpop.f32.mrb[8].mxu0  ;;  %v8847_v48 = vpop.f32.mrb[8].mxu1 }
 0x471   :  { %v7714_v51 = vadd.f32 %v5647_v50, %v4193_v58  ;;  %v5649_v52 = vpop.f32.mrb[9].mxu0  ;;  %v5813_v13 = vpop.f32.mrb[9].mxu1  ;;  %v8367_v58 = vld [vmem:[#allocation11 + $0x34c] ss:$16 sps:$4 sm:$0xff]   ;;  %v8370_v50 = vld [vmem:[#allocation11 + $0x364] ss:$16 sps:$4 sm:$0xff]  }
 0x472   :  { %v7715_v54 = vadd.f32 %v5649_v52, %v4197_v49  ;;  %v7717_v55 = vadd.f32 %v5813_v13, %v4205_v4  ;;  %v5651_v56 = vpop.f32.mrb[10].mxu0  ;;  %v5815_v59 = vpop.f32.mrb[10].mxu1  ;;  %v8362_v49 = vld [vmem:[#allocation11 + $0x340] ss:$16 sps:$4 sm:$0xff]   ;;  %v8365_v4 = vld [vmem:[#allocation11 + $0x348] ss:$16 sps:$4 sm:$0xff]  }
 0x473   :  { %v5818_v60 = vmax.f32 %v7714_v51, 0.0  ;;  %v5652_v61 = vpop.f32.mrb[11].mxu0  ;;  %v5816_v62 = vpop.f32.mrb[11].mxu1  ;;  %v8373_v51 = vld [vmem:[#allocation11 + $0x36c] ss:$16 sps:$4 sm:$0xff]  }
 0x474   :  { %v5819_v63 = vmax.f32 %v7715_v54, 0.0  ;;  %v5821_v8 = vmax.f32 %v7717_v55, 0.0  ;;  %v8368_v52 = vld [vmem:[#allocation11 + $0x360] ss:$16 sps:$4 sm:$0xff]   ;;  %v8371_v13 = vld [vmem:[#allocation11 + $0x368] ss:$16 sps:$4 sm:$0xff]  }
 0x475   :  { %v5822_v38 = vpack.c.bf16 %v5818_v60, %v5818_v60  ;;  %v8376_v54 = vld [vmem:[#allocation11 + $0x384] ss:$16 sps:$4 sm:$0xff]   ;;  %v8379_v55 = vld [vmem:[#allocation11 + $0x38c] ss:$16 sps:$4 sm:$0xff]   ;;  %v8374_v56 = vld [vmem:[#allocation11 + $0x380] ss:$16 sps:$4 sm:$0xff]  }
 0x476   :  { %v5823_v0 = vpack.c.bf16 %v5819_v63, %v5819_v63  ;;  %v5825_v7 = vpack.c.bf16 %v5821_v8, %v5821_v8  ;;  %v8377_v59 = vld [vmem:[#allocation11 + $0x388] ss:$16 sps:$4 sm:$0xff]   ;;  %v8382_v60 = vld [vmem:[#allocation11 + $0x3a4] ss:$16 sps:$4 sm:$0xff]   ;;  %v8385_v61 = vld [vmem:[#allocation11 + $0x3ac] ss:$16 sps:$4 sm:$0xff]   ;;  %v4201_v8 = vrot.slane %v8839_v24, %v8824_v45 }
 0x477   :  { %v8380_v62 = vld [vmem:[#allocation11 + $0x3a0] ss:$16 sps:$4 sm:$0xff]   ;;  %v8383_v63 = vld [vmem:[#allocation11 + $0x3a8] ss:$16 sps:$4 sm:$0xff]  }
 0x478   :  { %6648 = vmatprep.mubr.bf16.mxu0 %v5823_v0  ;;  %6730 = vmatprep.mubr.bf16.mxu1 %v5823_v0  ;;  %v8388_v0 = vld [vmem:[#allocation11 + $0x3c4] ss:$16 sps:$4 sm:$0xff]  }
 0x479   :  { %6649 = vmatmul.mubr.bf16.vlgmr.msra.gmra.mrb[12].mxu0 %v5822_v38  ;;  %6731 = vmatmul.mubr.bf16.vlgmr.msra.gmra.mrb[12].mxu1 %v5822_v38  ;;  %v8389_v38 = vld [vmem:[#allocation11 + $0x3c8] ss:$16 sps:$4 sm:$0xff]  }
 0x47a   :  { %6658 = vmatpush1.bf16.msra.mxu0 %v8302_v1  ;;  %6740 = vmatpush1.bf16.msra.mxu1 %v8305_v3  ;;  %v8391_v1 = vld [vmem:[#allocation11 + $0x3cc] ss:$16 sps:$4 sm:$0xff]   ;;  %v8386_v3 = vld [vmem:[#allocation11 + $0x3c0] ss:$16 sps:$4 sm:$0xff]  }
 0x47b   :  { %6689 = vmatprep.mubr.bf16.mxu0 %v5825_v7  ;;  %6771 = vmatprep.mubr.bf16.mxu1 %v5825_v7  ;;  %v8397_v7 = vld [vmem:[#allocation11 + $0x3ec] ss:$16 sps:$4 sm:$0xff]  }
 0x47c   :  { %6659 = vmatprep.subr.bf16.mxu0 %v8310_v5  ;;  %6741 = vmatprep.subr.bf16.mxu1 %v8313_v6  ;;  %v7716_v5 = vadd.f32 %v8847_v48, %v4201_v8  ;;  %v8394_v6 = vld [vmem:[#allocation11 + $0x3e4] ss:$16 sps:$4 sm:$0xff]  }
 0x47e   :  { %6660 = vmatpush1.bf16.msra.mxu0 %v8308_v10  ;;  %6742 = vmatpush1.bf16.msra.mxu1 %v8311_v11  ;;  %v8392_v10 = vld [vmem:[#allocation11 + $0x3e0] ss:$16 sps:$4 sm:$0xff]   ;;  %v8395_v11 = vld [vmem:[#allocation11 + $0x3e8] ss:$16 sps:$4 sm:$0xff]  }
 0x47f   :  { %6661 = vmatprep.subr.bf16.mxu0 %v8316_v14  ;;  %6743 = vmatprep.subr.bf16.mxu1 %v8319_v17  ;;  %v5820_v14 = vmax.f32 %v7716_v5, 0.0  ;;  %v5954_v17 = vld [vmem:[#allocation13] sm:$0xf] }
 0x480   :  { %v5967_v48 = vrot.slane %v5954_v17, %v8824_v45 }
 0x481   :  { %v5824_v24 = vpack.c.bf16 %v5820_v14, %v5820_v14 }
 0x482   :  { %6662 = vmatpush1.bf16.msra.mxu0 %v8314_v18  ;;  %6744 = vmatpush1.bf16.msra.mxu1 %v8317_v21  ;;  %v5959_v18 = vrot.slane %v5954_v17, %v8812_v31  ;;  %v5963_v21 = vrot.slane %v5954_v17, %v8802_v16 }
 0x483   :  { %6663 = vmatprep.subr.bf16.mxu0 %v8322_v22  ;;  %6745 = vmatprep.subr.bf16.mxu1 %v8325_v57  ;;  %v5971_v22 = vrot.slane %v5954_v17, %v8815_v35 }
 0x486   :  { %6664 = vmatpush1.bf16.msra.mxu0 %v8320_v23  ;;  %6746 = vmatpush1.bf16.msra.mxu1 %v8323_v26 }
 0x487   :  { %6665 = vmatprep.subr.bf16.mxu0 %v8328_v27  ;;  %6747 = vmatprep.subr.bf16.mxu1 %v8331_v12 }
 0x48a   :  { %6666 = vmatpush1.bf16.msra.mxu0 %v8326_v28  ;;  %6748 = vmatpush1.bf16.msra.mxu1 %v8329_v29 }
 0x48b   :  { %6667 = vmatprep.subr.bf16.mxu0 %v8334_v30  ;;  %6749 = vmatprep.subr.bf16.mxu1 %v8337_v32 }
 0x48e   :  { %6668 = vmatpush1.bf16.msra.mxu0 %v8332_v33  ;;  %6750 = vmatpush1.bf16.msra.mxu1 %v8335_v15 }
 0x48f   :  { %6669 = vmatprep.subr.bf16.mxu0 %v8340_v36  ;;  %6751 = vmatprep.subr.bf16.mxu1 %v8343_v25 }
 0x492   :  { %6670 = vmatpush1.bf16.msra.mxu0 %v8338_v19  ;;  %6752 = vmatpush1.bf16.msra.mxu1 %v8341_v53 }
 0x493   :  { %6671 = vmatprep.subr.bf16.mxu0 %v8346_v2  ;;  %6753 = vmatprep.subr.bf16.mxu1 %v8349_v37 }
 0x496   :  { %6672 = vmatpush1.bf16.msra.mxu0 %v8344_v40  ;;  %6754 = vmatpush1.bf16.msra.mxu1 %v8347_v41 }
 0x497   :  { %6673 = vmatprep.subr.bf16.mxu0 %v8352_v42  ;;  %6755 = vmatprep.subr.bf16.mxu1 %v8355_v9 }
 0x49a   :  { %6674 = vmatpush1.bf16.msra.mxu0 %v8350_v39  ;;  %6756 = vmatpush1.bf16.msra.mxu1 %v8353_v43 }
 0x49b   :  { %6675 = vmatprep.subr.bf16.mxu0 %v8358_v44  ;;  %6757 = vmatprep.subr.bf16.mxu1 %v8361_v46 }
 0x49e   :  { %6676 = vmatpush1.bf16.msra.mxu0 %v8356_v34  ;;  %6758 = vmatpush1.bf16.msra.mxu1 %v8359_v20 }
 0x49f   :  { %6677 = vmatprep.subr.bf16.mxu0 %v8364_v47  ;;  %6759 = vmatprep.subr.bf16.mxu1 %v8367_v58 }
 0x4a2   :  { %6678 = vmatpush1.bf16.msra.mxu0 %v8362_v49  ;;  %6760 = vmatpush1.bf16.msra.mxu1 %v8365_v4 }
 0x4a3   :  { %6679 = vmatprep.subr.bf16.mxu0 %v8370_v50  ;;  %6761 = vmatprep.subr.bf16.mxu1 %v8373_v51 }
 0x4a6   :  { %6680 = vmatpush1.bf16.msra.mxu0 %v8368_v52  ;;  %6762 = vmatpush1.bf16.msra.mxu1 %v8371_v13 }
 0x4a7   :  { %6681 = vmatprep.subr.bf16.mxu0 %v8376_v54  ;;  %6763 = vmatprep.subr.bf16.mxu1 %v8379_v55 }
 0x4aa   :  { %6682 = vmatpush1.bf16.msra.mxu0 %v8374_v56  ;;  %6764 = vmatpush1.bf16.msra.mxu1 %v8377_v59 }
 0x4ab   :  { %6683 = vmatprep.subr.bf16.mxu0 %v8382_v60  ;;  %6765 = vmatprep.subr.bf16.mxu1 %v8385_v61 }
 0x4ae   :  { %6684 = vmatpush1.bf16.msra.mxu0 %v8380_v62  ;;  %6766 = vmatpush1.bf16.msra.mxu1 %v8383_v63 }
 0x4af   :  { %6685 = vmatprep.subr.bf16.mxu0 %v8388_v0  ;;  %6767 = vmatprep.subr.bf16.mxu1 %v8391_v1 }
 0x4b2   :  { %6686 = vmatpush1.bf16.msra.mxu0 %v8386_v3  ;;  %6768 = vmatpush1.bf16.msra.mxu1 %v8389_v38 }
 0x4b3   :  { %6687 = vmatprep.subr.bf16.mxu0 %v8394_v6  ;;  %6769 = vmatprep.subr.bf16.mxu1 %v8397_v7 }
 0x4b6   :  { %6688 = vmatpush1.bf16.msra.mxu0 %v8392_v10  ;;  %6770 = vmatpush1.bf16.msra.mxu1 %v8395_v11 }
 0x4b9   :  { %6690 = vmatmul.mubr.bf16.vlgmr.msra.gmra.mrb[12].mxu0 %v5824_v24  ;;  %6772 = vmatmul.mubr.bf16.vlgmr.msra.gmra.mrb[12].mxu1 %v5824_v24 }
 0x58c   :  { %v6691_v57 = vpop.f32.mrb[12].mxu0  ;;  %v6773_v23 = vpop.f32.mrb[12].mxu1 }
 0x58d   :  { %v7718_v26 = vadd.f32 %v6691_v57, %v5959_v18  ;;  %v7720_v27 = vadd.f32 %v6773_v23, %v5967_v48  ;;  %v6693_v12 = vpop.f32.mrb[13].mxu0  ;;  %v6775_v28 = vpop.f32.mrb[13].mxu1 }
 0x58e   :  { %v7719_v29 = vadd.f32 %v6693_v12, %v5963_v21  ;;  %v7721_v30 = vadd.f32 %v6775_v28, %v5971_v22  ;;  %v6695_v32 = vpop.f32.mrb[14].mxu0  ;;  %v6777_v33 = vpop.f32.mrb[14].mxu1 }
 0x58f   :  { %6780 = vst [vmem:[#allocation14] sm:$0xff] %v7718_v26  ;;  %6782 = vst [vmem:[#allocation14 + $0x10] sm:$0xff] %v7720_v27  ;;  %v6696_v31 = vpop.f32.mrb[15].mxu0  ;;  %v6778_v45 = vpop.f32.mrb[15].mxu1 }
 0x590   :  { %6781 = vst [vmem:[#allocation14 + $0x8] sm:$0xff] %v7719_v29  ;;  %6783 = vst [vmem:[#allocation14 + $0x18] sm:$0xff] %v7721_v30 }
 0x591   :  { %8564 = shalt.err (!%p8561_p4)
}
 0x592   :  { %s8565_s0 = scalar_lea.hbm %s8875_s7, 512 }
 0x593   :  { %p8566_p5 = scmp.ne.s32.totalorder %s8875_s7, %s8565_s0  ;;  %p8569_p6 = scmp.lt.u32.totalorder %s8565_s0, %s8875_s7 }
 0x595   :  { %p8571_p7 = pnand %p8569_p6, %p8566_p5 }
 0x597   :  { %8574 = shalt.err (!%p8571_p7)
}
 0x598   :  { %6793 = dma.vmem_to_hbm [thread:$0]  %s6791_s11, 512, %s8875_s7, [#allocation4]  }
 0x599   :  { %8583 = dma.done.wait [#allocation4], 512  }
 0x59a   :  { %8584 = vsyncadd [#allocation4], 4294966784 }
 0x59b   :  { %6797 = vsyncpa [#allocation3], 1 }
 0x59c   :  { %6798 = vsyncpa [#allocation6], 1 }
 0x59d   :  { %6799 = vsyncpa [#allocation9], 1 }
 0x59e   :  { %6800 = vsyncpa [#allocation12], 1 }
 0x59f   :  { %6801 = vsyncpa [#allocation4], 1 }

</bundles_post_ra>
